<compile_context>
chip_gen: v7x
topology: tpu7x:2x2x1
jax: 0.10.0
libtpu: 0.0.40
codegen_flags: <defaults>
</compile_context>

<pallas_src>
import jax
import jax.numpy as jnp
from jax import lax
from jax.experimental import pallas as pl
from jax.experimental.pallas import tpu as pltpu

_COUT_PAD = 8  # conv2 out-channels padded to one sublane group for the matmul


def _flowhead_kernel(xp_ref, w1_ref, b1_ref, w2t_ref, b2_ref, o_ref, hpad_ref):
    # xp_ref  : (1, H+2, W+2, Cin)   bf16, spatially pre-padded NHWC input tile
    # w1_ref  : (9, Cin, Chid)       bf16, conv1 weights, tap-major (dy, dx)
    # b1_ref  : (1, Chid)            f32
    # w2t_ref : (9, COUT_PAD, Chid)  bf16, conv2 weights transposed per tap,
    #                                out-channels zero-padded to COUT_PAD
    # b2_ref  : (COUT_PAD, 1)        f32
    # o_ref   : (1, Cout, H*W)       f32, NCHW-flat output block (lane = H*W)
    # hpad_ref: VMEM (H+2, W+2, Chid) f32, spatially padded hidden scratch
    H = xp_ref.shape[1] - 2
    W = xp_ref.shape[2] - 2
    Cin = xp_ref.shape[3]
    Chid = hpad_ref.shape[2]
    Cout = o_ref.shape[1]
    Coutp = w2t_ref.shape[1]

    # ---- conv1: 9 per-tap accumulating matmuls (no im2col concat) ----
    # Tap order (dy, dx) row-major must match the wrapper's weight reshape.
    acc1 = jnp.zeros((H * W, Chid), jnp.float32)
    for t in range(9):
        dy, dx = t // 3, t % 3
        x_tap = xp_ref[0, dy:dy + H, dx:dx + W, :].reshape(H * W, Cin)
        acc1 = acc1 + jnp.dot(x_tap, w1_ref[t],
                              preferred_element_type=jnp.float32)
    hidden = jnp.maximum(acc1 + b1_ref[...], 0.0)          # f32 bias + ReLU

    # ---- hidden scratch: zero only the 1-pixel halo, overwrite interior ----
    # (Done every step, not @pl.when(pid==0), so it stays correct if the
    #  "parallel" batch axis is sharded across TensorCores.)
    hpad_ref[0:1, :, :] = jnp.zeros((1, W + 2, Chid), hpad_ref.dtype)
    hpad_ref[H + 1:H + 2, :, :] = jnp.zeros((1, W + 2, Chid), hpad_ref.dtype)
    hpad_ref[:, 0:1, :] = jnp.zeros((H + 2, 1, Chid), hpad_ref.dtype)
    hpad_ref[:, W + 1:W + 2, :] = jnp.zeros((H + 2, 1, Chid), hpad_ref.dtype)
    hpad_ref[1:H + 1, 1:W + 1, :] = hidden.reshape(H, W, Chid).astype(
        hpad_ref.dtype)

    # ---- conv2: 9 per-tap matmuls producing (Coutp, H*W) directly ----
    # dot_general contracts the channel axis of both operands (q @ k^T style),
    # so the result is already in NCHW-flat layout (lane axis = H*W).
    acc2 = jnp.zeros((Coutp, H * W), jnp.float32)
    for t in range(9):
        dy, dx = t // 3, t % 3
        h_tap = hpad_ref[dy:dy + H, dx:dx + W, :].reshape(H * W, Chid)
        acc2 = acc2 + lax.dot_general(
            w2t_ref[t], h_tap.astype(jnp.bfloat16),
            dimension_numbers=(((1,), (1,)), ((), ())),
            preferred_element_type=jnp.float32)
    acc2 = acc2 + b2_ref[...]
    o_ref[...] = acc2[:Cout, :].reshape(1, Cout, H * W).astype(o_ref.dtype)


@jax.jit
def flowhead_forward(x_nchw, w1, b1, w2, b2):
    """x_nchw: (N, Cin, H, W) f32. w1: (3,3,Cin,Chid) HWIO, w2: (3,3,Chid,Cout)."""
    N, Cin, H, W = x_nchw.shape
    Chid = w1.shape[3]
    Cout = w2.shape[3]
    Coutp = _COUT_PAD

    # NCHW -> NHWC, spatial pre-pad (padding fused out of the kernel), bf16.
    x_nhwc = jnp.transpose(x_nchw, (0, 2, 3, 1))
    x_pad = jnp.pad(x_nhwc, ((0, 0), (1, 1), (1, 1), (0, 0))).astype(
        jnp.bfloat16)

    # Tap-major (dy, dx) weight layouts — must stay in lock-step with the
    # kernel's `dy, dx = t // 3, t % 3` loop order.
    w1_taps = w1.reshape(9, Cin, Chid).astype(jnp.bfloat16)
    b1_2d = b1.reshape(1, Chid).astype(jnp.float32)
    w2_t = jnp.transpose(w2.reshape(9, Chid, Cout), (0, 2, 1))   # (9,Cout,Chid)
    w2_taps = jnp.pad(w2_t, ((0, 0), (0, Coutp - Cout), (0, 0))).astype(
        jnp.bfloat16)
    b2_2d = jnp.pad(b2, (0, Coutp - Cout)).reshape(Coutp, 1).astype(jnp.float32)

    out_flat = pl.pallas_call(
        _flowhead_kernel,
        out_shape=jax.ShapeDtypeStruct((N, Cout, H * W), jnp.float32),
        grid_spec=pltpu.PrefetchScalarGridSpec(
            num_scalar_prefetch=0,
            grid=(N,),
            in_specs=[
                pl.BlockSpec((1, H + 2, W + 2, Cin), lambda n: (n, 0, 0, 0)),
                pl.BlockSpec((9, Cin, Chid), lambda n: (0, 0, 0)),
                pl.BlockSpec((1, Chid), lambda n: (0, 0)),
                pl.BlockSpec((9, Coutp, Chid), lambda n: (0, 0, 0)),
                pl.BlockSpec((Coutp, 1), lambda n: (0, 0)),
            ],
            out_specs=pl.BlockSpec((1, Cout, H * W), lambda n: (n, 0, 0)),
            scratch_shapes=[
                pltpu.VMEM((H + 2, W + 2, Chid), jnp.float32),
            ],
        ),
        compiler_params=pltpu.CompilerParams(
            dimension_semantics=("parallel",)),
    )(x_pad, w1_taps, b1_2d, w2_taps, b2_2d)

    # NCHW-flat -> NCHW is a pure reshape (no transpose, no channel slice).
    return out_flat.reshape(N, Cout, H, W)


def _reference_forward(x_nchw, w1, b1, w2, b2, quantize_bf16=False):
    """Pure-JAX reference (lax conv). With quantize_bf16=True it applies the
    same bf16 rounding points as the kernel (x, w1, hidden, w2)."""
    if quantize_bf16:
        q = lambda a: a.astype(jnp.bfloat16).astype(jnp.float32)
    else:
        q = lambda a: a
    x = jnp.transpose(x_nchw, (0, 2, 3, 1))
    dn = lax.conv_dimension_numbers(x.shape, w1.shape, ("NHWC", "HWIO", "NHWC"))
    h = lax.conv_general_dilated(q(x), q(w1), (1, 1), "SAME",
                                 dimension_numbers=dn,
                                 precision=lax.Precision.HIGHEST) + b1
    h = jnp.maximum(h, 0.0)
    o = lax.conv_general_dilated(q(h), q(w2), (1, 1), "SAME",
                                 dimension_numbers=dn,
                                 precision=lax.Precision.HIGHEST) + b2
    return jnp.transpose(o, (0, 3, 1, 2))


if __name__ == "__main__":
    # Module defaults: input_dim=32, hidden_dim=64, output_dim=2.
    N, Cin, H, W = 2, 32, 16, 16
    Chid, Cout = 64, 2

    key = jax.random.PRNGKey(0)
    k_x, k_w1, k_b1, k_w2, k_b2 = jax.random.split(key, 5)

    x = jax.random.normal(k_x, (N, Cin, H, W), jnp.float32)
    # Weights stored HWIO (3, 3, in, out) — deterministic synthetic init.
    w1 = jax.random.normal(k_w1, (3, 3, Cin, Chid), jnp.float32) * 0.05
    b1 = jax.random.normal(k_b1, (Chid,), jnp.float32) * 0.05
    w2 = jax.random.normal(k_w2, (3, 3, Chid, Cout), jnp.float32) * 0.05
    b2 = jax.random.normal(k_b2, (Cout,), jnp.float32) * 0.05

    out = jax.block_until_ready(flowhead_forward(x, w1, b1, w2, b2))
    assert out.shape == (N, Cout, H, W), out.shape

    # Tight check vs a reference with the same bf16 rounding points
    # (proves the conv/tap/layout math is exact up to accumulation order).
    ref_q = _reference_forward(x, w1, b1, w2, b2, quantize_bf16=True)
    err_q = float(jnp.max(jnp.abs(out - ref_q)))
    assert jnp.allclose(out, ref_q, rtol=5e-3, atol=5e-3), err_q

    # Loose check vs the exact f32 module semantics (bf16 operands introduce
    # ~1e-3-level deviations at these scales).
    ref_f = _reference_forward(x, w1, b1, w2, b2, quantize_bf16=False)
    err_f = float(jnp.max(jnp.abs(out - ref_f)))
    assert jnp.allclose(out, ref_f, rtol=2e-2, atol=2e-2), err_f

    print("KERNEL_OK")
</pallas_src>

<mosaic_0001>
module attributes {stable_mosaic.version = 11 : i64} {
  func.func @_flowhead_kernel(%arg0: i32, %arg1: memref<1x18x18x32xbf16, #tpu.memory_space<vmem>>, %arg2: memref<9x32x64xbf16, #tpu.memory_space<vmem>>, %arg3: memref<1x64xf32, #tpu.memory_space<vmem>>, %arg4: memref<9x8x64xbf16, #tpu.memory_space<vmem>>, %arg5: memref<8x1xf32, #tpu.memory_space<vmem>>, %arg6: memref<1x2x256xf32, #tpu.memory_space<vmem>>, %arg7: memref<18x18x64xf32, #tpu.memory_space<vmem>>) attributes {dimension_semantics = [#tpu.dimension_semantics<parallel>], iteration_bounds = array<i64: 2>, scalar_prefetch = 0 : i64, scratch_operands = 1 : i64, tpu.core_type = #tpu.core_type<tc>, window_params = [{transform_indices = @transform_0, window_bounds = array<i64: 1, 18, 18, 32>}, {pipeline_mode = #tpu.pipeline_mode<synchronous>, transform_indices = @transform_1, window_bounds = array<i64: 9, 32, 64>}, {pipeline_mode = #tpu.pipeline_mode<synchronous>, transform_indices = @transform_2, window_bounds = array<i64: 1, 64>}, {pipeline_mode = #tpu.pipeline_mode<synchronous>, transform_indices = @transform_3, window_bounds = array<i64: 9, 8, 64>}, {pipeline_mode = #tpu.pipeline_mode<synchronous>, transform_indices = @transform_4, window_bounds = array<i64: 8, 1>}, {transform_indices = @transform_5, window_bounds = array<i64: 1, 2, 256>}]} {
    %cst = arith.constant 0.000000e+00 : f32
    %0 = vector.broadcast %cst : f32 to vector<256x64xf32>
    %c0 = arith.constant 0 : index
    %c0_0 = arith.constant 0 : index
    %c0_1 = arith.constant 0 : index
    %c0_2 = arith.constant 0 : index
    %1 = vector.load %arg1[%c0, %c0_0, %c0_1, %c0_2] : memref<1x18x18x32xbf16, #tpu.memory_space<vmem>>, vector<1x16x16x32xbf16>
    %2 = vector.shape_cast %1 : vector<1x16x16x32xbf16> to vector<16x16x32xbf16>
    %3 = vector.shape_cast %2 : vector<16x16x32xbf16> to vector<256x32xbf16>
    %c0_3 = arith.constant 0 : index
    %c0_4 = arith.constant 0 : index
    %c0_5 = arith.constant 0 : index
    %4 = vector.load %arg2[%c0_3, %c0_4, %c0_5] : memref<9x32x64xbf16, #tpu.memory_space<vmem>>, vector<1x32x64xbf16>
    %5 = vector.shape_cast %4 : vector<1x32x64xbf16> to vector<32x64xbf16>
    %cst_6 = arith.constant dense<0.000000e+00> : vector<256x64xf32>
    %6 = tpu.matmul %3, %5, %cst_6 {dimension_numbers = #tpu.dot_dimension_numbers<[1], [0], [0], [1], [0, 0, 1, 1], [], []>} : vector<256x32xbf16>, vector<32x64xbf16>, vector<256x64xf32> -> vector<256x64xf32>
    %7 = arith.addf %0, %6 : vector<256x64xf32>
    %c0_7 = arith.constant 0 : index
    %c0_8 = arith.constant 0 : index
    %c1 = arith.constant 1 : index
    %c0_9 = arith.constant 0 : index
    %8 = vector.load %arg1[%c0_7, %c0_8, %c1, %c0_9] : memref<1x18x18x32xbf16, #tpu.memory_space<vmem>>, vector<1x16x16x32xbf16>
    %9 = vector.shape_cast %8 : vector<1x16x16x32xbf16> to vector<16x16x32xbf16>
    %10 = vector.shape_cast %9 : vector<16x16x32xbf16> to vector<256x32xbf16>
    %c1_10 = arith.constant 1 : index
    %c0_11 = arith.constant 0 : index
    %c0_12 = arith.constant 0 : index
    %11 = vector.load %arg2[%c1_10, %c0_11, %c0_12] : memref<9x32x64xbf16, #tpu.memory_space<vmem>>, vector<1x32x64xbf16>
    %12 = vector.shape_cast %11 : vector<1x32x64xbf16> to vector<32x64xbf16>
    %cst_13 = arith.constant dense<0.000000e+00> : vector<256x64xf32>
    %13 = tpu.matmul %10, %12, %cst_13 {dimension_numbers = #tpu.dot_dimension_numbers<[1], [0], [0], [1], [0, 0, 1, 1], [], []>} : vector<256x32xbf16>, vector<32x64xbf16>, vector<256x64xf32> -> vector<256x64xf32>
    %14 = arith.addf %7, %13 : vector<256x64xf32>
    %c0_14 = arith.constant 0 : index
    %c0_15 = arith.constant 0 : index
    %c2 = arith.constant 2 : index
    %c0_16 = arith.constant 0 : index
    %15 = vector.load %arg1[%c0_14, %c0_15, %c2, %c0_16] : memref<1x18x18x32xbf16, #tpu.memory_space<vmem>>, vector<1x16x16x32xbf16>
    %16 = vector.shape_cast %15 : vector<1x16x16x32xbf16> to vector<16x16x32xbf16>
    %17 = vector.shape_cast %16 : vector<16x16x32xbf16> to vector<256x32xbf16>
    %c2_17 = arith.constant 2 : index
    %c0_18 = arith.constant 0 : index
    %c0_19 = arith.constant 0 : index
    %18 = vector.load %arg2[%c2_17, %c0_18, %c0_19] : memref<9x32x64xbf16, #tpu.memory_space<vmem>>, vector<1x32x64xbf16>
    %19 = vector.shape_cast %18 : vector<1x32x64xbf16> to vector<32x64xbf16>
    %cst_20 = arith.constant dense<0.000000e+00> : vector<256x64xf32>
    %20 = tpu.matmul %17, %19, %cst_20 {dimension_numbers = #tpu.dot_dimension_numbers<[1], [0], [0], [1], [0, 0, 1, 1], [], []>} : vector<256x32xbf16>, vector<32x64xbf16>, vector<256x64xf32> -> vector<256x64xf32>
    %21 = arith.addf %14, %20 : vector<256x64xf32>
    %c0_21 = arith.constant 0 : index
    %c1_22 = arith.constant 1 : index
    %c0_23 = arith.constant 0 : index
    %c0_24 = arith.constant 0 : index
    %22 = vector.load %arg1[%c0_21, %c1_22, %c0_23, %c0_24] : memref<1x18x18x32xbf16, #tpu.memory_space<vmem>>, vector<1x16x16x32xbf16>
    %23 = vector.shape_cast %22 : vector<1x16x16x32xbf16> to vector<16x16x32xbf16>
    %24 = vector.shape_cast %23 : vector<16x16x32xbf16> to vector<256x32xbf16>
    %c3 = arith.constant 3 : index
    %c0_25 = arith.constant 0 : index
    %c0_26 = arith.constant 0 : index
    %25 = vector.load %arg2[%c3, %c0_25, %c0_26] : memref<9x32x64xbf16, #tpu.memory_space<vmem>>, vector<1x32x64xbf16>
    %26 = vector.shape_cast %25 : vector<1x32x64xbf16> to vector<32x64xbf16>
    %cst_27 = arith.constant dense<0.000000e+00> : vector<256x64xf32>
    %27 = tpu.matmul %24, %26, %cst_27 {dimension_numbers = #tpu.dot_dimension_numbers<[1], [0], [0], [1], [0, 0, 1, 1], [], []>} : vector<256x32xbf16>, vector<32x64xbf16>, vector<256x64xf32> -> vector<256x64xf32>
    %28 = arith.addf %21, %27 : vector<256x64xf32>
    %c0_28 = arith.constant 0 : index
    %c1_29 = arith.constant 1 : index
    %c1_30 = arith.constant 1 : index
    %c0_31 = arith.constant 0 : index
    %29 = vector.load %arg1[%c0_28, %c1_29, %c1_30, %c0_31] : memref<1x18x18x32xbf16, #tpu.memory_space<vmem>>, vector<1x16x16x32xbf16>
    %30 = vector.shape_cast %29 : vector<1x16x16x32xbf16> to vector<16x16x32xbf16>
    %31 = vector.shape_cast %30 : vector<16x16x32xbf16> to vector<256x32xbf16>
    %c4 = arith.constant 4 : index
    %c0_32 = arith.constant 0 : index
    %c0_33 = arith.constant 0 : index
    %32 = vector.load %arg2[%c4, %c0_32, %c0_33] : memref<9x32x64xbf16, #tpu.memory_space<vmem>>, vector<1x32x64xbf16>
    %33 = vector.shape_cast %32 : vector<1x32x64xbf16> to vector<32x64xbf16>
    %cst_34 = arith.constant dense<0.000000e+00> : vector<256x64xf32>
    %34 = tpu.matmul %31, %33, %cst_34 {dimension_numbers = #tpu.dot_dimension_numbers<[1], [0], [0], [1], [0, 0, 1, 1], [], []>} : vector<256x32xbf16>, vector<32x64xbf16>, vector<256x64xf32> -> vector<256x64xf32>
    %35 = arith.addf %28, %34 : vector<256x64xf32>
    %c0_35 = arith.constant 0 : index
    %c1_36 = arith.constant 1 : index
    %c2_37 = arith.constant 2 : index
    %c0_38 = arith.constant 0 : index
    %36 = vector.load %arg1[%c0_35, %c1_36, %c2_37, %c0_38] : memref<1x18x18x32xbf16, #tpu.memory_space<vmem>>, vector<1x16x16x32xbf16>
    %37 = vector.shape_cast %36 : vector<1x16x16x32xbf16> to vector<16x16x32xbf16>
    %38 = vector.shape_cast %37 : vector<16x16x32xbf16> to vector<256x32xbf16>
    %c5 = arith.constant 5 : index
    %c0_39 = arith.constant 0 : index
    %c0_40 = arith.constant 0 : index
    %39 = vector.load %arg2[%c5, %c0_39, %c0_40] : memref<9x32x64xbf16, #tpu.memory_space<vmem>>, vector<1x32x64xbf16>
    %40 = vector.shape_cast %39 : vector<1x32x64xbf16> to vector<32x64xbf16>
    %cst_41 = arith.constant dense<0.000000e+00> : vector<256x64xf32>
    %41 = tpu.matmul %38, %40, %cst_41 {dimension_numbers = #tpu.dot_dimension_numbers<[1], [0], [0], [1], [0, 0, 1, 1], [], []>} : vector<256x32xbf16>, vector<32x64xbf16>, vector<256x64xf32> -> vector<256x64xf32>
    %42 = arith.addf %35, %41 : vector<256x64xf32>
    %c0_42 = arith.constant 0 : index
    %c2_43 = arith.constant 2 : index
    %c0_44 = arith.constant 0 : index
    %c0_45 = arith.constant 0 : index
    %43 = vector.load %arg1[%c0_42, %c2_43, %c0_44, %c0_45] : memref<1x18x18x32xbf16, #tpu.memory_space<vmem>>, vector<1x16x16x32xbf16>
    %44 = vector.shape_cast %43 : vector<1x16x16x32xbf16> to vector<16x16x32xbf16>
    %45 = vector.shape_cast %44 : vector<16x16x32xbf16> to vector<256x32xbf16>
    %c6 = arith.constant 6 : index
    %c0_46 = arith.constant 0 : index
    %c0_47 = arith.constant 0 : index
    %46 = vector.load %arg2[%c6, %c0_46, %c0_47] : memref<9x32x64xbf16, #tpu.memory_space<vmem>>, vector<1x32x64xbf16>
    %47 = vector.shape_cast %46 : vector<1x32x64xbf16> to vector<32x64xbf16>
    %cst_48 = arith.constant dense<0.000000e+00> : vector<256x64xf32>
    %48 = tpu.matmul %45, %47, %cst_48 {dimension_numbers = #tpu.dot_dimension_numbers<[1], [0], [0], [1], [0, 0, 1, 1], [], []>} : vector<256x32xbf16>, vector<32x64xbf16>, vector<256x64xf32> -> vector<256x64xf32>
    %49 = arith.addf %42, %48 : vector<256x64xf32>
    %c0_49 = arith.constant 0 : index
    %c2_50 = arith.constant 2 : index
    %c1_51 = arith.constant 1 : index
    %c0_52 = arith.constant 0 : index
    %50 = vector.load %arg1[%c0_49, %c2_50, %c1_51, %c0_52] : memref<1x18x18x32xbf16, #tpu.memory_space<vmem>>, vector<1x16x16x32xbf16>
    %51 = vector.shape_cast %50 : vector<1x16x16x32xbf16> to vector<16x16x32xbf16>
    %52 = vector.shape_cast %51 : vector<16x16x32xbf16> to vector<256x32xbf16>
    %c7 = arith.constant 7 : index
    %c0_53 = arith.constant 0 : index
    %c0_54 = arith.constant 0 : index
    %53 = vector.load %arg2[%c7, %c0_53, %c0_54] : memref<9x32x64xbf16, #tpu.memory_space<vmem>>, vector<1x32x64xbf16>
    %54 = vector.shape_cast %53 : vector<1x32x64xbf16> to vector<32x64xbf16>
    %cst_55 = arith.constant dense<0.000000e+00> : vector<256x64xf32>
    %55 = tpu.matmul %52, %54, %cst_55 {dimension_numbers = #tpu.dot_dimension_numbers<[1], [0], [0], [1], [0, 0, 1, 1], [], []>} : vector<256x32xbf16>, vector<32x64xbf16>, vector<256x64xf32> -> vector<256x64xf32>
    %56 = arith.addf %49, %55 : vector<256x64xf32>
    %c0_56 = arith.constant 0 : index
    %c2_57 = arith.constant 2 : index
    %c2_58 = arith.constant 2 : index
    %c0_59 = arith.constant 0 : index
    %57 = vector.load %arg1[%c0_56, %c2_57, %c2_58, %c0_59] : memref<1x18x18x32xbf16, #tpu.memory_space<vmem>>, vector<1x16x16x32xbf16>
    %58 = vector.shape_cast %57 : vector<1x16x16x32xbf16> to vector<16x16x32xbf16>
    %59 = vector.shape_cast %58 : vector<16x16x32xbf16> to vector<256x32xbf16>
    %c8 = arith.constant 8 : index
    %c0_60 = arith.constant 0 : index
    %c0_61 = arith.constant 0 : index
    %60 = vector.load %arg2[%c8, %c0_60, %c0_61] : memref<9x32x64xbf16, #tpu.memory_space<vmem>>, vector<1x32x64xbf16>
    %61 = vector.shape_cast %60 : vector<1x32x64xbf16> to vector<32x64xbf16>
    %cst_62 = arith.constant dense<0.000000e+00> : vector<256x64xf32>
    %62 = tpu.matmul %59, %61, %cst_62 {dimension_numbers = #tpu.dot_dimension_numbers<[1], [0], [0], [1], [0, 0, 1, 1], [], []>} : vector<256x32xbf16>, vector<32x64xbf16>, vector<256x64xf32> -> vector<256x64xf32>
    %63 = arith.addf %56, %62 : vector<256x64xf32>
    %c0_63 = arith.constant 0 : index
    %c0_64 = arith.constant 0 : index
    %64 = vector.load %arg3[%c0_63, %c0_64] : memref<1x64xf32, #tpu.memory_space<vmem>>, vector<1x64xf32>
    %65 = vector.broadcast %64 : vector<1x64xf32> to vector<256x64xf32>
    %66 = arith.addf %63, %65 : vector<256x64xf32>
    %cst_65 = arith.constant 0.000000e+00 : f32
    %67 = vector.broadcast %cst_65 : f32 to vector<256x64xf32>
    %68 = arith.maximumf %66, %67 : vector<256x64xf32>
    %cst_66 = arith.constant 0.000000e+00 : f32
    %69 = vector.broadcast %cst_66 : f32 to vector<1x18x64xf32>
    %c0_67 = arith.constant 0 : index
    %c0_68 = arith.constant 0 : index
    %c0_69 = arith.constant 0 : index
    %70 = vector.load %arg7[%c0_67, %c0_68, %c0_69] : memref<18x18x64xf32, #tpu.memory_space<vmem>>, vector<1x18x64xf32>
    tpu.vector_store %arg7[%c0_67, %c0_68, %c0_69], %69 {strides = array<i32>} : memref<18x18x64xf32, #tpu.memory_space<vmem>>, vector<1x18x64xf32>,
    %cst_70 = arith.constant 0.000000e+00 : f32
    %71 = vector.broadcast %cst_70 : f32 to vector<1x18x64xf32>
    %c17 = arith.constant 17 : index
    %c0_71 = arith.constant 0 : index
    %c0_72 = arith.constant 0 : index
    %72 = vector.load %arg7[%c17, %c0_71, %c0_72] : memref<18x18x64xf32, #tpu.memory_space<vmem>>, vector<1x18x64xf32>
    tpu.vector_store %arg7[%c17, %c0_71, %c0_72], %71 {strides = array<i32>} : memref<18x18x64xf32, #tpu.memory_space<vmem>>, vector<1x18x64xf32>,
    %cst_73 = arith.constant 0.000000e+00 : f32
    %73 = vector.broadcast %cst_73 : f32 to vector<18x1x64xf32>
    %c0_74 = arith.constant 0 : index
    %c0_75 = arith.constant 0 : index
    %c0_76 = arith.constant 0 : index
    %74 = vector.load %arg7[%c0_74, %c0_75, %c0_76] : memref<18x18x64xf32, #tpu.memory_space<vmem>>, vector<18x1x64xf32>
    tpu.vector_store %arg7[%c0_74, %c0_75, %c0_76], %73 {strides = array<i32>} : memref<18x18x64xf32, #tpu.memory_space<vmem>>, vector<18x1x64xf32>,
    %cst_77 = arith.constant 0.000000e+00 : f32
    %75 = vector.broadcast %cst_77 : f32 to vector<18x1x64xf32>
    %c0_78 = arith.constant 0 : index
    %c17_79 = arith.constant 17 : index
    %c0_80 = arith.constant 0 : index
    %76 = vector.load %arg7[%c0_78, %c17_79, %c0_80] : memref<18x18x64xf32, #tpu.memory_space<vmem>>, vector<18x1x64xf32>
    tpu.vector_store %arg7[%c0_78, %c17_79, %c0_80], %75 {strides = array<i32>} : memref<18x18x64xf32, #tpu.memory_space<vmem>>, vector<18x1x64xf32>,
    %77 = vector.shape_cast %68 : vector<256x64xf32> to vector<16x16x64xf32>
    %c1_81 = arith.constant 1 : index
    %c1_82 = arith.constant 1 : index
    %c0_83 = arith.constant 0 : index
    %78 = vector.load %arg7[%c1_81, %c1_82, %c0_83] : memref<18x18x64xf32, #tpu.memory_space<vmem>>, vector<16x16x64xf32>
    tpu.vector_store %arg7[%c1_81, %c1_82, %c0_83], %77 {strides = array<i32>} : memref<18x18x64xf32, #tpu.memory_space<vmem>>, vector<16x16x64xf32>,
    %cst_84 = arith.constant 0.000000e+00 : f32
    %79 = vector.broadcast %cst_84 : f32 to vector<8x256xf32>
    %c0_85 = arith.constant 0 : index
    %c0_86 = arith.constant 0 : index
    %c0_87 = arith.constant 0 : index
    %80 = vector.load %arg7[%c0_85, %c0_86, %c0_87] : memref<18x18x64xf32, #tpu.memory_space<vmem>>, vector<16x16x64xf32>
    %81 = vector.shape_cast %80 : vector<16x16x64xf32> to vector<256x64xf32>
    %c0_88 = arith.constant 0 : index
    %c0_89 = arith.constant 0 : index
    %c0_90 = arith.constant 0 : index
    %82 = vector.load %arg4[%c0_88, %c0_89, %c0_90] : memref<9x8x64xbf16, #tpu.memory_space<vmem>>, vector<1x8x64xbf16>
    %83 = vector.shape_cast %82 : vector<1x8x64xbf16> to vector<8x64xbf16>
    %84 = arith.truncf %81 : vector<256x64xf32> to vector<256x64xbf16>
    %cst_91 = arith.constant dense<0.000000e+00> : vector<8x256xf32>
    %85 = tpu.matmul %83, %84, %cst_91 {dimension_numbers = #tpu.dot_dimension_numbers<[1], [1], [0], [0], [0, 0, 1, 0], [], []>} : vector<8x64xbf16>, vector<256x64xbf16>, vector<8x256xf32> -> vector<8x256xf32>
    %86 = arith.addf %79, %85 : vector<8x256xf32>
    %c0_92 = arith.constant 0 : index
    %c1_93 = arith.constant 1 : index
    %c0_94 = arith.constant 0 : index
    %87 = vector.load %arg7[%c0_92, %c1_93, %c0_94] : memref<18x18x64xf32, #tpu.memory_space<vmem>>, vector<16x16x64xf32>
    %88 = vector.shape_cast %87 : vector<16x16x64xf32> to vector<256x64xf32>
    %c1_95 = arith.constant 1 : index
    %c0_96 = arith.constant 0 : index
    %c0_97 = arith.constant 0 : index
    %89 = vector.load %arg4[%c1_95, %c0_96, %c0_97] : memref<9x8x64xbf16, #tpu.memory_space<vmem>>, vector<1x8x64xbf16>
    %90 = vector.shape_cast %89 : vector<1x8x64xbf16> to vector<8x64xbf16>
    %91 = arith.truncf %88 : vector<256x64xf32> to vector<256x64xbf16>
    %cst_98 = arith.constant dense<0.000000e+00> : vector<8x256xf32>
    %92 = tpu.matmul %90, %91, %cst_98 {dimension_numbers = #tpu.dot_dimension_numbers<[1], [1], [0], [0], [0, 0, 1, 0], [], []>} : vector<8x64xbf16>, vector<256x64xbf16>, vector<8x256xf32> -> vector<8x256xf32>
    %93 = arith.addf %86, %92 : vector<8x256xf32>
    %c0_99 = arith.constant 0 : index
    %c2_100 = arith.constant 2 : index
    %c0_101 = arith.constant 0 : index
    %94 = vector.load %arg7[%c0_99, %c2_100, %c0_101] : memref<18x18x64xf32, #tpu.memory_space<vmem>>, vector<16x16x64xf32>
    %95 = vector.shape_cast %94 : vector<16x16x64xf32> to vector<256x64xf32>
    %c2_102 = arith.constant 2 : index
    %c0_103 = arith.constant 0 : index
    %c0_104 = arith.constant 0 : index
    %96 = vector.load %arg4[%c2_102, %c0_103, %c0_104] : memref<9x8x64xbf16, #tpu.memory_space<vmem>>, vector<1x8x64xbf16>
    %97 = vector.shape_cast %96 : vector<1x8x64xbf16> to vector<8x64xbf16>
    %98 = arith.truncf %95 : vector<256x64xf32> to vector<256x64xbf16>
    %cst_105 = arith.constant dense<0.000000e+00> : vector<8x256xf32>
    %99 = tpu.matmul %97, %98, %cst_105 {dimension_numbers = #tpu.dot_dimension_numbers<[1], [1], [0], [0], [0, 0, 1, 0], [], []>} : vector<8x64xbf16>, vector<256x64xbf16>, vector<8x256xf32> -> vector<8x256xf32>
    %100 = arith.addf %93, %99 : vector<8x256xf32>
    %c1_106 = arith.constant 1 : index
    %c0_107 = arith.constant 0 : index
    %c0_108 = arith.constant 0 : index
    %101 = vector.load %arg7[%c1_106, %c0_107, %c0_108] : memref<18x18x64xf32, #tpu.memory_space<vmem>>, vector<16x16x64xf32>
    %102 = vector.shape_cast %101 : vector<16x16x64xf32> to vector<256x64xf32>
    %c3_109 = arith.constant 3 : index
    %c0_110 = arith.constant 0 : index
    %c0_111 = arith.constant 0 : index
    %103 = vector.load %arg4[%c3_109, %c0_110, %c0_111] : memref<9x8x64xbf16, #tpu.memory_space<vmem>>, vector<1x8x64xbf16>
    %104 = vector.shape_cast %103 : vector<1x8x64xbf16> to vector<8x64xbf16>
    %105 = arith.truncf %102 : vector<256x64xf32> to vector<256x64xbf16>
    %cst_112 = arith.constant dense<0.000000e+00> : vector<8x256xf32>
    %106 = tpu.matmul %104, %105, %cst_112 {dimension_numbers = #tpu.dot_dimension_numbers<[1], [1], [0], [0], [0, 0, 1, 0], [], []>} : vector<8x64xbf16>, vector<256x64xbf16>, vector<8x256xf32> -> vector<8x256xf32>
    %107 = arith.addf %100, %106 : vector<8x256xf32>
    %c1_113 = arith.constant 1 : index
    %c1_114 = arith.constant 1 : index
    %c0_115 = arith.constant 0 : index
    %108 = vector.load %arg7[%c1_113, %c1_114, %c0_115] : memref<18x18x64xf32, #tpu.memory_space<vmem>>, vector<16x16x64xf32>
    %109 = vector.shape_cast %108 : vector<16x16x64xf32> to vector<256x64xf32>
    %c4_116 = arith.constant 4 : index
    %c0_117 = arith.constant 0 : index
    %c0_118 = arith.constant 0 : index
    %110 = vector.load %arg4[%c4_116, %c0_117, %c0_118] : memref<9x8x64xbf16, #tpu.memory_space<vmem>>, vector<1x8x64xbf16>
    %111 = vector.shape_cast %110 : vector<1x8x64xbf16> to vector<8x64xbf16>
    %112 = arith.truncf %109 : vector<256x64xf32> to vector<256x64xbf16>
    %cst_119 = arith.constant dense<0.000000e+00> : vector<8x256xf32>
    %113 = tpu.matmul %111, %112, %cst_119 {dimension_numbers = #tpu.dot_dimension_numbers<[1], [1], [0], [0], [0, 0, 1, 0], [], []>} : vector<8x64xbf16>, vector<256x64xbf16>, vector<8x256xf32> -> vector<8x256xf32>
    %114 = arith.addf %107, %113 : vector<8x256xf32>
    %c1_120 = arith.constant 1 : index
    %c2_121 = arith.constant 2 : index
    %c0_122 = arith.constant 0 : index
    %115 = vector.load %arg7[%c1_120, %c2_121, %c0_122] : memref<18x18x64xf32, #tpu.memory_space<vmem>>, vector<16x16x64xf32>
    %116 = vector.shape_cast %115 : vector<16x16x64xf32> to vector<256x64xf32>
    %c5_123 = arith.constant 5 : index
    %c0_124 = arith.constant 0 : index
    %c0_125 = arith.constant 0 : index
    %117 = vector.load %arg4[%c5_123, %c0_124, %c0_125] : memref<9x8x64xbf16, #tpu.memory_space<vmem>>, vector<1x8x64xbf16>
    %118 = vector.shape_cast %117 : vector<1x8x64xbf16> to vector<8x64xbf16>
    %119 = arith.truncf %116 : vector<256x64xf32> to vector<256x64xbf16>
    %cst_126 = arith.constant dense<0.000000e+00> : vector<8x256xf32>
    %120 = tpu.matmul %118, %119, %cst_126 {dimension_numbers = #tpu.dot_dimension_numbers<[1], [1], [0], [0], [0, 0, 1, 0], [], []>} : vector<8x64xbf16>, vector<256x64xbf16>, vector<8x256xf32> -> vector<8x256xf32>
    %121 = arith.addf %114, %120 : vector<8x256xf32>
    %c2_127 = arith.constant 2 : index
    %c0_128 = arith.constant 0 : index
    %c0_129 = arith.constant 0 : index
    %122 = vector.load %arg7[%c2_127, %c0_128, %c0_129] : memref<18x18x64xf32, #tpu.memory_space<vmem>>, vector<16x16x64xf32>
    %123 = vector.shape_cast %122 : vector<16x16x64xf32> to vector<256x64xf32>
    %c6_130 = arith.constant 6 : index
    %c0_131 = arith.constant 0 : index
    %c0_132 = arith.constant 0 : index
    %124 = vector.load %arg4[%c6_130, %c0_131, %c0_132] : memref<9x8x64xbf16, #tpu.memory_space<vmem>>, vector<1x8x64xbf16>
    %125 = vector.shape_cast %124 : vector<1x8x64xbf16> to vector<8x64xbf16>
    %126 = arith.truncf %123 : vector<256x64xf32> to vector<256x64xbf16>
    %cst_133 = arith.constant dense<0.000000e+00> : vector<8x256xf32>
    %127 = tpu.matmul %125, %126, %cst_133 {dimension_numbers = #tpu.dot_dimension_numbers<[1], [1], [0], [0], [0, 0, 1, 0], [], []>} : vector<8x64xbf16>, vector<256x64xbf16>, vector<8x256xf32> -> vector<8x256xf32>
    %128 = arith.addf %121, %127 : vector<8x256xf32>
    %c2_134 = arith.constant 2 : index
    %c1_135 = arith.constant 1 : index
    %c0_136 = arith.constant 0 : index
    %129 = vector.load %arg7[%c2_134, %c1_135, %c0_136] : memref<18x18x64xf32, #tpu.memory_space<vmem>>, vector<16x16x64xf32>
    %130 = vector.shape_cast %129 : vector<16x16x64xf32> to vector<256x64xf32>
    %c7_137 = arith.constant 7 : index
    %c0_138 = arith.constant 0 : index
    %c0_139 = arith.constant 0 : index
    %131 = vector.load %arg4[%c7_137, %c0_138, %c0_139] : memref<9x8x64xbf16, #tpu.memory_space<vmem>>, vector<1x8x64xbf16>
    %132 = vector.shape_cast %131 : vector<1x8x64xbf16> to vector<8x64xbf16>
    %133 = arith.truncf %130 : vector<256x64xf32> to vector<256x64xbf16>
    %cst_140 = arith.constant dense<0.000000e+00> : vector<8x256xf32>
    %134 = tpu.matmul %132, %133, %cst_140 {dimension_numbers = #tpu.dot_dimension_numbers<[1], [1], [0], [0], [0, 0, 1, 0], [], []>} : vector<8x64xbf16>, vector<256x64xbf16>, vector<8x256xf32> -> vector<8x256xf32>
    %135 = arith.addf %128, %134 : vector<8x256xf32>
    %c2_141 = arith.constant 2 : index
    %c2_142 = arith.constant 2 : index
    %c0_143 = arith.constant 0 : index
    %136 = vector.load %arg7[%c2_141, %c2_142, %c0_143] : memref<18x18x64xf32, #tpu.memory_space<vmem>>, vector<16x16x64xf32>
    %137 = vector.shape_cast %136 : vector<16x16x64xf32> to vector<256x64xf32>
    %c8_144 = arith.constant 8 : index
    %c0_145 = arith.constant 0 : index
    %c0_146 = arith.constant 0 : index
    %138 = vector.load %arg4[%c8_144, %c0_145, %c0_146] : memref<9x8x64xbf16, #tpu.memory_space<vmem>>, vector<1x8x64xbf16>
    %139 = vector.shape_cast %138 : vector<1x8x64xbf16> to vector<8x64xbf16>
    %140 = arith.truncf %137 : vector<256x64xf32> to vector<256x64xbf16>
    %cst_147 = arith.constant dense<0.000000e+00> : vector<8x256xf32>
    %141 = tpu.matmul %139, %140, %cst_147 {dimension_numbers = #tpu.dot_dimension_numbers<[1], [1], [0], [0], [0, 0, 1, 0], [], []>} : vector<8x64xbf16>, vector<256x64xbf16>, vector<8x256xf32> -> vector<8x256xf32>
    %142 = arith.addf %135, %141 : vector<8x256xf32>
    %c0_148 = arith.constant 0 : index
    %c0_149 = arith.constant 0 : index
    %143 = vector.load %arg5[%c0_148, %c0_149] : memref<8x1xf32, #tpu.memory_space<vmem>>, vector<8x1xf32>
    %144 = vector.broadcast %143 : vector<8x1xf32> to vector<8x256xf32>
    %145 = arith.addf %142, %144 : vector<8x256xf32>
    %146 = vector.extract_strided_slice %145 {offsets = [0, 0], sizes = [2, 256], strides = [1, 1]} : vector<8x256xf32> to vector<2x256xf32>
    %147 = vector.shape_cast %146 : vector<2x256xf32> to vector<1x2x256xf32>
    %c0_150 = arith.constant 0 : index
    %c0_151 = arith.constant 0 : index
    %c0_152 = arith.constant 0 : index
    %148 = vector.load %arg6[%c0_150, %c0_151, %c0_152] : memref<1x2x256xf32, #tpu.memory_space<vmem>>, vector<1x2x256xf32>
    tpu.vector_store %arg6[%c0_150, %c0_151, %c0_152], %147 {strides = array<i32>} : memref<1x2x256xf32, #tpu.memory_space<vmem>>, vector<1x2x256xf32>,
    return
  }
  func.func @transform_0(%arg0: i32) -> (i32, i32, i32, i32) {
    %c0_i32 = arith.constant 0 : i32
    %c0_i32_0 = arith.constant 0 : i32
    %c0_i32_1 = arith.constant 0 : i32
    %c0_i32_2 = arith.constant 0 : i32
    return %arg0, %c0_i32, %c0_i32_0, %c0_i32_1 : i32, i32, i32, i32
  }
  func.func @transform_1(%arg0: i32) -> (i32, i32, i32) {
    %c0_i32 = arith.constant 0 : i32
    %c0_i32_0 = arith.constant 0 : i32
    %c0_i32_1 = arith.constant 0 : i32
    %c0_i32_2 = arith.constant 0 : i32
    return %c0_i32, %c0_i32_0, %c0_i32_1 : i32, i32, i32
  }
  func.func @transform_2(%arg0: i32) -> (i32, i32) {
    %c0_i32 = arith.constant 0 : i32
    %c0_i32_0 = arith.constant 0 : i32
    %c0_i32_1 = arith.constant 0 : i32
    return %c0_i32, %c0_i32_0 : i32, i32
  }
  func.func @transform_3(%arg0: i32) -> (i32, i32, i32) {
    %c0_i32 = arith.constant 0 : i32
    %c0_i32_0 = arith.constant 0 : i32
    %c0_i32_1 = arith.constant 0 : i32
    %c0_i32_2 = arith.constant 0 : i32
    return %c0_i32, %c0_i32_0, %c0_i32_1 : i32, i32, i32
  }
  func.func @transform_4(%arg0: i32) -> (i32, i32) {
    %c0_i32 = arith.constant 0 : i32
    %c0_i32_0 = arith.constant 0 : i32
    %c0_i32_1 = arith.constant 0 : i32
    return %c0_i32, %c0_i32_0 : i32, i32
  }
  func.func @transform_5(%arg0: i32) -> (i32, i32, i32) {
    %c0_i32 = arith.constant 0 : i32
    %c0_i32_0 = arith.constant 0 : i32
    %c0_i32_1 = arith.constant 0 : i32
    return %arg0, %c0_i32, %c0_i32_0 : i32, i32, i32
  }
}

</mosaic_0001>

<bundles_post_ra>
// kernel: flowhead_forward.1
= control target key start
LH: loop header
LB: loop body
LE: loop exit
PB: predicated region body
PF: predicated region fallthrough
CT: control target
= control target key end

     0   :  { %s8117_s18 = smov 0   ;;  %s10406_s0 = inlined_call_operand.vmem [shape: bf16[2,18,18,32], index: 0, kind: input, shape index: {}]   ;;  %s10407_s1 = inlined_call_operand.vmem [shape: bf16[9,32,64], index: 1, kind: input, shape index: {}]   ;;  %s10408_s2 = inlined_call_operand.vmem [shape: f32[1,64], index: 2, kind: input, shape index: {}]   ;;  %s10409_s3 = inlined_call_operand.vmem [shape: bf16[9,8,64], index: 3, kind: input, shape index: {}]   ;;  %s10410_s4 = inlined_call_operand.vmem [shape: f32[8,1], index: 4, kind: input, shape index: {}]   ;;  %s10411_s5 = inlined_call_operand.vmem [shape: f32[2,2,256], index: 5, kind: output, shape index: {}]  }
   0x1 LB: > { %s6409_s19 = sadd.s32 4294967295, %s8083_s18   ;;  %p6413_p0 = scmp.ge.s32.totalorder %s8083_s18, 1  ;;  %s8083_s18 = sphi %s8117_s18, %s15_s18  }
   0x2   : > { %p187_p1 = scmp.lt.s32.totalorder %s8083_s18, 3 }
   0x4   : > { %p188_p2 = pnand %p6413_p0, %p187_p1 }
   0x6   : > { %191 = sbr.rel (%p188_p2) target bundleno = 1599 (0x63f), region = 40 }
   0xd   : > { %v8005_v0 = vld [vmem:[%s10407_s1 + $0x10] sm:$0xff]   ;;  %p215_p3 = scmp.lt.s32.totalorder %s6409_s19, 1  ;;  %v8006_v1 = vld [vmem:[%s10407_s1 + $0x18] sm:$0xff]   ;;  %v8137_v2 = vld [vmem:[%s10407_s1] sm:$0xff]   ;;  %vm278_vm0 = vsmask.f32 3328 }
   0xe   : > { %7341 = vmatprep.subr.bf16.mxu0 %v8005_v0  ;;  %vm279_vm1 = vsmask.f32 7440  ;;  %vm730_vm3 = vcmask 261120   ;;  %vm1289_vm4 = vcmask 1042432   ;;  %vm1290_vm5 = vcmask 1046532  }
   0xf   : > { %s10511_s19 = smov (!%p215_p3, %s6409_s19), 1  ;;  %7342 = vmatpush3.bf16.msra.mxu0 %v8005_v0  ;;  %vm8175_vm2 = vmor %vm278_vm0, %vm279_vm1  ;;  %vm4963_vm7 = vcmask 523264   ;;  %vm4972_vm8 = vcmask 516096   ;;  %vm4966_vm9 = vcmask 517120  }
  0x10   : > { %7343 = vmatprep.subr.bf16.mxu0 %v8006_v1  ;;  %s7993_s24 = smul.u32 216, %s10511_s19  ;;  %vm8486_vm6 = vmor %vm1289_vm4, %vm1290_vm5  ;;  %s7016_s12 = sshll.u32 %s10511_s19, 2 }
  0x11   : > { %s224_s14 = scalar_lea.vmem %s10411_s5, %s7016_s12 }
  0x12   : > { %s8142_s29 = scalar_lea.vmem %s10406_s0, %s7993_s24 }
  0x13   : > { %7344 = vmatpush3.bf16.msra.mxu0 %v8006_v1  ;;  %v8145_v3 = vld [vmem:[%s8142_s29] sm:$0xf]  ;;  %v8148_v4 = vld [vmem:[%s8142_s29 + $0x4] sm:$0xf]  ;;  %v262_v5 = vld [vmem:[%s8142_s29 + $0x8] sm:$0x1] }
  0x14   : > { %v282_v6 = vshrl.u32 %v8145_v3, 16  ;;  %v285_v7 = vshll.u32 %v8145_v3, 16  ;;  %v291_v8 = vshll.u32 %v8148_v4, 16  ;;  %v295_v9 = vshrl.u32 %v8148_v4, 16  ;;  %7377 = vmatprep.subr.bf16.mxu0 %v8137_v2  ;;  %v8157_v10 = vld [vmem:[%s8142_s29 + $0xc] sm:$0xf] }
  0x15   : > { %v301_v11 = vshll.u32 %v262_v5, 16  ;;  %v8160_v12 = vld [vmem:[%s8142_s29 + $0x10] sm:$0xf]  ;;  %v8163_v13 = vld [vmem:[%s8142_s29 + $0x14] sm:$0x1]  ;;  %v306_v19 = vshrl.u32 %v8157_v10, 16 }
  0x16   : > { %v284_v14 = vrot.slane %v282_v6, 4  ;;  %v287_v15 = vrot.slane %v285_v7, 5  ;;  %v293_v16 = vrot.slane %v291_v8, 5  ;;  %v297_v17 = vrot.slane %v295_v9, 4  ;;  %v8171_v26 = vld [vmem:[%s8142_s29 + $0x18] sm:$0xf] }
  0x17   : > { %v303_v18 = vrot.slane %v301_v11, 5  ;;  %v309_v20 = vshll.u32 %v8157_v10, 16  ;;  %v315_v21 = vshll.u32 %v8160_v12, 16  ;;  %v319_v24 = vshrl.u32 %v8160_v12, 16  ;;  %v8180_v31 = vld [vmem:[%s8142_s29 + $0x1c] sm:$0xf] }
  0x18   : > { %v288_v22 = vor.u32 %v287_v15, %v284_v14  ;;  %v298_v23 = vor.u32 %v297_v17, %v293_v16  ;;  %v325_v25 = vshll.u32 %v8163_v13, 16  ;;  %v308_v28 = vrot.slane %v306_v19, 4  ;;  %v264_v38 = vld [vmem:[%s8142_s29 + $0x20] sm:$0x1]  ;;  %v8193_v45 = vld [vmem:[%s8142_s29 + $0x24] sm:$0xf] }
  0x19   : > { %v311_v29 = vrot.slane %v309_v20, 5  ;;  %v317_v30 = vrot.slane %v315_v21, 5  ;;  %v321_v34 = vrot.slane %v319_v24, 4  ;;  %v330_v39 = vshrl.u32 %v8171_v26, 16  ;;  %v8196_v50 = vld [vmem:[%s8142_s29 + $0x28] sm:$0xf] }
  0x1a   : > { %v289_v32 = vrot.slane %v288_v22, 4  ;;  %v299_v33 = vrot.slane %v298_v23, 4  ;;  %v327_v37 = vrot.slane %v325_v25, 5  ;;  %v333_v40 = vshll.u32 %v8171_v26, 16  ;;  %v265_v57 = vld [vmem:[%s8142_s29 + $0x2c] sm:$0x1] }
  0x1b   : > { %v312_v36 = vor.u32 %v311_v29, %v308_v28  ;;  %v322_v43 = vor.u32 %v321_v34, %v317_v30  ;;  %v339_v44 = vshll.u32 %v8180_v31, 16  ;;  %v332_v48 = vrot.slane %v330_v39, 4  ;;  %v8209_v0 = vld [vmem:[%s8142_s29 + $0x30] sm:$0xf]  ;;  %v8212_v8 = vld [vmem:[%s8142_s29 + $0x34] sm:$0xf] }
  0x1c   : > { %v294_v41 = vsel %vm8175_vm2, %v289_v32, %v293_v16  ;;  %v304_v42 = vsel %vm8175_vm2, %v299_v33, %v303_v18  ;;  %v335_v49 = vrot.slane %v333_v40, 5  ;;  %v343_v53 = vshrl.u32 %v8180_v31, 16  ;;  %v8008_v9 = vld [vmem:[%s10407_s1 + $0x8] sm:$0xff]   ;;  %v8222_v19 = vld [vmem:[%s8142_s29 + $0x38] sm:$0x1]  ;;  %v8231_v28 = vld [vmem:[%s10407_s1 + $0x20] sm:$0xff]  }
  0x1d   : > { %v6421_v46 = vcombine.low %v294_v41, %v304_v42  ;;  %v313_v47 = vrot.slane %v312_v36, 4  ;;  %v323_v51 = vrot.slane %v322_v43, 4  ;;  %v341_v52 = vrot.slane %v339_v44, 5  ;;  %v8235_v34 = vld [vmem:[%s8142_s29 + $0x3c] sm:$0xf] }
  0x1e   : > { %v349_v54 = vshll.u32 %v264_v38, 16  ;;  %v336_v56 = vor.u32 %v335_v49, %v332_v48  ;;  %v354_v58 = vshrl.u32 %v8193_v45, 16  ;;  %v357_v59 = vshll.u32 %v8193_v45, 16  ;;  %v8241_v39 = vld [vmem:[%s8142_s29 + $0x40] sm:$0xf] }
  0x1f   : > { %7345 = vmatprep.mubr.msk.bf16.mxu0 %vm730_vm3, %v6421_v46  ;;  %v318_v55 = vsel %vm8175_vm2, %v313_v47, %v317_v30  ;;  %v328_v60 = vsel %vm8175_vm2, %v323_v51, %v327_v37  ;;  %v345_v61 = vrot.slane %v343_v53, 4  ;;  %v363_v63 = vshll.u32 %v8196_v50, 16  ;;  %v8246_v44 = vld [vmem:[%s8142_s29 + $0x44] sm:$0x1] }
  0x20   : > { %v351_v62 = vrot.slane %v349_v54, 5  ;;  %v6422_v1 = vcombine.low %v318_v55, %v328_v60  ;;  %v337_v5 = vrot.slane %v336_v56, 4  ;;  %v356_v6 = vrot.slane %v354_v58, 4  ;;  %v8254_v55 = vld [vmem:[%s8142_s29 + $0x48] sm:$0xf] }
  0x21   : > { %v359_v7 = vrot.slane %v357_v59, 5  ;;  %v346_v11 = vor.u32 %v345_v61, %v341_v52  ;;  %v365_v14 = vrot.slane %v363_v63, 5  ;;  %v367_v15 = vshrl.u32 %v8196_v50, 16  ;;  %v8261_v60 = vld [vmem:[%s8142_s29 + $0x4c] sm:$0xf] }
  0x22   : > { %v373_v16 = vshll.u32 %v265_v57, 16  ;;  %7346 = vmatmul.mubr.msk.bf16.vlgmr.msra.gmra.mrb[0].mxu0 %vm730_vm3, %v6422_v1  ;;  %v342_v17 = vsel %vm8175_vm2, %v337_v5, %v341_v52  ;;  %v378_v20 = vshrl.u32 %v8209_v0, 16  ;;  %v381_v21 = vshll.u32 %v8209_v0, 16 }
  0x23   : > { %v360_v18 = vor.u32 %v359_v7, %v356_v6  ;;  %7378 = vmatpush3.bf16.msra.mxu0 %v8137_v2  ;;  %v347_v22 = vrot.slane %v346_v11, 4  ;;  %v369_v23 = vrot.slane %v367_v15, 4  ;;  %v387_v25 = vshll.u32 %v8212_v8, 16 }
  0x24   : > { %v375_v24 = vrot.slane %v373_v16, 5  ;;  %v380_v30 = vrot.slane %v378_v20, 4  ;;  %v383_v32 = vrot.slane %v381_v21, 5  ;;  %v391_v33 = vshrl.u32 %v8212_v8, 16  ;;  %7379 = vmatprep.subr.bf16.mxu0 %v8008_v9 }
  0x25   : > { %v361_v29 = vrot.slane %v360_v18, 4  ;;  %v352_v2 = vsel %vm8175_vm2, %v347_v22, %v351_v62  ;;  %v370_v36 = vor.u32 %v369_v23, %v365_v14  ;;  %v389_v37 = vrot.slane %v387_v25, 5  ;;  %v8276_v18 = vld [vmem:[%s8142_s29 + $0x54] sm:$0xf] }
  0x26   : > { %v397_v38 = vshll.u32 %v8222_v19, 16  ;;  %v6423_v40 = vcombine.low %v342_v17, %v352_v2  ;;  %v384_v42 = vor.u32 %v383_v32, %v380_v30  ;;  %v393_v43 = vrot.slane %v391_v33, 4 }
  0x27   : > { %v366_v41 = vsel %vm8175_vm2, %v361_v29, %v365_v14  ;;  %v371_v46 = vrot.slane %v370_v36, 4  ;;  %v402_v48 = vshrl.u32 %v8235_v34, 16  ;;  %v405_v49 = vshll.u32 %v8235_v34, 16  ;;  %7380 = vmatpush3.bf16.msra.mxu0 %v8008_v9  ;;  %v8266_v9 = vld [vmem:[%s8142_s29 + $0x50] sm:$0x1] }
  0x28   : > { %v399_v47 = vrot.slane %v397_v38, 5  ;;  %7349 = vmatprep.mubr.msk.bf16.mxu0 %vm730_vm3, %v6423_v40  ;;  %v385_v51 = vrot.slane %v384_v42, 4  ;;  %v394_v52 = vor.u32 %v393_v43, %v389_v37  ;;  %v411_v53 = vshll.u32 %v8241_v39, 16  ;;  %7413 = vmatprep.subr.bf16.mxu0 %v8231_v28  ;;  %v8288_v42 = vld [vmem:[%s8142_s29 + $0x5c] sm:$0x1] }
  0x29   : > { %v415_v54 = vshrl.u32 %v8241_v39, 16  ;;  %v376_v56 = vsel %vm8175_vm2, %v371_v46, %v375_v24  ;;  %v404_v57 = vrot.slane %v402_v48, 4  ;;  %v407_v58 = vrot.slane %v405_v49, 5  ;;  %v8279_v24 = vld [vmem:[%s8142_s29 + $0x58] sm:$0xf] }
  0x2a   : > { %v421_v59 = vshll.u32 %v8246_v44, 16  ;;  %v6424_v61 = vcombine.low %v366_v41, %v376_v56  ;;  %v390_v62 = vsel %vm8175_vm2, %v385_v51, %v389_v37  ;;  %v395_v63 = vrot.slane %v394_v52, 4  ;;  %v8292_v46 = vld [vmem:[%s8142_s29 + $0x60] sm:$0xf]  ;;  %v8298_v52 = vld [vmem:[%s8142_s29 + $0x64] sm:$0xf] }
  0x2b   : > { %v413_v1 = vrot.slane %v411_v53, 5  ;;  %v408_v5 = vor.u32 %v407_v58, %v404_v57  ;;  %v417_v6 = vrot.slane %v415_v54, 4  ;;  %v426_v11 = vshrl.u32 %v8254_v55, 16 }
  0x2c   : > { %v423_v7 = vrot.slane %v421_v59, 5  ;;  %7350 = vmatmul.mubr.msk.bf16.gmra.mrb[4].mxu0 %vm730_vm3, %v6424_v61  ;;  %v400_v14 = vsel %vm8175_vm2, %v395_v63, %v399_v47  ;;  %v429_v15 = vshll.u32 %v8254_v55, 16  ;;  %v435_v16 = vshll.u32 %v8261_v60, 16 }
  0x2d   : > { %v439_v17 = vshrl.u32 %v8261_v60, 16  ;;  %v6425_v20 = vcombine.low %v390_v62, %v400_v14  ;;  %v409_v21 = vrot.slane %v408_v5, 4  ;;  %v418_v22 = vor.u32 %v417_v6, %v413_v1  ;;  %v8308_v5 = vld [vmem:[%s8142_s29 + $0x68] sm:$0x1] }
  0x2e   : > { %v428_v23 = vrot.slane %v426_v11, 4  ;;  %v431_v25 = vrot.slane %v429_v15, 5  ;;  %v437_v29 = vrot.slane %v435_v16, 5  ;;  %v445_v32 = vshll.u32 %v8266_v9, 16  ;;  %10435 = vst [vmem:[#allocation3_spill] sm:$0xff] %v8308_v5 }
  0x2f   : > { %v441_v30 = vrot.slane %v439_v17, 4  ;;  %7353 = vmatprep.mubr.msk.bf16.mxu0 %vm730_vm3, %v6425_v20  ;;  %v414_v33 = vsel %vm8175_vm2, %v409_v21, %v413_v1  ;;  %v419_v2 = vrot.slane %v418_v22, 4  ;;  %v450_v36 = vshrl.u32 %v8276_v18, 16  ;;  %v8313_v11 = vld [vmem:[%s8142_s29 + $0x6c] sm:$0xf] }
  0x30   : > { %v453_v37 = vshll.u32 %v8276_v18, 16  ;;  %v432_v38 = vor.u32 %v431_v25, %v428_v23  ;;  %v447_v41 = vrot.slane %v445_v32, 5  ;;  %v459_v43 = vshll.u32 %v8279_v24, 16  ;;  %v8316_v20 = vld [vmem:[%s8142_s29 + $0x70] sm:$0xf] }
  0x31   : > { %v442_v40 = vor.u32 %v441_v30, %v437_v29  ;;  %v424_v47 = vsel %vm8175_vm2, %v419_v2, %v423_v7  ;;  %v452_v48 = vrot.slane %v450_v36, 4  ;;  %v463_v51 = vshrl.u32 %v8279_v24, 16 }
  0x32   : > { %v455_v49 = vrot.slane %v453_v37, 5  ;;  %v6426_v53 = vcombine.low %v414_v33, %v424_v47  ;;  %v433_v54 = vrot.slane %v432_v38, 4  ;;  %v461_v57 = vrot.slane %v459_v43, 5  ;;  %v8324_v33 = vld [vmem:[%s8142_s29 + $0x74] sm:$0x1] }
  0x33   : > { %v443_v56 = vrot.slane %v442_v40, 4  ;;  %v465_v59 = vrot.slane %v463_v51, 4  ;;  %v469_v61 = vshll.u32 %v8288_v42, 16  ;;  %v474_v62 = vshrl.u32 %v8292_v46, 16  ;;  %10436 = vst [vmem:[#allocation4_spill] sm:$0xff] %v8324_v33 }
  0x34   : > { %v456_v58 = vor.u32 %v455_v49, %v452_v48  ;;  %7354 = vmatmul.mubr.msk.bf16.gmra.mrb[8].mxu0 %vm730_vm3, %v6426_v53  ;;  %v438_v63 = vsel %vm8175_vm2, %v433_v54, %v437_v29  ;;  %v477_v6 = vshll.u32 %v8292_v46, 16  ;;  %v483_v7 = vshll.u32 %v8298_v52, 16 }
  0x35   : > { %v448_v1 = vsel %vm8175_vm2, %v443_v56, %v447_v41  ;;  %v466_v16 = vor.u32 %v465_v59, %v461_v57  ;;  %v471_v17 = vrot.slane %v469_v61, 5  ;;  %v476_v21 = vrot.slane %v474_v62, 4  ;;  %v8330_v41 = vld [vmem:[%s8142_s29 + $0x78] sm:$0xf] }
  0x36   : > { %v6427_v14 = vcombine.low %v438_v63, %v448_v1  ;;  %v457_v15 = vrot.slane %v456_v58, 4  ;;  %v479_v22 = vrot.slane %v477_v6, 5  ;;  %v485_v23 = vrot.slane %v483_v7, 5  ;;  %v8339_v58 = vld [vmem:[%s8142_s29 + $0x80] sm:$0x1] }
  0x37   : > { %v487_v25 = vshrl.u32 %v8298_v52, 16  ;;  %v467_v30 = vrot.slane %v466_v16, 4  ;;  %v493_v32 = vshll.u32 %v8308_v5, 16  ;;  %v498_v2 = vshrl.u32 %v8313_v11, 16  ;;  %10437 = vst [vmem:[#allocation5_spill] sm:$0xff] %v8339_v58 }
  0x38   : > { %7357 = vmatprep.mubr.msk.bf16.mxu0 %vm730_vm3, %v6427_v14  ;;  %v462_v29 = vsel %vm8175_vm2, %v457_v15, %v461_v57  ;;  %v480_v36 = vor.u32 %v479_v22, %v476_v21  ;;  %v501_v38 = vshll.u32 %v8313_v11, 16  ;;  %v507_v40 = vshll.u32 %v8316_v20, 16  ;;  %v8336_v57 = vld [vmem:[%s8142_s29 + $0x7c] sm:$0xf]  ;;  %v8344_v1 = vld [vmem:[%s8142_s29 + $0x84] sm:$0xf] }
  0x39   : > { %v489_v37 = vrot.slane %v487_v25, 4  ;;  %v472_v43 = vsel %vm8175_vm2, %v467_v30, %v471_v17  ;;  %v495_v47 = vrot.slane %v493_v32, 5  ;;  %v500_v48 = vrot.slane %v498_v2, 4  ;;  %v8351_v16 = vld [vmem:[%s8142_s29 + $0x88] sm:$0xf] }
  0x3a   : > { %v511_v49 = vshrl.u32 %v8316_v20, 16  ;;  %v6428_v51 = vcombine.low %v462_v29, %v472_v43  ;;  %v481_v53 = vrot.slane %v480_v36, 4  ;;  %v503_v56 = vrot.slane %v501_v38, 5  ;;  %v8358_v2 = vld [vmem:[%s8142_s29 + $0x8c] sm:$0x1] }
  0x3b   : > { %v490_v54 = vor.u32 %v489_v37, %v485_v23  ;;  %v509_v59 = vrot.slane %v507_v40, 5  ;;  %v517_v62 = vshll.u32 %v8324_v33, 16  ;;  %v522_v63 = vshrl.u32 %v8330_v41, 16  ;;  %10438 = vst [vmem:[#allocation6_spill] sm:$0xff] %v8358_v2  ;;  %v8362_v43 = vld [vmem:[%s8142_s29 + $0x90] sm:$0xf] }
  0x3c   : > { %v513_v61 = vrot.slane %v511_v49, 4  ;;  %7358 = vmatmul.mubr.msk.bf16.gmra.mrb[12].mxu0 %vm730_vm3, %v6428_v51  ;;  %v486_v6 = vsel %vm8175_vm2, %v481_v53, %v485_v23  ;;  %v504_v14 = vor.u32 %v503_v56, %v500_v48  ;;  %v525_v15 = vshll.u32 %v8330_v41, 16  ;;  %v8368_v53 = vld [vmem:[%s8142_s29 + $0x94] sm:$0xf] }
  0x3d   : > { %v491_v7 = vrot.slane %v490_v54, 4  ;;  %v519_v21 = vrot.slane %v517_v62, 5  ;;  %v524_v22 = vrot.slane %v522_v63, 4  ;;  %v531_v25 = vshll.u32 %v8336_v57, 16 }
  0x3e   : > { %v514_v17 = vor.u32 %v513_v61, %v509_v59  ;;  %v505_v30 = vrot.slane %v504_v14, 4  ;;  %v527_v32 = vrot.slane %v525_v15, 5  ;;  %v535_v23 = vshrl.u32 %v8336_v57, 16 }
  0x3f   : > { %v496_v29 = vsel %vm8175_vm2, %v491_v7, %v495_v47  ;;  %v533_v38 = vrot.slane %v531_v25, 5  ;;  %v541_v40 = vshll.u32 %v8339_v58, 16  ;;  %v546_v47 = vshrl.u32 %v8344_v1, 16  ;;  %v8378_v25 = vld [vmem:[%s8142_s29 + $0x98] sm:$0x1] }
  0x40   : > { %v6429_v36 = vcombine.low %v486_v6, %v496_v29  ;;  %v515_v37 = vrot.slane %v514_v17, 4  ;;  %v510_v48 = vsel %vm8175_vm2, %v505_v30, %v509_v59  ;;  %v528_v49 = vor.u32 %v527_v32, %v524_v22  ;;  %10439 = vst [vmem:[#allocation7_spill] sm:$0xff] %v8378_v25  ;;  %v8381_v29 = vld [vmem:[%s8142_s29 + $0x9c] sm:$0xf] }
  0x41   : > { %v537_v51 = vrot.slane %v535_v23, 4  ;;  %v543_v56 = vrot.slane %v541_v40, 5  ;;  %v549_v61 = vshll.u32 %v8344_v1, 16  ;;  %v555_v62 = vshll.u32 %v8351_v16, 16  ;;  %v8435_v58 = vld [vmem:[%s8142_s29 + $0xbc] sm:$0x1] }
  0x42   : > { %7361 = vmatprep.mubr.msk.bf16.mxu0 %vm730_vm3, %v6429_v36  ;;  %v520_v54 = vsel %vm8175_vm2, %v515_v37, %v519_v21  ;;  %v529_v59 = vrot.slane %v528_v49, 4  ;;  %v548_v7 = vrot.slane %v546_v47, 4  ;;  %v559_v17 = vshrl.u32 %v8351_v16, 16 }
  0x43   : > { %v6430_v63 = vcombine.low %v510_v48, %v520_v54  ;;  %v538_v6 = vor.u32 %v537_v51, %v533_v38  ;;  %v551_v14 = vrot.slane %v549_v61, 5  ;;  %v557_v15 = vrot.slane %v555_v62, 5 }
  0x44   : > { %v565_v22 = vshll.u32 %v8358_v2, 16  ;;  %v534_v21 = vsel %vm8175_vm2, %v529_v59, %v533_v38  ;;  %v570_v32 = vshrl.u32 %v8362_v43, 16  ;;  %v573_v23 = vshll.u32 %v8362_v43, 16  ;;  %v8393_v38 = vld [vmem:[%s8142_s29 + $0xa0] sm:$0xf] }
  0x45   : > { %7362 = vmatmul.mubr.msk.bf16.gmra.mrb[16].mxu0 %vm730_vm3, %v6430_v63  ;;  %v539_v30 = vrot.slane %v538_v6, 4  ;;  %v552_v36 = vor.u32 %v551_v14, %v548_v7  ;;  %v561_v37 = vrot.slane %v559_v17, 4  ;;  %v579_v48 = vshll.u32 %v8368_v53, 16  ;;  %v8396_v6 = vld [vmem:[%s8142_s29 + $0xa4] sm:$0x1] }
  0x46   : > { %v567_v40 = vrot.slane %v565_v22, 5  ;;  %v572_v51 = vrot.slane %v570_v32, 4  ;;  %v575_v47 = vrot.slane %v573_v23, 5  ;;  %v583_v54 = vshrl.u32 %v8368_v53, 16  ;;  %10440 = vst [vmem:[#allocation8_spill] sm:$0xff] %v8396_v6 }
  0x47   : > { %v544_v49 = vsel %vm8175_vm2, %v539_v30, %v543_v56  ;;  %v553_v62 = vrot.slane %v552_v36, 4  ;;  %v562_v63 = vor.u32 %v561_v37, %v557_v15  ;;  %v581_v59 = vrot.slane %v579_v48, 5  ;;  %v8401_v56 = vld [vmem:[%s8142_s29 + $0xa8] sm:$0xf]  ;;  %v8409_v36 = vld [vmem:[%s8142_s29 + $0xac] sm:$0xf] }
  0x48   : > { %v6431_v61 = vcombine.low %v534_v21, %v544_v49  ;;  %v576_v7 = vor.u32 %v575_v47, %v572_v51  ;;  %v585_v14 = vrot.slane %v583_v54, 4  ;;  %v589_v17 = vshll.u32 %v8378_v25, 16 }
  0x49   : > { %v594_v22 = vshrl.u32 %v8381_v29, 16  ;;  %v558_v30 = vsel %vm8175_vm2, %v553_v62, %v557_v15  ;;  %v563_v21 = vrot.slane %v562_v63, 4  ;;  %v597_v32 = vshll.u32 %v8381_v29, 16  ;;  %v8415_v15 = vld [vmem:[%s8142_s29 + $0xb0] sm:$0x1] }
  0x4a   : > { %7365 = vmatprep.mubr.msk.bf16.mxu0 %vm730_vm3, %v6431_v61  ;;  %v603_v23 = vshll.u32 %v8393_v38, 16  ;;  %v577_v37 = vrot.slane %v576_v7, 4  ;;  %v586_v48 = vor.u32 %v585_v14, %v581_v59  ;;  %v591_v49 = vrot.slane %v589_v17, 5  ;;  %10441 = vst [vmem:[#allocation9_spill] sm:$0xff] %v8415_v15 }
  0x4b   : > { %v596_v51 = vrot.slane %v594_v22, 4  ;;  %v568_v47 = vsel %vm8175_vm2, %v563_v21, %v567_v40  ;;  %v599_v54 = vrot.slane %v597_v32, 5  ;;  %v607_v61 = vshrl.u32 %v8393_v38, 16 }
  0x4c   : > { %v605_v35 = vrot.slane %v603_v23, 5  ;;  %v6432_v62 = vcombine.low %v558_v30, %v568_v47  ;;  %v582_v63 = vsel %vm8175_vm2, %v577_v37, %v581_v59  ;;  %v587_v25 = vrot.slane %v586_v48, 4  ;;  %v8428_v23 = vld [vmem:[%s8142_s29 + $0xb4] sm:$0xf] }
  0x4d   : > { %v613_v7 = vshll.u32 %v8396_v6, 16  ;;  %v600_v14 = vor.u32 %v599_v54, %v596_v51  ;;  %v609_v17 = vrot.slane %v607_v61, 4  ;;  %v618_v22 = vshrl.u32 %v8401_v56, 16  ;;  %v8431_v54 = vld [vmem:[%s8142_s29 + $0xb8] sm:$0xf] }
  0x4e   : > { %v621_v40 = vshll.u32 %v8401_v56, 16  ;;  %7366 = vmatmul.mubr.msk.bf16.gmra.mrb[20].mxu0 %vm730_vm3, %v6432_v62  ;;  %v592_v21 = vsel %vm8175_vm2, %v587_v25, %v591_v49  ;;  %v627_v32 = vshll.u32 %v8409_v36, 16  ;;  %v631_v59 = vshrl.u32 %v8409_v36, 16 }
  0x4f   : > { %v615_v30 = vrot.slane %v613_v7, 5  ;;  %v6433_v37 = vcombine.low %v582_v63, %v592_v21  ;;  %v601_v48 = vrot.slane %v600_v14, 4  ;;  %v610_v51 = vor.u32 %v609_v17, %v605_v35 }
  0x50   : > { %v620_v47 = vrot.slane %v618_v22, 4  ;;  %v623_v61 = vrot.slane %v621_v40, 5  ;;  %v629_v6 = vrot.slane %v627_v32, 5  ;;  %v633_v2 = vrot.slane %v631_v59, 4 }
  0x51   : > { %v637_v62 = vshll.u32 %v8415_v15, 16  ;;  %7369 = vmatprep.mubr.msk.bf16.mxu0 %vm730_vm3, %v6433_v37  ;;  %v606_v25 = vsel %vm8175_vm2, %v601_v48, %v605_v35  ;;  %v611_v49 = vrot.slane %v610_v51, 4  ;;  %v642_v63 = vshrl.u32 %v8428_v23, 16 }
  0x52   : > { %v645_v7 = vshll.u32 %v8428_v23, 16  ;;  %v624_v14 = vor.u32 %v623_v61, %v620_v47  ;;  %v634_v17 = vor.u32 %v633_v2, %v629_v6  ;;  %v651_v40 = vshll.u32 %v8431_v54, 16 }
  0x53   : > { %v639_v22 = vrot.slane %v637_v62, 5  ;;  %v616_v21 = vsel %vm8175_vm2, %v611_v49, %v615_v30  ;;  %v644_v32 = vrot.slane %v642_v63, 4  ;;  %v655_v37 = vshrl.u32 %v8431_v54, 16 }
  0x54   : > { %v647_v59 = vrot.slane %v645_v7, 5  ;;  %v6434_v15 = vcombine.low %v606_v25, %v616_v21  ;;  %v625_v33 = vrot.slane %v624_v14, 4  ;;  %v635_v35 = vrot.slane %v634_v17, 4 }
  0x55   : > { %v653_v48 = vrot.slane %v651_v40, 5  ;;  %v657_v5 = vrot.slane %v655_v37, 4  ;;  %v661_v47 = vshll.u32 %v8435_v58, 16  ;;  %v6456_v2 = vcombine.low %v8157_v10, %v8160_v12 }
  0x56   : > { %v648_v51 = vor.u32 %v647_v59, %v644_v32  ;;  %v1301_v61 = vrot.slane %v8160_v12, 5  ;;  %v1304_v30 = vrot.slane %v8163_v13, 5  ;;  %7370 = vmatmul.mubr.msk.bf16.gmra.mrb[24].mxu0 %vm730_vm3, %v6434_v15  ;;  %v630_v62 = vsel %vm8175_vm2, %v625_v33, %v629_v6  ;;  %v1242_v33 = vld [vmem:[%s8142_s29 + $0xc] sm:$0xe]  ;;  %v1252_v59 = vld [vmem:[%s8142_s29 + $0x84] sm:$0xe] }
  0x57   : > { %v640_v25 = vsel %vm8175_vm2, %v635_v35, %v639_v22  ;;  %v658_v7 = vor.u32 %v657_v5, %v653_v48  ;;  %v663_v14 = vrot.slane %v661_v47, 5  ;;  %v6459_v17 = vcombine.low %v8209_v0, %v8212_v8  ;;  %v1250_v35 = vld [vmem:[%s8142_s29 + $0x6c] sm:$0xe]  ;;  %v1253_v32 = vld [vmem:[%s8142_s29 + $0x90] sm:$0xe] }
  0x58   : > { %v6435_v49 = vcombine.low %v630_v62, %v640_v25  ;;  %v649_v63 = vrot.slane %v648_v51, 4  ;;  %v6460_v10 = vcombine.low %v8235_v34, %v8241_v39  ;;  %v6461_v12 = vcombine.low %v8254_v55, %v8261_v60  ;;  %v9938_v47 = vld [vmem:[%s10409_s3 + $0x4] sm:$0xf] }
  0x59   : > { %v659_v5 = vrot.slane %v658_v7, 4  ;;  %v6490_v62 = vrot.slane %v1242_v33, 9  ;;  %v1303_v25 = vrot.slane %v1301_v61, 4  ;;  %v1249_v33 = vld [vmem:[%s8142_s29 + $0x60] sm:$0xe]  ;;  %v10452_v55 = vcombine.low %v8276_v18, %v8279_v24  ;;  %7195 = vmatprep.mubr.msk.bf16.mxu1 %vm4963_vm7, %v9938_v47 }
  0x5a   : > { %7373 = vmatprep.mubr.msk.bf16.mxu0 %vm730_vm3, %v6435_v49  ;;  %v654_v6 = vsel %vm8175_vm2, %v649_v63, %v653_v48  ;;  %v1245_v49 = vld [vmem:[%s8142_s29 + $0x30] sm:$0xe]  ;;  %v10444_v63 = vcombine.low %v8145_v3, %v8148_v4  ;;  %v6457_v3 = vcombine.low %v8171_v26, %v8180_v31  ;;  %v1325_v4 = vrot.slane %v8222_v19, 5 }
  0x5b   : > { %v664_v37 = vsel %vm8175_vm2, %v659_v5, %v663_v14  ;;  %v8498_v7 = vsel %vm8486_vm6, %v6490_v62, %v1301_v61  ;;  %v8502_v14 = vsel %vm8486_vm6, %v1303_v25, %v1304_v30  ;;  %v1247_v5 = vld [vmem:[%s8142_s29 + $0x48] sm:$0xe]  ;;  %v1248_v61 = vld [vmem:[%s8142_s29 + $0x54] sm:$0xe]  ;;  %v1332_v48 = vrot.slane %v8246_v44, 5 }
  0x5c   : > { %v6436_v51 = vcombine.low %v654_v6, %v664_v37  ;;  %v1246_v6 = vld [vmem:[%s8142_s29 + $0x3c] sm:$0xe]  ;;  %v6493_v37 = vrot.slane %v1245_v49, 9  ;;  %v8019_v49 = vld [vmem:[%s10407_s1 + $0x28] sm:$0xff]   ;;  %v6495_v26 = vrot.slane %v1247_v5, 9  ;;  %v1336_v31 = vrot.slane %v8261_v60, 5 }
  0x5d   : > { %v6494_v25 = vrot.slane %v1246_v6, 9  ;;  %v6458_v19 = vcombine.low %v8193_v45, %v8196_v50  ;;  %v1339_v50 = vrot.slane %v8266_v9, 5  ;;  %v1251_v9 = vld [vmem:[%s8142_s29 + $0x78] sm:$0xe]  ;;  %v10453_v60 = vcombine.low %v8292_v46, %v8298_v52  ;;  %v8071_v46 = vld [vmem:[%s8142_s29 + $0x4] sm:$0xf] }
  0x5e   : > { %7374 = vmatmul.mubr.msk.bf16.gmra.mrb[28].mxu0 %vm730_vm3, %v6436_v51  ;;  %v1322_v51 = vrot.slane %v8212_v8, 5  ;;  %v8540_v5 = vsel %vm8486_vm6, %v6495_v26, %v1336_v31  ;;  %v1338_v45 = vrot.slane %v1336_v31, 4  ;;  %v6497_v26 = vrot.slane %v1249_v33, 9  ;;  %v10449_v8 = vld [vmem:[#allocation7_spill] sm:$0xff] }
  0x5f   : > { %7381 = vmatprep.mubr.msk.bf16.mxu0 %vm730_vm3, %v10444_v63  ;;  %v1329_v63 = vrot.slane %v8241_v39, 5  ;;  %v1350_v31 = vrot.slane %v8298_v52, 5  ;;  %v6498_v33 = vrot.slane %v1250_v35, 9  ;;  %v6499_v21 = vrot.slane %v1251_v9, 9 }
  0x60   : > { %v8515_v62 = vsel %vm8486_vm6, %v6493_v37, %v1322_v51  ;;  %v1324_v30 = vrot.slane %v1322_v51, 4  ;;  %v10456_v18 = vcombine.low %v8344_v1, %v8351_v16  ;;  %v1294_v52 = vrot.slane %v8071_v46, 5 }
  0x61   : > { %v8532_v6 = vsel %vm8486_vm6, %v6494_v25, %v1329_v63  ;;  %v1331_v51 = vrot.slane %v1329_v63, 4  ;;  %v1343_v25 = vrot.slane %v8279_v24, 5  ;;  %v1346_v63 = vrot.slane %v8288_v42, 5 }
  0x62   : > { %v8528_v37 = vsel %vm8486_vm6, %v1324_v30, %v1325_v4  ;;  %v8548_v4 = vld [vmem:[%s10407_s1 + $0x30] sm:$0xff]   ;;  %v6496_v30 = vrot.slane %v1248_v61, 9  ;;  %v10457_v24 = vcombine.low %v8362_v43, %v8368_v53  ;;  %v10458_v1 = vcombine.low %v8381_v29, %v8393_v38 }
  0x63   : > { %v1345_v42 = vrot.slane %v1343_v25, 4 }
  0x64   : > { %v8568_v61 = vsel %vm8486_vm6, %v6496_v30, %v1343_v25  ;;  %v10446_v30 = vld [vmem:[#allocation4_spill] sm:$0xff] }
  0x65   : > { %v1360_v25 = vrot.slane %v10446_v30, 5 }
  0x66   : > { %7382 = vmatmul.mubr.msk.bf16.vlgmr.msra.gmra.mrb[0].mxu0 %vm730_vm3, %v6456_v2  ;;  %v8552_v2 = vsel %vm8486_vm6, %v1331_v51, %v1332_v48  ;;  %v10445_v51 = vld [vmem:[#allocation3_spill] sm:$0xff]  ;;  %v8580_v48 = vsel %vm8486_vm6, %v1345_v42, %v1346_v63 }
  0x67   : > { %7414 = vmatpush3.bf16.msra.mxu0 %v8231_v28  ;;  %7385 = vmatprep.mubr.msk.bf16.mxu0 %vm730_vm3, %v6457_v3  ;;  %v8561_v3 = vsel %vm8486_vm6, %v1338_v45, %v1339_v50  ;;  %v1353_v44 = vrot.slane %v10445_v51, 5  ;;  %v8574_v28 = vsel %vm8486_vm6, %v6497_v26, %v1350_v31  ;;  %v1352_v45 = vrot.slane %v1350_v31, 4  ;;  %v1254_v31 = vld [vmem:[%s8142_s29 + $0x9c] sm:$0xe]  ;;  %v10447_v26 = vld [vmem:[#allocation5_spill] sm:$0xff] }
  0x68   : > { %7415 = vmatprep.subr.bf16.mxu0 %v8019_v49  ;;  %v1357_v50 = vrot.slane %v8316_v20, 5  ;;  %v1364_v51 = vrot.slane %v8336_v57, 5  ;;  %v1367_v40 = vrot.slane %v10447_v26, 5  ;;  %v10450_v26 = vld [vmem:[#allocation8_spill] sm:$0xff] }
  0x69   : > { %v8589_v35 = vsel %vm8486_vm6, %v1352_v45, %v1353_v44  ;;  %v6500_v45 = vrot.slane %v1252_v59, 9  ;;  %v1255_v59 = vld [vmem:[%s8142_s29 + $0xa8] sm:$0xe]  ;;  %v1388_v15 = vrot.slane %v10450_v26, 5 }
  0x6a   : > { %v1359_v63 = vrot.slane %v1357_v50, 4  ;;  %v8600_v42 = vsel %vm8486_vm6, %v6499_v21, %v1364_v51  ;;  %v1366_v30 = vrot.slane %v1364_v51, 4  ;;  %v6501_v51 = vrot.slane %v1253_v32, 9 }
  0x6b   : > { %7416 = vmatpush3.bf16.msra.mxu0 %v8019_v49  ;;  %v8593_v49 = vsel %vm8486_vm6, %v6498_v33, %v1357_v50  ;;  %v1371_v33 = vrot.slane %v8351_v16, 5  ;;  %v10448_v50 = vld [vmem:[#allocation6_spill] sm:$0xff]  ;;  %v6502_v32 = vrot.slane %v1254_v31, 9  ;;  %v10459_v16 = vcombine.low %v8401_v56, %v8409_v36 }
  0x6c   : > { %7449 = vmatprep.subr.bf16.mxu0 %v8548_v4  ;;  %v8606_v44 = vsel %vm8486_vm6, %v1359_v63, %v1360_v25  ;;  %v1374_v22 = vrot.slane %v10448_v50, 5  ;;  %v1378_v25 = vrot.slane %v8368_v53, 5  ;;  %v1256_v50 = vld [vmem:[%s8142_s29 + $0xb4] sm:$0xe]  ;;  %v10460_v56 = vcombine.low %v8428_v23, %v8431_v54  ;;  %v8028_v23 = vld [vmem:[%s10407_s1 + $0x38] sm:$0xff]  }
  0x6d   : > { %v8626_v63 = vsel %vm8486_vm6, %v6500_v45, %v1371_v33  ;;  %v1373_v0 = vrot.slane %v1371_v33, 4  ;;  %v6503_v45 = vrot.slane %v1255_v59, 9  ;;  %v1392_v33 = vrot.slane %v8409_v36, 5  ;;  %v8075_v36 = vld [vmem:[%s8142_s29 + $0x28] sm:$0xf] }
  0x6e   : > { %7386 = vmatmul.mubr.msk.bf16.gmra.mrb[4].mxu0 %vm730_vm3, %v6458_v19  ;;  %v8618_v19 = vsel %vm8486_vm6, %v1366_v30, %v1367_v40  ;;  %v8632_v21 = vsel %vm8486_vm6, %v6501_v51, %v1378_v25  ;;  %v1380_v40 = vrot.slane %v1378_v25, 4  ;;  %v1385_v30 = vrot.slane %v8393_v38, 5 }
  0x6f   : > { %7389 = vmatprep.mubr.msk.bf16.mxu0 %vm730_vm3, %v6459_v17  ;;  %v1381_v17 = vrot.slane %v10449_v8, 5  ;;  %v8637_v9 = vsel %vm8486_vm6, %v1373_v0, %v1374_v22  ;;  %v8655_v59 = vsel %vm8486_vm6, %v6503_v45, %v1392_v33  ;;  %v1394_v26 = vrot.slane %v1392_v33, 4  ;;  %v10451_v0 = vld [vmem:[#allocation9_spill] sm:$0xff]  ;;  %v8073_v33 = vld [vmem:[%s8142_s29 + $0x1c] sm:$0xf] }
  0x70   : > { %v8649_v31 = vsel %vm8486_vm6, %v6502_v32, %v1385_v30  ;;  %v1387_v25 = vrot.slane %v1385_v30, 4  ;;  %v1395_v13 = vrot.slane %v10451_v0, 5  ;;  %v1402_v32 = vrot.slane %v8435_v58, 5 }
  0x71   : > { %v8645_v51 = vsel %vm8486_vm6, %v1380_v40, %v1381_v17  ;;  %v6504_v17 = vrot.slane %v1256_v50, 9  ;;  %v1399_v40 = vrot.slane %v8431_v54, 5  ;;  %v10461_v54 = vcombine.low %v8498_v7, %v8502_v14 }
  0x72   : > { %v6521_v22 = vcombine.low %v8632_v21, %v8645_v51  ;;  %v8660_v8 = vsel %vm8486_vm6, %v1387_v25, %v1388_v15  ;;  %v8672_v45 = vsel %vm8486_vm6, %v1394_v26, %v1395_v13  ;;  %v10455_v15 = vcombine.low %v8330_v41, %v8336_v57  ;;  %v1243_v26 = vld [vmem:[%s8142_s29 + $0x18] sm:$0xe]  ;;  %v8035_v51 = vld [vmem:[%s8142_s29 + $0x48] sm:$0xff]  }
  0x73   : > { %v6522_v30 = vcombine.low %v8649_v31, %v8660_v8  ;;  %v6523_v34 = vcombine.low %v8655_v59, %v8672_v45  ;;  %v8682_v39 = vsel %vm8486_vm6, %v6504_v17, %v1399_v40  ;;  %v1401_v58 = vrot.slane %v1399_v40, 4  ;;  %v8074_v17 = vld [vmem:[%s8142_s29 + $0x20] sm:$0x1]  ;;  %v8848_v45 = vld [vmem:[%s8142_s29 + $0x64] sm:$0xf] }
  0x74   : > { %v1296_v57 = vrot.slane %v1294_v52, 4  ;;  %v1308_v25 = vrot.slane %v8073_v33, 5  ;;  %v6491_v29 = vrot.slane %v1243_v26, 9  ;;  %v1311_v40 = vrot.slane %v8074_v17, 5  ;;  %v6616_v26 = vld [vmem:[%s8142_s29 + $0x18] sm:$0xf] }
  0x75   : > { %v10462_v7 = vcombine.low %v8515_v62, %v8528_v37  ;;  %v10463_v14 = vcombine.low %v8532_v6, %v8552_v2  ;;  %v10466_v62 = vcombine.low %v8574_v28, %v8589_v35  ;;  %v10467_v37 = vcombine.low %v8593_v49, %v8606_v44  ;;  %v8029_v2 = vld [vmem:[%s8142_s29 + $0xc] sm:$0xff]   ;;  %v8031_v28 = vld [vmem:[%s8142_s29 + $0x18] sm:$0xff]   ;;  %v6704_v44 = vld [vmem:[%s8142_s29 + $0x48] sm:$0xe] }
  0x76   : > { %7390 = vmatmul.mubr.msk.bf16.gmra.mrb[8].mxu0 %vm730_vm3, %v6460_v10  ;;  %v8686_v10 = vsel %vm8486_vm6, %v1401_v58, %v1402_v32  ;;  %v1310_v38 = vrot.slane %v1308_v25, 4  ;;  %v1315_v32 = vrot.slane %v8075_v36, 5  ;;  %v10468_v6 = vcombine.low %v8600_v42, %v8618_v19  ;;  %v8033_v35 = vld [vmem:[%s8142_s29 + $0x30] sm:$0xff]   ;;  %v8034_v49 = vld [vmem:[%s8142_s29 + $0x3c] sm:$0xff]  }
  0x77   : > { %7393 = vmatprep.mubr.msk.bf16.mxu0 %vm730_vm3, %v6461_v12  ;;  %v6524_v13 = vcombine.low %v8682_v39, %v8686_v10  ;;  %v10454_v12 = vcombine.low %v8313_v11, %v8316_v20  ;;  %v1241_v11 = vld [vmem:[%s8142_s29] sm:$0xe]  ;;  %v8072_v20 = vld [vmem:[%s8142_s29 + $0x8] sm:$0x1]  ;;  %v1309_v39 = vsel %vm8486_vm6, %v6491_v29, %v1308_v25  ;;  %v1244_v10 = vld [vmem:[%s8142_s29 + $0x24] sm:$0xe] }
  0x78   : > { %v1297_v50 = vrot.slane %v8072_v20, 5  ;;  %v6489_v41 = vrot.slane %v1241_v11, 9  ;;  %v1312_v58 = vsel %vm8486_vm6, %v1310_v38, %v1311_v40  ;;  %v10465_v20 = vcombine.low %v8568_v61, %v8580_v48  ;;  %v8039_v48 = vld [vmem:[%s10407_s1 + $0x48] sm:$0xff]   ;;  %v8818_v61 = vld [vmem:[%s10407_s1 + $0x50] sm:$0xff]   ;;  %v9016_v29 = vld [vmem:[%s8142_s29 + $0xc4] sm:$0xf] }
  0x79   : > { %v8828_v42 = vld [vmem:[%s8142_s29 + $0x50] sm:$0x1]  ;;  %v2154_v36 = vshrl.u32 %v6616_v26, 16 }
  0x7a   : > { %v1295_v43 = vsel %vm8486_vm6, %v6489_v41, %v1294_v52  ;;  %v1298_v53 = vsel %vm8486_vm6, %v1296_v57, %v1297_v50  ;;  %v8030_v52 = vld [vmem:[%s10407_s1 + $0x40] sm:$0xff]   ;;  %v2923_v19 = vrot.slane %v8828_v42, 5  ;;  %v2934_v50 = vrot.slane %v8848_v45, 5  ;;  %v8038_v25 = vld [vmem:[%s8142_s29 + $0x6c] sm:$0xff]  }
  0x7b   : > { %v6509_v0 = vcombine.low %v1295_v43, %v1298_v53  ;;  %v6613_v43 = vld [vmem:[%s8142_s29 + $0xc] sm:$0xf]  ;;  %v8860_v53 = vld [vmem:[%s8142_s29 + $0x10] sm:$0xf] }
  0x7c   : > { %v2130_v38 = vshrl.u32 %v6613_v43, 16  ;;  %v2133_v17 = vshll.u32 %v6613_v43, 16  ;;  %v2139_v40 = vshll.u32 %v8860_v53, 16 }
  0x7e   : > { %7394 = vmatmul.mubr.msk.bf16.gmra.mrb[12].mxu0 %vm730_vm3, %v10452_v55  ;;  %v6511_v55 = vcombine.low %v1309_v39, %v1312_v58  ;;  %v8878_v39 = vld [vmem:[%s8142_s29 + $0x7c] sm:$0xf]  ;;  %v8881_v58 = vld [vmem:[%s8142_s29 + $0x80] sm:$0x1] }
  0x7f   : > { %7397 = vmatprep.mubr.msk.bf16.mxu0 %vm730_vm3, %v10453_v60  ;;  %v6492_v60 = vrot.slane %v1244_v10, 9  ;;  %v6708_v10 = vld [vmem:[%s8142_s29 + $0x78] sm:$0xe] }
  0x86   : > { %7398 = vmatmul.mubr.msk.bf16.gmra.mrb[16].mxu0 %vm730_vm3, %v10454_v12  ;;  %v1317_v12 = vrot.slane %v1315_v32, 4 }
  0x87   : > { %7401 = vmatprep.mubr.msk.bf16.mxu0 %vm730_vm3, %v10455_v15  ;;  %v8076_v15 = vld [vmem:[%s8142_s29 + $0x2c] sm:$0x1] }
  0x8e   : > { %7402 = vmatmul.mubr.msk.bf16.gmra.mrb[20].mxu0 %vm730_vm3, %v10456_v18  ;;  %v1318_v18 = vrot.slane %v8076_v15, 5  ;;  %v2132_v15 = vrot.slane %v2130_v38, 4 }
  0x8f   : > { %7405 = vmatprep.mubr.msk.bf16.mxu0 %vm730_vm3, %v10457_v24  ;;  %v1316_v24 = vsel %vm8486_vm6, %v6492_v60, %v1315_v32  ;;  %v2157_v32 = vshll.u32 %v6616_v26, 16  ;;  %v2951_v60 = vrot.slane %v8881_v58, 5  ;;  %v8936_v26 = vld [vmem:[%s8142_s29 + $0x34] sm:$0xf] }
  0x90   : > { %v1319_v46 = vsel %vm8486_vm6, %v1317_v12, %v1318_v18  ;;  %v6724_v12 = vrot.slane %v6708_v10, 9  ;;  %v2135_v18 = vrot.slane %v2133_v17, 5  ;;  %v8042_v17 = vld [vmem:[%s8142_s29 + $0x90] sm:$0xff]   ;;  %v8043_v10 = vld [vmem:[%s8142_s29 + $0x9c] sm:$0xff]  }
  0x91   : > { %v6512_v11 = vcombine.low %v1316_v24, %v1319_v46  ;;  %v8040_v46 = vld [vmem:[%s8142_s29 + $0x78] sm:$0xff]  }
  0x96   : > { %7406 = vmatmul.mubr.msk.bf16.gmra.mrb[24].mxu0 %vm730_vm3, %v10458_v1  ;;  %v2936_v1 = vrot.slane %v2934_v50, 4 }
  0x97   : > { %7409 = vmatprep.mubr.msk.bf16.mxu0 %vm730_vm3, %v10459_v16  ;;  %v8037_v16 = vld [vmem:[%s8142_s29 + $0x60] sm:$0xff]  }
  0x9e   : > { %7410 = vmatmul.mubr.msk.bf16.gmra.mrb[28].mxu0 %vm730_vm3, %v10460_v56  ;;  %v2143_v56 = vshrl.u32 %v8860_v53, 16 }
  0x9f   : > { %7417 = vmatprep.mubr.msk.bf16.mxu0 %vm730_vm3, %v6509_v0 }
  0xa6   : > { %7418 = vmatmul.mubr.msk.bf16.vlgmr.msra.gmra.mrb[0].mxu0 %vm730_vm3, %v10461_v54  ;;  %v8890_v54 = vld [vmem:[%s8142_s29 + $0x1c] sm:$0xf] }
  0xa7   : > { %7450 = vmatpush3.bf16.msra.mxu0 %v8548_v4  ;;  %7421 = vmatprep.mubr.msk.bf16.mxu0 %vm730_vm3, %v6511_v55  ;;  %v10464_v4 = vcombine.low %v8540_v5, %v8561_v3  ;;  %v10469_v5 = vcombine.low %v8626_v63, %v8637_v9  ;;  %v8032_v3 = vld [vmem:[%s8142_s29 + $0x24] sm:$0xff]   ;;  %v8825_v9 = vld [vmem:[%s8142_s29 + $0x4c] sm:$0xf]  ;;  %v6720_v63 = vrot.slane %v6704_v44, 9  ;;  %v2948_v55 = vrot.slane %v8878_v39, 5 }
  0xa8   : > { %7451 = vmatprep.subr.bf16.mxu0 %v8028_v23  ;;  %v2920_v21 = vrot.slane %v8825_v9, 5  ;;  %v8917_v44 = vld [vmem:[%s8142_s29 + $0x28] sm:$0xf] }
  0xa9   : > { %v2950_v24 = vrot.slane %v2948_v55, 4  ;;  %v2187_v43 = vshll.u32 %v8917_v44, 16 }
  0xaa   : > { %v2922_v8 = vrot.slane %v2920_v21, 4  ;;  %v8837_v31 = vsel %vm8486_vm6, %v6720_v63, %v2920_v21  ;;  %v8920_v21 = vld [vmem:[%s8142_s29 + $0x94] sm:$0xf] }
  0xab   : > { %7452 = vmatpush3.bf16.msra.mxu0 %v8028_v23  ;;  %v8887_v23 = vrot.slane %v2139_v40, 5 }
  0xac   : > { %7485 = vmatprep.subr.bf16.mxu0 %v8030_v52  ;;  %v8842_v59 = vsel %vm8486_vm6, %v2922_v8, %v2923_v19  ;;  %v8923_v19 = vld [vmem:[%s8142_s29 + $0x98] sm:$0x1] }
  0xae   : > { %7422 = vmatmul.mubr.msk.bf16.gmra.mrb[4].mxu0 %vm730_vm3, %v6512_v11  ;;  %v2145_v11 = vrot.slane %v2143_v56, 4 }
  0xaf   : > { %7425 = vmatprep.mubr.msk.bf16.mxu0 %vm730_vm3, %v10462_v7  ;;  %v2156_v7 = vrot.slane %v2154_v36, 4 }
  0xb6   : > { %7426 = vmatmul.mubr.msk.bf16.gmra.mrb[8].mxu0 %vm730_vm3, %v10463_v14  ;;  %v2159_v14 = vrot.slane %v2157_v32, 5 }
  0xb7   : > { %7429 = vmatprep.mubr.msk.bf16.mxu0 %vm730_vm3, %v10464_v4  ;;  %v8898_v4 = vsel %vm8486_vm6, %v6724_v12, %v2948_v55 }
  0xbe   : > { %7430 = vmatmul.mubr.msk.bf16.gmra.mrb[12].mxu0 %vm730_vm3, %v10465_v20  ;;  %v8041_v20 = vld [vmem:[%s8142_s29 + $0x84] sm:$0xff]  }
  0xbf   : > { %7433 = vmatprep.mubr.msk.bf16.mxu0 %vm730_vm3, %v10466_v62  ;;  %v8903_v62 = vsel %vm8486_vm6, %v2950_v24, %v2951_v60 }
  0xc0   : > { %10470 = vst [vmem:[#allocation3_spill] sm:$0xff] %v8903_v62  ;;  %v9043_v62 = vld [vmem:[%s8142_s29 + $0x58] sm:$0xf] }
  0xc6   : > { %7434 = vmatmul.mubr.msk.bf16.gmra.mrb[16].mxu0 %vm730_vm3, %v10467_v37  ;;  %v2163_v37 = vshll.u32 %v8890_v54, 16 }
  0xc7   : > { %7437 = vmatprep.mubr.msk.bf16.mxu0 %vm730_vm3, %v10468_v6  ;;  %v2167_v6 = vshrl.u32 %v8890_v54, 16 }
  0xce   : > { %7438 = vmatmul.mubr.msk.bf16.gmra.mrb[20].mxu0 %vm730_vm3, %v10469_v5  ;;  %v6619_v5 = vld [vmem:[%s8142_s29 + $0x24] sm:$0xf] }
  0xcf   : > { %7441 = vmatprep.mubr.msk.bf16.mxu0 %vm730_vm3, %v6521_v22  ;;  %v8036_v22 = vld [vmem:[%s8142_s29 + $0x54] sm:$0xff]   ;;  %v2178_v63 = vshrl.u32 %v6619_v5, 16  ;;  %v2181_v8 = vshll.u32 %v6619_v5, 16 }
  0xd1   : > { %v2180_v60 = vrot.slane %v2178_v63, 4  ;;  %v2183_v12 = vrot.slane %v2181_v8, 5  ;;  %v6712_v8 = vld [vmem:[%s8142_s29 + $0xa8] sm:$0xe] }
  0xd6   : > { %7442 = vmatmul.mubr.msk.bf16.gmra.mrb[24].mxu0 %vm730_vm3, %v6522_v30  ;;  %v9019_v30 = vld [vmem:[%s8142_s29 + $0xc8] sm:$0x1] }
  0xd7   : > { %7445 = vmatprep.mubr.msk.bf16.mxu0 %vm730_vm3, %v6523_v34  ;;  %v8851_v34 = vld [vmem:[%s8142_s29 + $0x68] sm:$0x1] }
  0xd8   : > { %v2937_v41 = vrot.slane %v8851_v34, 5 }
  0xda   : > { %v8870_v0 = vsel %vm8486_vm6, %v2936_v1, %v2937_v41  ;;  %v2169_v41 = vrot.slane %v2167_v6, 4  ;;  %v2215_v6 = vshrl.u32 %v8936_v26, 16 }
  0xde   : > { %7446 = vmatmul.mubr.msk.bf16.gmra.mrb[28].mxu0 %vm730_vm3, %v6524_v13  ;;  %v6706_v13 = vld [vmem:[%s8142_s29 + $0x60] sm:$0xe] }
  0xdf   : > { %7453 = vmatprep.mubr.msk.bf16.mxu0 %vm730_vm3, %v8029_v2  ;;  %v6722_v57 = vrot.slane %v6706_v13, 9  ;;  %v2965_v13 = vrot.slane %v8923_v19, 5  ;;  %v6628_v2 = vld [vmem:[%s8142_s29 + $0x48] sm:$0xf] }
  0xe1   : > { %v8864_v33 = vsel %vm8486_vm6, %v6722_v57, %v2934_v50  ;;  %v8929_v50 = vrot.slane %v2163_v37, 5  ;;  %v6622_v57 = vld [vmem:[%s8142_s29 + $0x30] sm:$0xf] }
  0xe2   : > { %v2202_v24 = vshrl.u32 %v6622_v57, 16 }
  0xe3   : > { %v2170_v5 = vor.u32 %v2169_v41, %v8929_v50 }
  0xe4   : > { %v2204_v41 = vrot.slane %v2202_v24, 4 }
  0xe6   : > { %7454 = vmatmul.mubr.msk.bf16.vlgmr.msra.gmra.mrb[0].mxu0 %vm730_vm3, %v8031_v28 }
  0xe7   : > { %7486 = vmatpush3.bf16.msra.mxu0 %v8030_v52  ;;  %7457 = vmatprep.mubr.msk.bf16.mxu0 %vm730_vm3, %v8032_v3  ;;  %v8894_v52 = vld [vmem:[%s8142_s29 + $0x14] sm:$0x1]  ;;  %v8912_v3 = vld [vmem:[%s8142_s29 + $0x20] sm:$0x1] }
  0xe8   : > { %7487 = vmatprep.subr.bf16.mxu0 %v8039_v48  ;;  %v2149_v28 = vshll.u32 %v8894_v52, 16 }
  0xea   : > { %v2151_v36 = vrot.slane %v2149_v28, 5  ;;  %v6625_v28 = vld [vmem:[%s8142_s29 + $0x3c] sm:$0xf] }
  0xeb   : > { %7488 = vmatpush3.bf16.msra.mxu0 %v8039_v48  ;;  %v2136_v48 = vor.u32 %v2135_v18, %v2132_v15  ;;  %v8951_v18 = vld [vmem:[%s8142_s29 + $0x2c] sm:$0x1] }
  0xec   : > { %7521 = vmatprep.subr.bf16.mxu0 %v8818_v61  ;;  %v2197_v63 = vshll.u32 %v8951_v18, 16 }
  0xed   : > { %v2137_v40 = vrot.slane %v2136_v48, 4  ;;  %v8965_v48 = vld [vmem:[%s8142_s29 + $0xac] sm:$0xf] }
  0xee   : > { %7458 = vmatmul.mubr.msk.bf16.gmra.mrb[4].mxu0 %vm730_vm3, %v8033_v35  ;;  %v2146_v35 = vor.u32 %v2145_v11, %v8887_v23  ;;  %v2211_v11 = vshll.u32 %v8936_v26, 16 }
  0xef   : > { %7461 = vmatprep.mubr.msk.bf16.mxu0 %vm730_vm3, %v8034_v49  ;;  %v2160_v49 = vor.u32 %v2159_v14, %v2156_v7  ;;  %v8999_v7 = vrot.slane %v2197_v63, 5 }
  0xf0   : > { %v2147_v56 = vrot.slane %v2146_v35, 4  ;;  %v8968_v35 = vld [vmem:[%s8142_s29 + $0xb0] sm:$0x1] }
  0xf1   : > { %v8944_v55 = vrot.slane %v2160_v49, 4  ;;  %v2184_v49 = vor.u32 %v2183_v12, %v2180_v60  ;;  %v8044_v60 = vld [vmem:[%s8142_s29 + $0xa8] sm:$0xff]   ;;  %v2142_v12 = vsel %vm8175_vm2, %v2137_v40, %v8887_v23 }
  0xf2   : > { %v2152_v24 = vsel %vm8175_vm2, %v2147_v56, %v2151_v36 }
  0xf6   : > { %7462 = vmatmul.mubr.msk.bf16.gmra.mrb[8].mxu0 %vm730_vm3, %v8035_v51  ;;  %v6710_v51 = vld [vmem:[%s8142_s29 + $0x90] sm:$0xe] }
  0xf7   : > { %7465 = vmatprep.mubr.msk.bf16.mxu0 %vm730_vm3, %v8036_v22  ;;  %v2962_v22 = vrot.slane %v8920_v21, 5  ;;  %v6726_v1 = vrot.slane %v6710_v51, 9  ;;  %v2976_v51 = vrot.slane %v8965_v48, 5 }
  0xf9   : > { %v2964_v38 = vrot.slane %v2962_v22, 4  ;;  %v8941_v32 = vsel %vm8486_vm6, %v6726_v1, %v2962_v22  ;;  %v2979_v22 = vrot.slane %v8968_v35, 5  ;;  %v8978_v1 = vrot.slane %v2211_v11, 5 }
  0xfa   : > { %10471 = vst [vmem:[#allocation4_spill] sm:$0xff] %v8941_v32  ;;  %v2259_v32 = vshll.u32 %v8825_v9, 16 }
  0xfb   : > { %v8948_v15 = vsel %vm8486_vm6, %v2964_v38, %v2965_v13  ;;  %v8976_v13 = vld [vmem:[%s8142_s29 + $0x38] sm:$0x1]  ;;  %v8982_v38 = vld [vmem:[%s8142_s29 + $0x40] sm:$0xf] }
  0xfc   : > { %10472 = vst [vmem:[#allocation5_spill] sm:$0xff] %v8948_v15  ;;  %v2221_v40 = vshll.u32 %v8976_v13, 16  ;;  %v2235_v56 = vshll.u32 %v8982_v38, 16  ;;  %v2239_v36 = vshrl.u32 %v8982_v38, 16  ;;  %v8046_v15 = vld [vmem:[%s8142_s29 + $0xc0] sm:$0xff]  }
  0xfe   : > { %7466 = vmatmul.mubr.msk.bf16.gmra.mrb[12].mxu0 %vm730_vm3, %v8037_v16  ;;  %v2173_v16 = vshll.u32 %v8912_v3, 16 }
  0xff   : > { %7469 = vmatprep.mubr.msk.bf16.mxu0 %vm730_vm3, %v8038_v25  ;;  %v2191_v25 = vshrl.u32 %v8917_v44, 16 }
 0x100   : > { %v8956_v14 = vrot.slane %v2173_v16, 5  ;;  %v6728_v16 = vrot.slane %v6712_v8, 9  ;;  %v8045_v8 = vld [vmem:[%s8142_s29 + $0xb4] sm:$0xff]  }
 0x101   : > { %v2193_v37 = vrot.slane %v2191_v25, 4  ;;  %v2217_v25 = vrot.slane %v2215_v6, 4  ;;  %v8997_v6 = vrot.slane %v2184_v49, 4 }
 0x102   : > { %v8992_v11 = vsel %vm8486_vm6, %v6728_v16, %v2976_v51 }
 0x103   : > { %10473 = vst [vmem:[#allocation6_spill] sm:$0xff] %v8992_v11  ;;  %v2218_v63 = vor.u32 %v2217_v25, %v8978_v1  ;;  %v6714_v25 = vld [vmem:[%s8142_s29 + $0xc0] sm:$0xe] }
 0x106   : > { %7470 = vmatmul.mubr.msk.bf16.gmra.mrb[16].mxu0 %vm730_vm3, %v8040_v46  ;;  %v2205_v46 = vshll.u32 %v6622_v57, 16 }
 0x107   : > { %7473 = vmatprep.mubr.msk.bf16.mxu0 %vm730_vm3, %v8041_v20  ;;  %v8958_v20 = vrot.slane %v2187_v43, 5 }
 0x108   : > { %v2207_v57 = vrot.slane %v2205_v46, 5  ;;  %v2229_v46 = vshll.u32 %v6625_v28, 16 }
 0x109   : > { %v2194_v43 = vor.u32 %v2193_v37, %v8958_v20  ;;  %v8995_v37 = vrot.slane %v2170_v5, 4  ;;  %v6730_v5 = vrot.slane %v6714_v25, 9 }
 0x10a   : > { %v2208_v49 = vor.u32 %v2207_v57, %v2204_v41  ;;  %v2231_v16 = vrot.slane %v2229_v46, 5  ;;  %v2166_v41 = vsel %vm8175_vm2, %v8944_v55, %v8929_v50  ;;  %v2253_v46 = vshll.u32 %v6628_v2, 16 }
 0x10b   : > { %v2176_v57 = vsel %vm8175_vm2, %v8995_v37, %v8956_v14  ;;  %v2219_v55 = vrot.slane %v2218_v63, 4 }
 0x10c   : > { %v2209_v50 = vrot.slane %v2208_v49, 4 }
 0x10e   : > { %7474 = vmatmul.mubr.msk.bf16.gmra.mrb[20].mxu0 %vm730_vm3, %v8042_v17  ;;  %v2226_v17 = vshrl.u32 %v6625_v28, 16  ;;  %v9011_v28 = vrot.slane %v2194_v43, 4  ;;  %v9031_v43 = vld [vmem:[%s8142_s29 + $0x44] sm:$0x1] }
 0x10f   : > { %7477 = vmatprep.mubr.msk.bf16.mxu0 %vm730_vm3, %v8043_v10  ;;  %v2978_v10 = vrot.slane %v2976_v51, 4  ;;  %v2245_v37 = vshll.u32 %v9031_v43, 16 }
 0x110   : > { %v2228_v51 = vrot.slane %v2226_v17, 4  ;;  %v2990_v17 = vrot.slane %v9016_v29, 5 }
 0x111   : > { %v9004_v23 = vsel %vm8486_vm6, %v2978_v10, %v2979_v22  ;;  %v6665_v22 = vcombine.low %v2142_v12, %v2152_v24  ;;  %v2250_v10 = vshrl.u32 %v6628_v2, 16  ;;  %v9036_v12 = vrot.slane %v2235_v56, 5 }
 0x112   : > { %10474 = vst [vmem:[#allocation7_spill] sm:$0xff] %v9004_v23  ;;  %v2241_v24 = vrot.slane %v2239_v36, 4  ;;  %v2223_v23 = vrot.slane %v2221_v40, 5  ;;  %v2992_v11 = vrot.slane %v2990_v17, 4  ;;  %v2232_v14 = vor.u32 %v2231_v16, %v2228_v51 }
 0x113   : > { %v9047_v56 = vsel %vm8486_vm6, %v6730_v5, %v2990_v17  ;;  %v2263_v2 = vshrl.u32 %v8825_v9, 16  ;;  %v2252_v51 = vrot.slane %v2250_v10, 4  ;;  %v2255_v16 = vrot.slane %v2253_v46, 5  ;;  %v6634_v10 = vld [vmem:[%s8142_s29 + $0x60] sm:$0xf] }
 0x114   : > { %10475 = vst [vmem:[#allocation8_spill] sm:$0xff] %v9047_v56  ;;  %v2242_v63 = vor.u32 %v2241_v24, %v9036_v12  ;;  %v2190_v5 = vsel %vm8175_vm2, %v8997_v6, %v8958_v20  ;;  %v2200_v9 = vsel %vm8175_vm2, %v9011_v28, %v8999_v7  ;;  %v2287_v17 = vshrl.u32 %v9043_v62, 16  ;;  %v9079_v56 = vld [vmem:[%s8142_s29 + $0x5c] sm:$0x1] }
 0x115   : > { %v2224_v20 = vsel %vm8175_vm2, %v2219_v55, %v2223_v23  ;;  %v2233_v6 = vrot.slane %v2232_v14, 4  ;;  %v2247_v24 = vrot.slane %v2245_v37, 5  ;;  %v9075_v7 = vrot.slane %v2259_v32, 5 }
 0x116   : > { %7478 = vmatmul.mubr.msk.bf16.gmra.mrb[24].mxu0 %vm730_vm3, %v8044_v60  ;;  %v2993_v60 = vrot.slane %v9019_v30, 5  ;;  %v2265_v28 = vrot.slane %v2263_v2, 4  ;;  %v2243_v25 = vrot.slane %v2242_v63, 4  ;;  %v2289_v55 = vrot.slane %v2287_v17, 4 }
 0x117   : > { %7481 = vmatprep.mubr.msk.bf16.mxu0 %vm730_vm3, %v8045_v8  ;;  %v6631_v8 = vld [vmem:[%s8142_s29 + $0x54] sm:$0xf]  ;;  %v2301_v14 = vshll.u32 %v6634_v10, 16  ;;  %v2307_v37 = vshll.u32 %v8848_v45, 16  ;;  %v2311_v2 = vshrl.u32 %v8848_v45, 16  ;;  %v8048_v45 = vld [vmem:[%s10407_s1 + $0x58] sm:$0xff]  }
 0x118   : > { %v2274_v36 = vshrl.u32 %v6631_v8, 16  ;;  %v2277_v49 = vshll.u32 %v6631_v8, 16  ;;  %v9052_v40 = vsel %vm8486_vm6, %v2992_v11, %v2993_v60  ;;  %v2283_v11 = vshll.u32 %v9043_v62, 16 }
 0x119   : > { %10476 = vst [vmem:[#allocation9_spill] sm:$0xff] %v9052_v40  ;;  %v2214_v60 = vsel %vm8175_vm2, %v2209_v50, %v8978_v1  ;;  %v2256_v40 = vor.u32 %v2255_v16, %v2252_v51  ;;  %v2298_v1 = vshrl.u32 %v6634_v10, 16  ;;  %v6666_v50 = vcombine.low %v2166_v41, %v2176_v57  ;;  %v9092_v57 = vld [vmem:[%s8142_s29 + $0x70] sm:$0xf] }
 0x11a   : > { %v2276_v46 = vrot.slane %v2274_v36, 4  ;;  %v2279_v8 = vrot.slane %v2277_v49, 5  ;;  %v9081_v23 = vrot.slane %v2283_v11, 5  ;;  %v6668_v32 = vcombine.low %v2214_v60, %v2224_v20  ;;  %v6637_v36 = vld [vmem:[%s8142_s29 + $0x6c] sm:$0xf] }
 0x11b   : > { %v2266_v49 = vor.u32 %v2265_v28, %v9075_v7  ;;  %v2293_v41 = vshll.u32 %v9079_v56, 16  ;;  %v2248_v51 = vsel %vm8175_vm2, %v2243_v25, %v2247_v24  ;;  %v2257_v16 = vrot.slane %v2256_v40, 4  ;;  %v6640_v60 = vld [vmem:[%s8142_s29 + $0x78] sm:$0xf] }
 0x11c   : > { %v2280_v63 = vor.u32 %v2279_v8, %v2276_v46  ;;  %v2290_v11 = vor.u32 %v2289_v55, %v9081_v23  ;;  %v2322_v17 = vshrl.u32 %v6637_v36, 16  ;;  %v2325_v10 = vshll.u32 %v6637_v36, 16 }
 0x11d   : > { %v9102_v20 = vrot.slane %v2307_v37, 5  ;;  %v2331_v25 = vshll.u32 %v9092_v57, 16  ;;  %v2335_v40 = vshrl.u32 %v9092_v57, 16  ;;  %v2267_v24 = vrot.slane %v2266_v49, 4  ;;  %v9118_v49 = vld [vmem:[%s8142_s29 + $0x74] sm:$0x1] }
 0x11e   : > { %7482 = vmatmul.mubr.msk.bf16.gmra.mrb[28].mxu0 %vm730_vm3, %v8046_v15  ;;  %v2269_v15 = vshll.u32 %v8828_v42, 16  ;;  %v2238_v42 = vsel %vm8175_vm2, %v2233_v6, %v9036_v12  ;;  %v2303_v12 = vrot.slane %v2301_v14, 5  ;;  %v2313_v6 = vrot.slane %v2311_v2, 4 }
 0x11f   : > { %7489 = vmatprep.mubr.msk.bf16.mxu0 %vm730_vm3, %v6665_v22  ;;  %v6667_v22 = vcombine.low %v2190_v5, %v2200_v9  ;;  %v2300_v9 = vrot.slane %v2298_v1, 4  ;;  %v2281_v28 = vrot.slane %v2280_v63, 4  ;;  %v2295_v46 = vrot.slane %v2293_v41, 5 }
 0x120   : > { %v2271_v5 = vrot.slane %v2269_v15, 5  ;;  %v2317_v8 = vshll.u32 %v8851_v34, 16  ;;  %v2346_v15 = vshrl.u32 %v6640_v60, 16  ;;  %v2349_v1 = vshll.u32 %v6640_v60, 16 }
 0x121   : > { %v2359_v55 = vshrl.u32 %v8878_v39, 16  ;;  %v2291_v14 = vrot.slane %v2290_v11, 4  ;;  %v2324_v37 = vrot.slane %v2322_v17, 4  ;;  %v2327_v2 = vrot.slane %v2325_v10, 5 }
 0x122   : > { %v6669_v36 = vcombine.low %v2238_v42, %v2248_v51  ;;  %v2314_v34 = vor.u32 %v2313_v6, %v9102_v20  ;;  %v9120_v63 = vrot.slane %v2331_v25, 5  ;;  %v2337_v41 = vrot.slane %v2335_v40, 4  ;;  %v6643_v42 = vld [vmem:[%s8142_s29 + $0x84] sm:$0xf]  ;;  %v9136_v6 = vld [vmem:[%s8142_s29 + $0x88] sm:$0xf] }
 0x123   : > { %v2272_v60 = vsel %vm8175_vm2, %v2267_v24, %v2271_v5  ;;  %v9130_v11 = vrot.slane %v2317_v8, 5  ;;  %v2348_v51 = vrot.slane %v2346_v15, 4  ;;  %v2361_v10 = vrot.slane %v2359_v55, 4 }
 0x124   : > { %v2328_v5 = vor.u32 %v2327_v2, %v2324_v37  ;;  %v2338_v25 = vor.u32 %v2337_v41, %v9120_v63  ;;  %v2370_v40 = vshrl.u32 %v6643_v42, 16  ;;  %v2373_v24 = vshll.u32 %v6643_v42, 16  ;;  %v9154_v2 = vld [vmem:[%s8142_s29 + $0x8c] sm:$0x1] }
 0x126   : > { %7490 = vmatmul.mubr.msk.bf16.vlgmr.msra.gmra.mrb[0].mxu0 %vm730_vm3, %v6666_v50  ;;  %v2355_v50 = vshll.u32 %v8878_v39, 16  ;;  %v2262_v39 = vsel %vm8175_vm2, %v2257_v16, %v9075_v7  ;;  %v2296_v7 = vsel %vm8175_vm2, %v2291_v14, %v2295_v46  ;;  %v2383_v46 = vshrl.u32 %v9136_v6, 16 }
 0x127   : > { %7522 = vmatpush3.bf16.msra.mxu0 %v8818_v61  ;;  %7493 = vmatprep.mubr.msk.bf16.mxu0 %vm730_vm3, %v6667_v22  ;;  %v9114_v61 = vld [vmem:[%s10407_s1 + $0x60] sm:$0xff]   ;;  %v2304_v22 = vor.u32 %v2303_v12, %v2300_v9  ;;  %v2286_v9 = vsel %vm8175_vm2, %v2281_v28, %v9081_v23  ;;  %v2351_v12 = vrot.slane %v2349_v1, 5  ;;  %v2341_v23 = vshll.u32 %v9118_v49, 16 }
 0x128   : > { %7523 = vmatprep.subr.bf16.mxu0 %v8048_v45  ;;  %v9133_v17 = vrot.slane %v2355_v50, 5  ;;  %v2379_v28 = vshll.u32 %v9136_v6, 16  ;;  %v6670_v8 = vcombine.low %v2262_v39, %v2272_v60  ;;  %v2365_v50 = vshll.u32 %v8881_v58, 16  ;;  %v6649_v60 = vld [vmem:[%s8142_s29 + $0x9c] sm:$0xf] }
 0x129   : > { %v2305_v16 = vrot.slane %v2304_v22, 4  ;;  %v2352_v15 = vor.u32 %v2351_v12, %v2348_v51  ;;  %v6671_v55 = vcombine.low %v2286_v9, %v2296_v7  ;;  %v2329_v22 = vrot.slane %v2328_v5, 4  ;;  %v9163_v12 = vld [vmem:[%s8142_s29 + $0xa0] sm:$0xf] }
 0x12a   : > { %v2362_v1 = vor.u32 %v2361_v10, %v9133_v17  ;;  %v2343_v37 = vrot.slane %v2341_v23, 5  ;;  %v2372_v41 = vrot.slane %v2370_v40, 4  ;;  %v2375_v39 = vrot.slane %v2373_v24, 5 }
 0x12b   : > { %7524 = vmatpush3.bf16.msra.mxu0 %v8048_v45  ;;  %v2315_v45 = vrot.slane %v2314_v34, 4  ;;  %v2310_v14 = vsel %vm8175_vm2, %v2305_v16, %v9102_v20  ;;  %v2339_v34 = vrot.slane %v2338_v25, 4  ;;  %v9160_v58 = vrot.slane %v2379_v28, 5 }
 0x12c   : > { %7557 = vmatprep.subr.bf16.mxu0 %v9114_v61  ;;  %v2385_v42 = vrot.slane %v2383_v46, 4  ;;  %v2353_v20 = vrot.slane %v2352_v15, 4  ;;  %v2363_v10 = vrot.slane %v2362_v1, 4  ;;  %v2367_v7 = vrot.slane %v2365_v50, 5 }
 0x12d   : > { %v2389_v16 = vshll.u32 %v9154_v2, 16  ;;  %v2403_v5 = vshll.u32 %v8920_v21, 16  ;;  %v2418_v23 = vshrl.u32 %v6649_v60, 16  ;;  %v2334_v25 = vsel %vm8175_vm2, %v2329_v22, %v9120_v63 }
 0x12e   : > { %7494 = vmatmul.mubr.msk.bf16.gmra.mrb[4].mxu0 %vm730_vm3, %v6668_v32  ;;  %v6646_v32 = vld [vmem:[%s8142_s29 + $0x90] sm:$0xf]  ;;  %v2344_v40 = vsel %vm8175_vm2, %v2339_v34, %v2343_v37  ;;  %v2427_v24 = vshll.u32 %v9163_v12, 16  ;;  %v2431_v28 = vshrl.u32 %v9163_v12, 16  ;;  %v2376_v46 = vor.u32 %v2375_v39, %v2372_v41  ;;  %v9186_v39 = vld [vmem:[%s8142_s29 + $0xa4] sm:$0x1] }
 0x12f   : > { %7497 = vmatprep.mubr.msk.bf16.mxu0 %vm730_vm3, %v6669_v36  ;;  %v2320_v36 = vsel %vm8175_vm2, %v2315_v45, %v9130_v11  ;;  %v2394_v9 = vshrl.u32 %v6646_v32, 16  ;;  %v2397_v51 = vshll.u32 %v6646_v32, 16  ;;  %v2407_v11 = vshrl.u32 %v8920_v21, 16 }
 0x130   : > { %v2421_v45 = vshll.u32 %v6649_v60, 16  ;;  %v2386_v21 = vor.u32 %v2385_v42, %v9160_v58  ;;  %v2358_v63 = vsel %vm8175_vm2, %v2353_v20, %v9133_v17  ;;  %v2368_v1 = vsel %vm8175_vm2, %v2363_v10, %v2367_v7 }
 0x131   : > { %v2396_v15 = vrot.slane %v2394_v9, 4  ;;  %v2391_v50 = vrot.slane %v2389_v16, 5  ;;  %v9183_v32 = vrot.slane %v2403_v5, 5  ;;  %v2409_v22 = vrot.slane %v2407_v11, 4  ;;  %v6652_v9 = vld [vmem:[%s8142_s29 + $0xa8] sm:$0xf] }
 0x132   : > { %v2420_v37 = vrot.slane %v2418_v23, 4  ;;  %v2423_v34 = vrot.slane %v2421_v45, 5  ;;  %v6673_v41 = vcombine.low %v2334_v25, %v2344_v40  ;;  %v2429_v60 = vrot.slane %v2427_v24, 5 }
 0x133   : > { %v2433_v42 = vrot.slane %v2431_v28, 4  ;;  %v2387_v17 = vrot.slane %v2386_v21, 4  ;;  %v2413_v10 = vshll.u32 %v8923_v19, 16  ;;  %v6674_v7 = vcombine.low %v2358_v63, %v2368_v1 }
 0x134   : > { %v2410_v16 = vor.u32 %v2409_v22, %v9183_v32  ;;  %v2424_v5 = vor.u32 %v2423_v34, %v2420_v37  ;;  %v2437_v11 = vshll.u32 %v9186_v39, 16  ;;  %v2442_v23 = vshrl.u32 %v6652_v9, 16 }
 0x135   : > { %v2434_v45 = vor.u32 %v2433_v42, %v2429_v60  ;;  %v2445_v25 = vshll.u32 %v6652_v9, 16  ;;  %v2451_v40 = vshll.u32 %v8965_v48, 16  ;;  %v2455_v24 = vshrl.u32 %v8965_v48, 16 }
 0x136   : > { %7498 = vmatmul.mubr.msk.bf16.gmra.mrb[8].mxu0 %vm730_vm3, %v6670_v8  ;;  %v2399_v8 = vrot.slane %v2397_v51, 5  ;;  %v2377_v51 = vrot.slane %v2376_v46, 4  ;;  %v2392_v28 = vsel %vm8175_vm2, %v2387_v17, %v2391_v50  ;;  %v2415_v21 = vrot.slane %v2413_v10, 5  ;;  %v6658_v10 = vld [vmem:[%s8142_s29 + $0xc0] sm:$0xf] }
 0x137   : > { %7501 = vmatprep.mubr.msk.bf16.mxu0 %vm730_vm3, %v6671_v55  ;;  %v6672_v55 = vcombine.low %v2310_v14, %v2320_v36  ;;  %v6655_v14 = vld [vmem:[%s8142_s29 + $0xb4] sm:$0xf]  ;;  %v9194_v36 = vld [vmem:[%s8142_s29 + $0xb8] sm:$0xf]  ;;  %v2411_v22 = vrot.slane %v2410_v16, 4  ;;  %v2425_v48 = vrot.slane %v2424_v5, 4 }
 0x138   : > { %v2400_v20 = vor.u32 %v2399_v8, %v2396_v15  ;;  %v2382_v19 = vsel %vm8175_vm2, %v2377_v51, %v9160_v58  ;;  %v2466_v15 = vshrl.u32 %v6655_v14, 16  ;;  %v2469_v8 = vshll.u32 %v6655_v14, 16 }
 0x139   : > { %v2475_v63 = vshll.u32 %v9194_v36, 16  ;;  %v2479_v1 = vshrl.u32 %v9194_v36, 16  ;;  %v2439_v37 = vrot.slane %v2437_v11, 5  ;;  %v2444_v34 = vrot.slane %v2442_v23, 4  ;;  %v9215_v11 = vld [vmem:[%s8142_s29 + $0xbc] sm:$0x1] }
 0x13a   : > { %v2401_v46 = vrot.slane %v2400_v20, 4  ;;  %v2453_v58 = vrot.slane %v2451_v40, 5  ;;  %v2457_v42 = vrot.slane %v2455_v24, 4  ;;  %v6675_v9 = vcombine.low %v2382_v19, %v2392_v28 }
 0x13b   : > { %v2468_v50 = vrot.slane %v2466_v15, 4  ;;  %v2471_v51 = vrot.slane %v2469_v8, 5  ;;  %v2477_v17 = vrot.slane %v2475_v63, 5  ;;  %v2481_v20 = vrot.slane %v2479_v1, 4 }
 0x13c   : > { %v2406_v14 = vsel %vm8175_vm2, %v2401_v46, %v9183_v32  ;;  %v2416_v16 = vsel %vm8175_vm2, %v2411_v22, %v2415_v21  ;;  %v2461_v5 = vshll.u32 %v8968_v35, 16  ;;  %v2430_v23 = vsel %vm8175_vm2, %v2425_v48, %v2429_v60 }
 0x13d   : > { %v2458_v40 = vor.u32 %v2457_v42, %v2453_v58  ;;  %v2490_v32 = vshrl.u32 %v6658_v10, 16  ;;  %v2493_v24 = vshll.u32 %v6658_v10, 16  ;;  %v2499_v19 = vshll.u32 %v9016_v29, 16 }
 0x13e   : > { %7502 = vmatmul.mubr.msk.bf16.gmra.mrb[12].mxu0 %vm730_vm3, %v6672_v55  ;;  %v2435_v55 = vrot.slane %v2434_v45, 4  ;;  %v2503_v35 = vshrl.u32 %v9016_v29, 16  ;;  %v2472_v28 = vor.u32 %v2471_v51, %v2468_v50  ;;  %v2482_v46 = vor.u32 %v2481_v20, %v2477_v17 }
 0x13f   : > { %7505 = vmatprep.mubr.msk.bf16.mxu0 %vm730_vm3, %v6673_v41  ;;  %v2447_v41 = vrot.slane %v2445_v25, 5  ;;  %v6676_v21 = vcombine.low %v2406_v14, %v2416_v16  ;;  %v2459_v8 = vrot.slane %v2458_v40, 4  ;;  %v2463_v63 = vrot.slane %v2461_v5, 5  ;;  %v6699_v16 = vld [vmem:[%s8142_s29 + $0xc] sm:$0xe] }
 0x140   : > { %v2440_v45 = vsel %vm8175_vm2, %v2435_v55, %v2439_v37  ;;  %v2492_v1 = vrot.slane %v2490_v32, 4  ;;  %v2495_v22 = vrot.slane %v2493_v24, 5  ;;  %v2501_v48 = vrot.slane %v2499_v19, 5 }
 0x141   : > { %v2448_v25 = vor.u32 %v2447_v41, %v2444_v34  ;;  %v6677_v15 = vcombine.low %v2430_v23, %v2440_v45  ;;  %v2505_v37 = vrot.slane %v2503_v35, 4  ;;  %v2473_v34 = vrot.slane %v2472_v28, 4  ;;  %v6700_v28 = vld [vmem:[%s8142_s29 + $0x18] sm:$0xe] }
 0x142   : > { %v2483_v55 = vrot.slane %v2482_v46, 4  ;;  %v2464_v42 = vsel %vm8175_vm2, %v2459_v8, %v2463_v63  ;;  %v2509_v51 = vshll.u32 %v9019_v30, 16  ;;  %v2885_v14 = vrot.slane %v8860_v53, 5  ;;  %v6701_v46 = vld [vmem:[%s8142_s29 + $0x24] sm:$0xe] }
 0x143   : > { %v2449_v60 = vrot.slane %v2448_v25, 4  ;;  %v2506_v50 = vor.u32 %v2505_v37, %v2501_v48  ;;  %v2478_v20 = vsel %vm8175_vm2, %v2473_v34, %v2477_v17  ;;  %v6715_v40 = vrot.slane %v6699_v16, 9  ;;  %v6702_v34 = vld [vmem:[%s8142_s29 + $0x30] sm:$0xe] }
 0x144   : > { %v2511_v25 = vrot.slane %v2509_v51, 5  ;;  %v2887_v32 = vrot.slane %v2885_v14, 4  ;;  %v2888_v30 = vrot.slane %v8894_v52, 5  ;;  %v2892_v24 = vrot.slane %v8890_v54, 5 }
 0x145   : > { %v2454_v29 = vsel %vm8175_vm2, %v2449_v60, %v2453_v58  ;;  %v2507_v45 = vrot.slane %v2506_v50, 4  ;;  %v2886_v19 = vsel %vm8486_vm6, %v6715_v40, %v2885_v14  ;;  %v2899_v52 = vrot.slane %v8917_v44, 5 }
 0x146   : > { %7506 = vmatmul.mubr.msk.bf16.gmra.mrb[16].mxu0 %vm730_vm3, %v6674_v7  ;;  %v2485_v7 = vshll.u32 %v9215_v11, 16  ;;  %v6678_v58 = vcombine.low %v2454_v29, %v2464_v42  ;;  %v2889_v35 = vsel %vm8486_vm6, %v2887_v32, %v2888_v30  ;;  %v2894_v60 = vrot.slane %v2892_v24, 4 }
 0x147   : > { %7509 = vmatprep.mubr.msk.bf16.mxu0 %vm730_vm3, %v6675_v9  ;;  %v2496_v9 = vor.u32 %v2495_v22, %v2492_v1  ;;  %v2512_v53 = vsel %vm8175_vm2, %v2507_v45, %v2511_v25  ;;  %v2895_v8 = vrot.slane %v8912_v3, 5  ;;  %v6717_v63 = vrot.slane %v6701_v46, 9  ;;  %v6709_v46 = vld [vmem:[%s8142_s29 + $0x84] sm:$0xe] }
 0x148   : > { %v2487_v41 = vrot.slane %v2485_v7, 5  ;;  %v2901_v54 = vrot.slane %v2899_v52, 4  ;;  %v2902_v1 = vrot.slane %v8951_v18, 5  ;;  %v2913_v18 = vrot.slane %v8982_v38, 5 }
 0x149   : > { %v2497_v23 = vrot.slane %v2496_v9, 4  ;;  %v2896_v22 = vsel %vm8486_vm6, %v2894_v60, %v2895_v8  ;;  %v2900_v37 = vsel %vm8486_vm6, %v6717_v63, %v2899_v52  ;;  %v6718_v42 = vrot.slane %v6702_v34, 9  ;;  %v6711_v8 = vld [vmem:[%s8142_s29 + $0x9c] sm:$0xe] }
 0x14a   : > { %v2488_v10 = vsel %vm8175_vm2, %v2483_v55, %v2487_v41  ;;  %v2903_v3 = vsel %vm8486_vm6, %v2901_v54, %v2902_v1  ;;  %v6703_v55 = vld [vmem:[%s8142_s29 + $0x3c] sm:$0xe]  ;;  %v2909_v50 = vrot.slane %v8976_v13, 5  ;;  %v2927_v16 = vrot.slane %v9043_v62, 5 }
 0x14b   : > { %v6679_v5 = vcombine.low %v2478_v20, %v2488_v10  ;;  %v2502_v17 = vsel %vm8175_vm2, %v2497_v23, %v2501_v48  ;;  %v2906_v48 = vrot.slane %v8936_v26, 5  ;;  %v6737_v29 = vcombine.low %v2900_v37, %v2903_v3  ;;  %v8050_v10 = vld [vmem:[%s10407_s1 + $0x68] sm:$0xff]   ;;  %v10481_v34 = vld [vmem:[#allocation4_spill] sm:$0xff] }
 0x14c   : > { %v6680_v7 = vcombine.low %v2502_v17, %v2512_v53  ;;  %v6719_v51 = vrot.slane %v6703_v55, 9  ;;  %v2915_v20 = vrot.slane %v2913_v18, 4  ;;  %v2916_v26 = vrot.slane %v9031_v43, 5  ;;  %v6707_v17 = vld [vmem:[%s8142_s29 + $0x6c] sm:$0xe] }
 0x14d   : > { %v2908_v9 = vrot.slane %v2906_v48, 4  ;;  %v2907_v38 = vsel %vm8486_vm6, %v6718_v42, %v2906_v48  ;;  %v2929_v25 = vrot.slane %v2927_v16, 4  ;;  %v2930_v40 = vrot.slane %v9079_v56, 5  ;;  %v6713_v48 = vld [vmem:[%s8142_s29 + $0xb4] sm:$0xe]  ;;  %v10484_v42 = vld [vmem:[#allocation6_spill] sm:$0xff] }
 0x14e   : > { %7510 = vmatmul.mubr.msk.bf16.gmra.mrb[20].mxu0 %vm730_vm3, %v6676_v21  ;;  %v6735_v21 = vcombine.low %v2886_v19, %v2889_v35  ;;  %v2914_v14 = vsel %vm8486_vm6, %v6719_v51, %v2913_v18  ;;  %v2917_v43 = vsel %vm8486_vm6, %v2915_v20, %v2916_v26  ;;  %v2941_v30 = vrot.slane %v9092_v57, 5  ;;  %v10482_v18 = vld [vmem:[#allocation5_spill] sm:$0xff]  ;;  %v10487_v51 = vld [vmem:[#allocation8_spill] sm:$0xff] }
 0x14f   : > { %7513 = vmatprep.mubr.msk.bf16.mxu0 %vm730_vm3, %v6677_v15  ;;  %v6716_v15 = vrot.slane %v6700_v28, 9  ;;  %v2910_v13 = vsel %vm8486_vm6, %v2908_v9, %v2909_v50  ;;  %v6739_v23 = vcombine.low %v2914_v14, %v2917_v43  ;;  %v2931_v32 = vsel %vm8486_vm6, %v2929_v25, %v2930_v40  ;;  %v10485_v9 = vld [vmem:[#allocation7_spill] sm:$0xff]  ;;  %v10488_v20 = vld [vmem:[#allocation9_spill] sm:$0xff] }
 0x150   : > { %v2943_v19 = vrot.slane %v2941_v30, 4  ;;  %v2944_v56 = vrot.slane %v9118_v49, 5  ;;  %v10477_v35 = vcombine.low %v8837_v31, %v8842_v59  ;;  %v2955_v52 = vrot.slane %v9136_v6, 5  ;;  %v9371_v14 = vld [vmem:[%s10407_s1 + $0x80] sm:$0xff]  }
 0x151   : > { %v2893_v44 = vsel %vm8486_vm6, %v6716_v15, %v2892_v24  ;;  %v6723_v24 = vrot.slane %v6707_v17, 9  ;;  %v2958_v15 = vrot.slane %v9154_v2, 5  ;;  %v10478_v31 = vcombine.low %v8864_v33, %v8870_v0  ;;  %v10479_v33 = vld [vmem:[#allocation3_spill] sm:$0xff]  ;;  %v8055_v43 = vld [vmem:[%s8142_s29 + $0x3c] sm:$0xff]  }
 0x152   : > { %v6736_v41 = vcombine.low %v2893_v44, %v2896_v22  ;;  %v2945_v57 = vsel %vm8486_vm6, %v2943_v19, %v2944_v56  ;;  %v2957_v49 = vrot.slane %v2955_v52, 4  ;;  %v2969_v60 = vrot.slane %v9163_v12, 5  ;;  %v9404_v19 = vld [vmem:[%s8142_s29 + $0x74] sm:$0x1]  ;;  %v6932_v56 = vld [vmem:[%s8142_s29 + $0x6c] sm:$0xe] }
 0x153   : > { %v2942_v28 = vsel %vm8486_vm6, %v6723_v24, %v2941_v30  ;;  %v6727_v54 = vrot.slane %v6711_v8, 9  ;;  %v2972_v1 = vrot.slane %v9186_v39, 5  ;;  %v10480_v0 = vcombine.low %v8898_v4, %v10479_v33  ;;  %v8058_v30 = vld [vmem:[%s8142_s29 + $0x60] sm:$0xff]   ;;  %v9401_v24 = vld [vmem:[%s8142_s29 + $0x70] sm:$0xf] }
 0x154   : > { %v2959_v6 = vsel %vm8486_vm6, %v2957_v49, %v2958_v15  ;;  %v2971_v2 = vrot.slane %v2969_v60, 4  ;;  %v2983_v22 = vrot.slane %v9194_v36, 5  ;;  %v6729_v37 = vrot.slane %v6713_v48, 9  ;;  %v8060_v15 = vld [vmem:[%s8142_s29 + $0x78] sm:$0xff]   ;;  %v9431_v33 = vld [vmem:[%s8142_s29 + $0x88] sm:$0xf] }
 0x155   : > { %v2970_v44 = vsel %vm8486_vm6, %v6727_v54, %v2969_v60  ;;  %v2986_v4 = vrot.slane %v9215_v11, 5  ;;  %v10483_v55 = vcombine.low %v10481_v34, %v10482_v18  ;;  %v10486_v50 = vcombine.low %v10484_v42, %v10485_v9  ;;  %v8051_v11 = vld [vmem:[%s8142_s29 + $0x18] sm:$0xff]   ;;  %v8062_v18 = vld [vmem:[%s8142_s29 + $0x84] sm:$0xff]   ;;  %v8063_v9 = vld [vmem:[%s8142_s29 + $0x90] sm:$0xff]  }
 0x156   : > { %7514 = vmatmul.mubr.msk.bf16.gmra.mrb[24].mxu0 %vm730_vm3, %v6678_v58  ;;  %v6705_v58 = vld [vmem:[%s8142_s29 + $0x54] sm:$0xe]  ;;  %v2973_v12 = vsel %vm8486_vm6, %v2971_v2, %v2972_v1  ;;  %v2985_v3 = vrot.slane %v2983_v22, 4  ;;  %v10489_v26 = vcombine.low %v10487_v51, %v10488_v20  ;;  %v6845_v20 = vld [vmem:[%s8142_s29 + $0x30] sm:$0xf] }
 0x157   : > { %7517 = vmatprep.mubr.msk.bf16.mxu0 %vm730_vm3, %v6679_v5  ;;  %v6738_v5 = vcombine.low %v2907_v38, %v2910_v13  ;;  %v6721_v45 = vrot.slane %v6705_v58, 9  ;;  %v6747_v39 = vcombine.low %v2970_v44, %v2973_v12  ;;  %v8054_v38 = vld [vmem:[%s8142_s29 + $0x30] sm:$0xff]   ;;  %v8061_v13 = vld [vmem:[%s10407_s1 + $0x78] sm:$0xff]   ;;  %v6934_v44 = vld [vmem:[%s8142_s29 + $0x84] sm:$0xe]  ;;  %v4539_v12 = vrot.slane %v9431_v33, 5 }
 0x158   : > { %v2987_v36 = vsel %vm8486_vm6, %v2985_v3, %v2986_v4  ;;  %v9381_v58 = vld [vmem:[%s8142_s29 + $0x5c] sm:$0x1]  ;;  %v6950_v48 = vrot.slane %v6934_v44, 9  ;;  %v9443_v4 = vld [vmem:[%s8142_s29 + $0x28] sm:$0xf] }
 0x159   : > { %v2928_v62 = vsel %vm8486_vm6, %v6721_v45, %v2927_v16  ;;  %v8056_v16 = vld [vmem:[%s8142_s29 + $0x48] sm:$0xff]   ;;  %v4514_v45 = vrot.slane %v9381_v58, 5  ;;  %v4541_v34 = vrot.slane %v4539_v12, 4  ;;  %v3758_v51 = vshrl.u32 %v9443_v4, 16 }
 0x15a   : > { %v6741_v53 = vcombine.low %v2928_v62, %v2931_v32  ;;  %v8057_v62 = vld [vmem:[%s8142_s29 + $0x54] sm:$0xff]   ;;  %v9451_v42 = vsel %vm8486_vm6, %v6950_v48, %v4539_v12  ;;  %v8065_v44 = vld [vmem:[%s8142_s29 + $0xa8] sm:$0xff]  }
 0x15e   : > { %7518 = vmatmul.mubr.msk.bf16.gmra.mrb[28].mxu0 %vm730_vm3, %v6680_v7  ;;  %v6743_v7 = vcombine.low %v2942_v28, %v2945_v57  ;;  %v4528_v28 = vrot.slane %v9404_v19, 5  ;;  %v6948_v57 = vrot.slane %v6932_v56, 9 }
 0x15f   : > { %7525 = vmatprep.mubr.msk.bf16.mxu0 %vm730_vm3, %v6735_v21  ;;  %v6725_v21 = vrot.slane %v6709_v46, 9  ;;  %v8059_v46 = vld [vmem:[%s8142_s29 + $0x6c] sm:$0xff]  }
 0x161   : > { %v2956_v59 = vsel %vm8486_vm6, %v6725_v21, %v2955_v52  ;;  %v9413_v21 = vld [vmem:[%s8142_s29 + $0x1c] sm:$0xf] }
 0x162   : > { %v6745_v63 = vcombine.low %v2956_v59, %v2959_v6  ;;  %v3734_v54 = vshrl.u32 %v9413_v21, 16  ;;  %v9569_v6 = vld [vmem:[%s8142_s29 + $0xd0] sm:$0xf] }
 0x166   : > { %7526 = vmatmul.mubr.msk.bf16.vlgmr.msra.gmra.mrb[0].mxu0 %vm730_vm3, %v6736_v41  ;;  %v2984_v41 = vsel %vm8486_vm6, %v6729_v37, %v2983_v22 }
 0x167   : > { %7558 = vmatpush3.bf16.msra.mxu0 %v9114_v61  ;;  %7529 = vmatprep.mubr.msk.bf16.mxu0 %vm730_vm3, %v6737_v29  ;;  %v9290_v61 = vld [vmem:[%s10407_s1 + $0x70] sm:$0xff]   ;;  %v6749_v29 = vcombine.low %v2984_v41, %v2987_v36  ;;  %v3736_v41 = vrot.slane %v3734_v54, 4 }
 0x168   : > { %7559 = vmatprep.subr.bf16.mxu0 %v8050_v10 }
 0x16b   : > { %7560 = vmatpush3.bf16.msra.mxu0 %v8050_v10  ;;  %v8053_v10 = vld [vmem:[%s8142_s29 + $0x24] sm:$0xff]  }
 0x16c   : > { %7593 = vmatprep.subr.bf16.mxu0 %v9290_v61 }
 0x16e   : > { %7530 = vmatmul.mubr.msk.bf16.gmra.mrb[4].mxu0 %vm730_vm3, %v6738_v5  ;;  %v6930_v5 = vld [vmem:[%s8142_s29 + $0x54] sm:$0xe] }
 0x16f   : > { %7533 = vmatprep.mubr.msk.bf16.mxu0 %vm730_vm3, %v6739_v23  ;;  %v6946_v25 = vrot.slane %v6930_v5, 9  ;;  %v9470_v5 = vld [vmem:[%s8142_s29 + $0x34] sm:$0xf] }
 0x176   : > { %7534 = vmatmul.mubr.msk.bf16.gmra.mrb[8].mxu0 %vm730_vm3, %v10477_v35  ;;  %v4525_v35 = vrot.slane %v9401_v24, 5 }
 0x177   : > { %7537 = vmatprep.mubr.msk.bf16.mxu0 %vm730_vm3, %v6741_v53  ;;  %v9572_v53 = vld [vmem:[%s8142_s29 + $0xd4] sm:$0x1] }
 0x178   : > { %v4527_v52 = vrot.slane %v4525_v35, 4  ;;  %v9417_v49 = vsel %vm8486_vm6, %v6948_v57, %v4525_v35  ;;  %v6848_v57 = vld [vmem:[%s8142_s29 + $0x3c] sm:$0xf] }
 0x17a   : > { %v9423_v59 = vsel %vm8486_vm6, %v4527_v52, %v4528_v28  ;;  %v3760_v28 = vrot.slane %v3758_v51, 4 }
 0x17e   : > { %7538 = vmatmul.mubr.msk.bf16.gmra.mrb[12].mxu0 %vm730_vm3, %v10478_v31  ;;  %v6842_v31 = vld [vmem:[%s8142_s29 + $0x24] sm:$0xf] }
 0x17f   : > { %7541 = vmatprep.mubr.msk.bf16.mxu0 %vm730_vm3, %v6743_v7  ;;  %v6839_v7 = vld [vmem:[%s8142_s29 + $0x18] sm:$0xf]  ;;  %v3745_v2 = vshrl.u32 %v6842_v31, 16  ;;  %v3748_v1 = vshll.u32 %v6842_v31, 16  ;;  %v9489_v31 = vld [vmem:[%s8142_s29 + $0x40] sm:$0xf] }
 0x180   : > { %v3721_v60 = vshrl.u32 %v6839_v7, 16  ;;  %v3724_v8 = vshll.u32 %v6839_v7, 16  ;;  %v3778_v7 = vshll.u32 %v9470_v5, 16  ;;  %v3806_v51 = vshrl.u32 %v9489_v31, 16 }
 0x181   : > { %v3747_v36 = vrot.slane %v3745_v2, 4 }
 0x182   : > { %v3726_v37 = vrot.slane %v3724_v8, 5  ;;  %v8064_v8 = vld [vmem:[%s8142_s29 + $0x9c] sm:$0xff]  }
 0x186   : > { %7542 = vmatmul.mubr.msk.bf16.gmra.mrb[16].mxu0 %vm730_vm3, %v10480_v0  ;;  %v9434_v0 = vld [vmem:[%s8142_s29 + $0x8c] sm:$0x1] }
 0x187   : > { %7545 = vmatprep.mubr.msk.bf16.mxu0 %vm730_vm3, %v6745_v63  ;;  %v3730_v63 = vshll.u32 %v9413_v21, 16  ;;  %v4542_v22 = vrot.slane %v9434_v0, 5 }
 0x189   : > { %v9440_v3 = vrot.slane %v3730_v63, 5 }
 0x18e   : > { %7546 = vmatmul.mubr.msk.bf16.gmra.mrb[20].mxu0 %vm730_vm3, %v10483_v55  ;;  %v9447_v55 = vld [vmem:[%s8142_s29 + $0x20] sm:$0x1] }
 0x18f   : > { %7549 = vmatprep.mubr.msk.bf16.mxu0 %vm730_vm3, %v6747_v39  ;;  %v3723_v39 = vrot.slane %v3721_v60, 4 }
 0x196   : > { %7550 = vmatmul.mubr.msk.bf16.gmra.mrb[24].mxu0 %vm730_vm3, %v10486_v50  ;;  %v9456_v50 = vsel %vm8486_vm6, %v4541_v34, %v4542_v22  ;;  %v3793_v34 = vshrl.u32 %v6848_v57, 16 }
 0x197   : > { %7553 = vmatprep.mubr.msk.bf16.mxu0 %vm730_vm3, %v6749_v29  ;;  %v3750_v29 = vrot.slane %v3748_v1, 5  ;;  %10490 = vst [vmem:[#allocation3_spill] sm:$0xff] %v9456_v50  ;;  %v9596_v50 = vld [vmem:[%s8142_s29 + $0x64] sm:$0xf] }
 0x19e   : > { %7554 = vmatmul.mubr.msk.bf16.gmra.mrb[28].mxu0 %vm730_vm3, %v10489_v26  ;;  %v6854_v26 = vld [vmem:[%s8142_s29 + $0x54] sm:$0xf] }
 0x19f   : > { %7561 = vmatprep.mubr.msk.bf16.mxu0 %vm730_vm3, %v8051_v11  ;;  %v3754_v11 = vshll.u32 %v9443_v4, 16 }
 0x1a1   : > { %v9482_v35 = vrot.slane %v3754_v11, 5 }
 0x1a6   : > { %7562 = vmatmul.mubr.msk.bf16.vlgmr.msra.gmra.mrb[0].mxu0 %vm730_vm3, %v8053_v10  ;;  %v3740_v10 = vshll.u32 %v9447_v55, 16 }
 0x1a7   : > { %7594 = vmatpush3.bf16.msra.mxu0 %v9290_v61  ;;  %7565 = vmatprep.mubr.msk.bf16.mxu0 %vm730_vm3, %v8054_v38  ;;  %v9378_v61 = vld [vmem:[%s8142_s29 + $0x58] sm:$0xf]  ;;  %v9465_v38 = vld [vmem:[%s8142_s29 + $0x2c] sm:$0x1] }
 0x1a8   : > { %7595 = vmatprep.subr.bf16.mxu0 %v8061_v13  ;;  %v4511_v23 = vrot.slane %v9378_v61, 5  ;;  %v3742_v2 = vrot.slane %v3740_v10, 5  ;;  %v6851_v10 = vld [vmem:[%s8142_s29 + $0x48] sm:$0xf]  ;;  %v4486_v27 = vrot.slane %v9465_v38, 5 }
 0x1aa   : > { %v4513_v40 = vrot.slane %v4511_v23, 4  ;;  %v9390_v32 = vsel %vm8486_vm6, %v6946_v25, %v4511_v23  ;;  %v9473_v23 = vld [vmem:[%s8142_s29 + $0xa0] sm:$0xf]  ;;  %v3769_v25 = vshrl.u32 %v6845_v20, 16 }
 0x1ab   : > { %7596 = vmatpush3.bf16.msra.mxu0 %v8061_v13  ;;  %v3727_v13 = vor.u32 %v3726_v37, %v3723_v39  ;;  %v9504_v37 = vld [vmem:[%s8142_s29 + $0x38] sm:$0x1] }
 0x1ac   : > { %7629 = vmatprep.subr.bf16.mxu0 %v9371_v14  ;;  %v9395_v17 = vsel %vm8486_vm6, %v4513_v40, %v4514_v45  ;;  %v9476_v45 = vld [vmem:[%s8142_s29 + $0xa4] sm:$0x1]  ;;  %v3772_v40 = vshll.u32 %v6845_v20, 16  ;;  %v3771_v22 = vrot.slane %v3769_v25, 4  ;;  %v3761_v20 = vor.u32 %v3760_v28, %v9482_v35 }
 0x1ad   : > { %v4556_v56 = vrot.slane %v9476_v45, 5  ;;  %v3728_v63 = vrot.slane %v3727_v13, 4  ;;  %v9518_v13 = vld [vmem:[%s8142_s29 + $0xb8] sm:$0xf]  ;;  %v3788_v25 = vshll.u32 %v9504_v37, 16  ;;  %v3795_v28 = vrot.slane %v3793_v34, 4 }
 0x1ae   : > { %7566 = vmatmul.mubr.msk.bf16.gmra.mrb[4].mxu0 %vm730_vm3, %v8055_v43  ;;  %v3737_v43 = vor.u32 %v3736_v41, %v9440_v3  ;;  %v3774_v48 = vrot.slane %v3772_v40, 5  ;;  %v3802_v41 = vshll.u32 %v9489_v31, 16  ;;  %v6938_v40 = vld [vmem:[%s8142_s29 + $0xb4] sm:$0xe] }
 0x1af   : > { %7569 = vmatprep.mubr.msk.bf16.mxu0 %vm730_vm3, %v8056_v16  ;;  %v3751_v16 = vor.u32 %v3750_v29, %v3747_v36  ;;  %v9552_v36 = vrot.slane %v3788_v25, 5 }
 0x1b0   : > { %v3738_v54 = vrot.slane %v3737_v43, 4  ;;  %v9521_v43 = vld [vmem:[%s8142_s29 + $0xbc] sm:$0x1] }
 0x1b1   : > { %v9497_v12 = vrot.slane %v3751_v16, 4  ;;  %v3775_v16 = vor.u32 %v3774_v48, %v3771_v22  ;;  %v8066_v22 = vld [vmem:[%s8142_s29 + $0xb4] sm:$0xff]   ;;  %v3733_v48 = vsel %vm8175_vm2, %v3728_v63, %v9440_v3 }
 0x1b2   : > { %v3743_v34 = vsel %vm8175_vm2, %v3738_v54, %v3742_v2 }
 0x1b6   : > { %7570 = vmatmul.mubr.msk.bf16.gmra.mrb[8].mxu0 %vm730_vm3, %v8057_v62  ;;  %v6936_v62 = vld [vmem:[%s8142_s29 + $0x9c] sm:$0xe] }
 0x1b7   : > { %7573 = vmatprep.mubr.msk.bf16.mxu0 %vm730_vm3, %v8058_v30  ;;  %v4553_v30 = vrot.slane %v9473_v23, 5  ;;  %v6952_v52 = vrot.slane %v6936_v62, 9  ;;  %v4567_v62 = vrot.slane %v9518_v13, 5 }
 0x1b9   : > { %v4555_v60 = vrot.slane %v4553_v30, 4  ;;  %v9494_v1 = vsel %vm8486_vm6, %v6952_v52, %v4553_v30  ;;  %v4570_v30 = vrot.slane %v9521_v43, 5  ;;  %v9531_v52 = vrot.slane %v3802_v41, 5 }
 0x1ba   : > { %10491 = vst [vmem:[#allocation4_spill] sm:$0xff] %v9494_v1  ;;  %v3850_v1 = vshll.u32 %v9378_v61, 16 }
 0x1bb   : > { %v9501_v39 = vsel %vm8486_vm6, %v4555_v60, %v4556_v56  ;;  %v9529_v56 = vld [vmem:[%s8142_s29 + $0x44] sm:$0x1]  ;;  %v9535_v60 = vld [vmem:[%s8142_s29 + $0x4c] sm:$0xf] }
 0x1bc   : > { %10492 = vst [vmem:[#allocation5_spill] sm:$0xff] %v9501_v39  ;;  %v3812_v63 = vshll.u32 %v9529_v56, 16  ;;  %v3826_v54 = vshll.u32 %v9535_v60, 16  ;;  %v3830_v2 = vshrl.u32 %v9535_v60, 16  ;;  %v8068_v39 = vld [vmem:[%s8142_s29 + $0xcc] sm:$0xff]  }
 0x1be   : > { %7574 = vmatmul.mubr.msk.bf16.gmra.mrb[12].mxu0 %vm730_vm3, %v8059_v46  ;;  %v3764_v46 = vshll.u32 %v9465_v38, 16 }
 0x1bf   : > { %7577 = vmatprep.mubr.msk.bf16.mxu0 %vm730_vm3, %v8060_v15  ;;  %v3782_v15 = vshrl.u32 %v9470_v5, 16 }
 0x1c0   : > { %v9509_v29 = vrot.slane %v3764_v46, 5  ;;  %v6954_v46 = vrot.slane %v6938_v40, 9  ;;  %v8067_v40 = vld [vmem:[%s8142_s29 + $0xc0] sm:$0xff]  }
 0x1c1   : > { %v3784_v11 = vrot.slane %v3782_v15, 4  ;;  %v3808_v15 = vrot.slane %v3806_v51, 4  ;;  %v9550_v51 = vrot.slane %v3775_v16, 4 }
 0x1c2   : > { %v9545_v41 = vsel %vm8486_vm6, %v6954_v46, %v4567_v62 }
 0x1c3   : > { %10493 = vst [vmem:[#allocation6_spill] sm:$0xff] %v9545_v41  ;;  %v3809_v25 = vor.u32 %v3808_v15, %v9531_v52  ;;  %v6940_v15 = vld [vmem:[%s8142_s29 + $0xcc] sm:$0xe] }
 0x1c6   : > { %7578 = vmatmul.mubr.msk.bf16.gmra.mrb[16].mxu0 %vm730_vm3, %v8062_v18  ;;  %v3796_v18 = vshll.u32 %v6848_v57, 16 }
 0x1c7   : > { %7581 = vmatprep.mubr.msk.bf16.mxu0 %vm730_vm3, %v8063_v9  ;;  %v9511_v9 = vrot.slane %v3778_v7, 5 }
 0x1c8   : > { %v3798_v57 = vrot.slane %v3796_v18, 5  ;;  %v3820_v18 = vshll.u32 %v6851_v10, 16 }
 0x1c9   : > { %v3785_v7 = vor.u32 %v3784_v11, %v9511_v9  ;;  %v9548_v11 = vrot.slane %v3761_v20, 4  ;;  %v6956_v20 = vrot.slane %v6940_v15, 9 }
 0x1ca   : > { %v3799_v16 = vor.u32 %v3798_v57, %v3795_v28  ;;  %v3822_v46 = vrot.slane %v3820_v18, 5  ;;  %v3757_v28 = vsel %vm8175_vm2, %v9497_v12, %v9482_v35  ;;  %v3844_v18 = vshll.u32 %v6854_v26, 16 }
 0x1cb   : > { %v3767_v57 = vsel %vm8175_vm2, %v9548_v11, %v9509_v29  ;;  %v3810_v12 = vrot.slane %v3809_v25, 4 }
 0x1cc   : > { %v3800_v35 = vrot.slane %v3799_v16, 4 }
 0x1ce   : > { %7582 = vmatmul.mubr.msk.bf16.gmra.mrb[20].mxu0 %vm730_vm3, %v8064_v8  ;;  %v3817_v8 = vshrl.u32 %v6851_v10, 16  ;;  %v9564_v10 = vrot.slane %v3785_v7, 4  ;;  %v9584_v7 = vld [vmem:[%s8142_s29 + $0x50] sm:$0x1] }
 0x1cf   : > { %7585 = vmatprep.mubr.msk.bf16.mxu0 %vm730_vm3, %v8065_v44  ;;  %v4569_v44 = vrot.slane %v4567_v62, 4  ;;  %v3836_v11 = vshll.u32 %v9584_v7, 16 }
 0x1d0   : > { %v3819_v62 = vrot.slane %v3817_v8, 4  ;;  %v4581_v8 = vrot.slane %v9569_v6, 5 }
 0x1d1   : > { %v9557_v3 = vsel %vm8486_vm6, %v4569_v44, %v4570_v30  ;;  %v6891_v30 = vcombine.low %v3733_v48, %v3743_v34  ;;  %v3841_v44 = vshrl.u32 %v6854_v26, 16  ;;  %v9589_v48 = vrot.slane %v3826_v54, 5 }
 0x1d2   : > { %10494 = vst [vmem:[#allocation7_spill] sm:$0xff] %v9557_v3  ;;  %v3832_v34 = vrot.slane %v3830_v2, 4  ;;  %v3814_v3 = vrot.slane %v3812_v63, 5  ;;  %v4583_v41 = vrot.slane %v4581_v8, 4  ;;  %v3823_v29 = vor.u32 %v3822_v46, %v3819_v62 }
 0x1d3   : > { %v9600_v54 = vsel %vm8486_vm6, %v6956_v20, %v4581_v8  ;;  %v3854_v26 = vshrl.u32 %v9378_v61, 16  ;;  %v3843_v62 = vrot.slane %v3841_v44, 4  ;;  %v3846_v46 = vrot.slane %v3844_v18, 5  ;;  %v6860_v44 = vld [vmem:[%s8142_s29 + $0x6c] sm:$0xf] }
 0x1d4   : > { %10495 = vst [vmem:[#allocation8_spill] sm:$0xff] %v9600_v54  ;;  %v3833_v25 = vor.u32 %v3832_v34, %v9589_v48  ;;  %v3781_v20 = vsel %vm8175_vm2, %v9550_v51, %v9511_v9  ;;  %v3791_v61 = vsel %vm8175_vm2, %v9564_v10, %v9552_v36  ;;  %v3878_v8 = vshrl.u32 %v9596_v50, 16  ;;  %v9632_v54 = vld [vmem:[%s8142_s29 + $0x68] sm:$0x1] }
 0x1d5   : > { %v3815_v9 = vsel %vm8175_vm2, %v3810_v12, %v3814_v3  ;;  %v3824_v51 = vrot.slane %v3823_v29, 4  ;;  %v3838_v34 = vrot.slane %v3836_v11, 5  ;;  %v9628_v36 = vrot.slane %v3850_v1, 5 }
 0x1d6   : > { %7586 = vmatmul.mubr.msk.bf16.gmra.mrb[24].mxu0 %vm730_vm3, %v8066_v22  ;;  %v4584_v22 = vrot.slane %v9572_v53, 5  ;;  %v3856_v10 = vrot.slane %v3854_v26, 4  ;;  %v3834_v15 = vrot.slane %v3833_v25, 4  ;;  %v3880_v12 = vrot.slane %v3878_v8, 4 }
 0x1d7   : > { %7589 = vmatprep.mubr.msk.bf16.mxu0 %vm730_vm3, %v8067_v40  ;;  %v6857_v40 = vld [vmem:[%s8142_s29 + $0x60] sm:$0xf]  ;;  %v3892_v29 = vshll.u32 %v6860_v44, 16  ;;  %v3898_v11 = vshll.u32 %v9401_v24, 16  ;;  %v3902_v26 = vshrl.u32 %v9401_v24, 16  ;;  %v8070_v24 = vld [vmem:[%s10407_s1 + $0x88] sm:$0xff]  }
 0x1d8   : > { %v3865_v2 = vshrl.u32 %v6857_v40, 16  ;;  %v3868_v16 = vshll.u32 %v6857_v40, 16  ;;  %v9605_v63 = vsel %vm8486_vm6, %v4583_v41, %v4584_v22  ;;  %v3874_v41 = vshll.u32 %v9596_v50, 16 }
 0x1d9   : > { %10496 = vst [vmem:[#allocation9_spill] sm:$0xff] %v9605_v63  ;;  %v3805_v22 = vsel %vm8175_vm2, %v3800_v35, %v9531_v52  ;;  %v3847_v63 = vor.u32 %v3846_v46, %v3843_v62  ;;  %v3889_v52 = vshrl.u32 %v6860_v44, 16  ;;  %v6892_v35 = vcombine.low %v3757_v28, %v3767_v57  ;;  %v9645_v57 = vld [vmem:[%s8142_s29 + $0x7c] sm:$0xf] }
 0x1da   : > { %v3867_v18 = vrot.slane %v3865_v2, 4  ;;  %v3870_v40 = vrot.slane %v3868_v16, 5  ;;  %v9634_v3 = vrot.slane %v3874_v41, 5  ;;  %v6894_v1 = vcombine.low %v3805_v22, %v3815_v9  ;;  %v6863_v2 = vld [vmem:[%s8142_s29 + $0x78] sm:$0xf] }
 0x1db   : > { %v3857_v16 = vor.u32 %v3856_v10, %v9628_v36  ;;  %v3884_v28 = vshll.u32 %v9632_v54, 16  ;;  %v3839_v62 = vsel %vm8175_vm2, %v3834_v15, %v3838_v34  ;;  %v3848_v46 = vrot.slane %v3847_v63, 4  ;;  %v6866_v22 = vld [vmem:[%s8142_s29 + $0x84] sm:$0xf] }
 0x1dc   : > { %v3871_v25 = vor.u32 %v3870_v40, %v3867_v18  ;;  %v3881_v41 = vor.u32 %v3880_v12, %v9634_v3  ;;  %v3913_v8 = vshrl.u32 %v6863_v2, 16  ;;  %v3916_v44 = vshll.u32 %v6863_v2, 16 }
 0x1dd   : > { %v9655_v9 = vrot.slane %v3898_v11, 5  ;;  %v3922_v15 = vshll.u32 %v9645_v57, 16  ;;  %v3926_v63 = vshrl.u32 %v9645_v57, 16  ;;  %v3858_v34 = vrot.slane %v3857_v16, 4  ;;  %v9666_v16 = vld [vmem:[%s8142_s29 + $0x80] sm:$0x1] }
 0x1de   : > { %7590 = vmatmul.mubr.msk.bf16.gmra.mrb[28].mxu0 %vm730_vm3, %v8068_v39  ;;  %v3860_v39 = vshll.u32 %v9381_v58, 16  ;;  %v3829_v58 = vsel %vm8175_vm2, %v3824_v51, %v9589_v48  ;;  %v3894_v48 = vrot.slane %v3892_v29, 5  ;;  %v3904_v51 = vrot.slane %v3902_v26, 4 }
 0x1df   : > { %7597 = vmatprep.mubr.msk.bf16.mxu0 %vm730_vm3, %v6891_v30  ;;  %v6893_v30 = vcombine.low %v3781_v20, %v3791_v61  ;;  %v3891_v61 = vrot.slane %v3889_v52, 4  ;;  %v3872_v10 = vrot.slane %v3871_v25, 4  ;;  %v3886_v18 = vrot.slane %v3884_v28, 5 }
 0x1e0   : > { %v3862_v20 = vrot.slane %v3860_v39, 5  ;;  %v3908_v40 = vshll.u32 %v9404_v19, 16  ;;  %v3937_v39 = vshrl.u32 %v6866_v22, 16  ;;  %v3940_v52 = vshll.u32 %v6866_v22, 16  ;;  %v9684_v22 = vld [vmem:[%s8142_s29 + $0x94] sm:$0xf] }
 0x1e1   : > { %v3950_v12 = vshrl.u32 %v9431_v33, 16  ;;  %v3882_v29 = vrot.slane %v3881_v41, 4  ;;  %v3895_v11 = vor.u32 %v3894_v48, %v3891_v61  ;;  %v3915_v26 = vrot.slane %v3913_v8, 4 }
 0x1e2   : > { %v3905_v2 = vor.u32 %v3904_v51, %v9655_v9  ;;  %v9668_v25 = vrot.slane %v3922_v15, 5  ;;  %v3928_v19 = vrot.slane %v3926_v63, 4  ;;  %v3853_v28 = vsel %vm8175_vm2, %v3848_v46, %v9628_v36 }
 0x1e3   : > { %v3877_v61 = vsel %vm8175_vm2, %v3872_v10, %v9634_v3  ;;  %v9678_v41 = vrot.slane %v3908_v40, 5  ;;  %v3942_v48 = vrot.slane %v3940_v52, 5  ;;  %v3887_v36 = vsel %vm8175_vm2, %v3882_v29, %v3886_v18 }
 0x1e4   : > { %v3896_v46 = vrot.slane %v3895_v11, 4  ;;  %v3932_v51 = vshll.u32 %v9666_v16, 16  ;;  %v3906_v3 = vrot.slane %v3905_v2, 4  ;;  %v3974_v10 = vshrl.u32 %v9684_v22, 16 }
 0x1e5   : > { %v3956_v52 = vshll.u32 %v9434_v0, 16 }
 0x1e6   : > { %7598 = vmatmul.mubr.msk.bf16.vlgmr.msra.gmra.mrb[0].mxu0 %vm730_vm3, %v6892_v35  ;;  %v3946_v35 = vshll.u32 %v9431_v33, 16  ;;  %v3863_v33 = vsel %vm8175_vm2, %v3858_v34, %v3862_v20  ;;  %v3970_v34 = vshll.u32 %v9684_v22, 16  ;;  %v3934_v11 = vrot.slane %v3932_v51, 5 }
 0x1e7   : > { %7630 = vmatpush3.bf16.msra.mxu0 %v9371_v14  ;;  %7601 = vmatprep.mubr.msk.bf16.mxu0 %vm730_vm3, %v6893_v30  ;;  %v3918_v14 = vrot.slane %v3916_v44, 5  ;;  %v6895_v30 = vcombine.low %v3829_v58, %v3839_v62  ;;  %v6869_v58 = vld [vmem:[%s8142_s29 + $0x90] sm:$0xf]  ;;  %v3939_v62 = vrot.slane %v3937_v39, 4  ;;  %v3952_v44 = vrot.slane %v3950_v12, 4 }
 0x1e8   : > { %7631 = vmatprep.subr.bf16.mxu0 %v8070_v24  ;;  %v9681_v8 = vrot.slane %v3946_v35, 5  ;;  %v3961_v15 = vshrl.u32 %v6869_v58, 16  ;;  %v3964_v63 = vshll.u32 %v6869_v58, 16  ;;  %v6896_v18 = vcombine.low %v3853_v28, %v3863_v33  ;;  %v6875_v28 = vld [vmem:[%s8142_s29 + $0xa8] sm:$0xf] }
 0x1e9   : > { %v3919_v20 = vor.u32 %v3918_v14, %v3915_v26  ;;  %v3943_v40 = vor.u32 %v3942_v48, %v3939_v62  ;;  %v6897_v35 = vcombine.low %v3877_v61, %v3887_v36  ;;  %v3901_v12 = vsel %vm8175_vm2, %v3896_v46, %v9655_v9  ;;  %v9701_v26 = vld [vmem:[%s8142_s29 + $0x98] sm:$0x1]  ;;  %v9710_v62 = vld [vmem:[%s8142_s29 + $0xac] sm:$0xf] }
 0x1ea   : > { %v3953_v39 = vor.u32 %v3952_v44, %v9681_v8  ;;  %v3911_v14 = vsel %vm8175_vm2, %v3906_v3, %v9678_v41  ;;  %v3963_v2 = vrot.slane %v3961_v15, 4  ;;  %v9707_v0 = vrot.slane %v3970_v34, 5 }
 0x1eb   : > { %7632 = vmatpush3.bf16.msra.mxu0 %v8070_v24  ;;  %v3929_v24 = vor.u32 %v3928_v19, %v9668_v25  ;;  %v3920_v29 = vrot.slane %v3919_v20, 4  ;;  %v3966_v19 = vrot.slane %v3964_v63, 5  ;;  %v3976_v33 = vrot.slane %v3974_v10, 4 }
 0x1ec   : > { %v3944_v9 = vrot.slane %v3943_v40, 4  ;;  %v3954_v48 = vrot.slane %v3953_v39, 4  ;;  %v3958_v44 = vrot.slane %v3956_v52, 5  ;;  %v3980_v36 = vshll.u32 %v9701_v26, 16 }
 0x1ed   : > { %v3994_v46 = vshll.u32 %v9473_v23, 16  ;;  %v3998_v41 = vshrl.u32 %v9473_v23, 16  ;;  %v4009_v20 = vshrl.u32 %v6875_v28, 16  ;;  %v4012_v51 = vshll.u32 %v6875_v28, 16 }
 0x1ee   : > { %7602 = vmatmul.mubr.msk.bf16.gmra.mrb[4].mxu0 %vm730_vm3, %v6894_v1  ;;  %v6872_v1 = vld [vmem:[%s8142_s29 + $0x9c] sm:$0xf]  ;;  %v3925_v3 = vsel %vm8175_vm2, %v3920_v29, %v9668_v25  ;;  %v4018_v15 = vshll.u32 %v9710_v62, 16  ;;  %v4022_v63 = vshrl.u32 %v9710_v62, 16  ;;  %v3967_v34 = vor.u32 %v3966_v19, %v3963_v2  ;;  %v9733_v2 = vld [vmem:[%s8142_s29 + $0xb0] sm:$0x1] }
 0x1ef   : > { %7605 = vmatprep.mubr.msk.bf16.mxu0 %vm730_vm3, %v6895_v30  ;;  %v3930_v30 = vrot.slane %v3929_v24, 4  ;;  %v3985_v61 = vshrl.u32 %v6872_v1, 16  ;;  %v3988_v58 = vshll.u32 %v6872_v1, 16  ;;  %v3977_v23 = vor.u32 %v3976_v33, %v9707_v0  ;;  %v6878_v33 = vld [vmem:[%s8142_s29 + $0xb4] sm:$0xf] }
 0x1f0   : > { %v3949_v25 = vsel %vm8175_vm2, %v3944_v9, %v9681_v8  ;;  %v3959_v40 = vsel %vm8175_vm2, %v3954_v48, %v3958_v44  ;;  %v3982_v39 = vrot.slane %v3980_v36, 5  ;;  %v9730_v52 = vrot.slane %v3994_v46, 5 }
 0x1f1   : > { %v3935_v24 = vsel %vm8175_vm2, %v3930_v30, %v3934_v11  ;;  %v3987_v10 = vrot.slane %v3985_v61, 4  ;;  %v4000_v1 = vrot.slane %v3998_v41, 4  ;;  %v4011_v29 = vrot.slane %v4009_v20, 4 }
 0x1f2   : > { %v4014_v11 = vrot.slane %v4012_v51, 5  ;;  %v6899_v30 = vcombine.low %v3925_v3, %v3935_v24  ;;  %v4020_v19 = vrot.slane %v4018_v15, 5  ;;  %v4024_v28 = vrot.slane %v4022_v63, 4 }
 0x1f3   : > { %v3968_v61 = vrot.slane %v3967_v34, 4  ;;  %v3978_v8 = vrot.slane %v3977_v23, 4  ;;  %v4004_v9 = vshll.u32 %v9476_v45, 16  ;;  %v6900_v48 = vcombine.low %v3949_v25, %v3959_v40 }
 0x1f4   : > { %v4001_v44 = vor.u32 %v4000_v1, %v9730_v52  ;;  %v4015_v36 = vor.u32 %v4014_v11, %v4011_v29  ;;  %v4028_v46 = vshll.u32 %v9733_v2, 16  ;;  %v4033_v41 = vshrl.u32 %v6878_v33, 16 }
 0x1f5   : > { %v4025_v20 = vor.u32 %v4024_v28, %v4020_v19  ;;  %v4036_v51 = vshll.u32 %v6878_v33, 16  ;;  %v4042_v3 = vshll.u32 %v9518_v13, 16  ;;  %v4046_v24 = vshrl.u32 %v9518_v13, 16 }
 0x1f6   : > { %7606 = vmatmul.mubr.msk.bf16.gmra.mrb[8].mxu0 %vm730_vm3, %v6896_v18  ;;  %v3990_v18 = vrot.slane %v3988_v58, 5  ;;  %v3973_v45 = vsel %vm8175_vm2, %v3968_v61, %v9707_v0  ;;  %v3983_v15 = vsel %vm8175_vm2, %v3978_v8, %v3982_v39  ;;  %v4006_v34 = vrot.slane %v4004_v9, 5 }
 0x1f7   : > { %7609 = vmatprep.mubr.msk.bf16.mxu0 %vm730_vm3, %v6897_v35  ;;  %v6898_v35 = vcombine.low %v3901_v12, %v3911_v14  ;;  %v6881_v12 = vld [vmem:[%s8142_s29 + $0xc0] sm:$0xf]  ;;  %v9741_v14 = vld [vmem:[%s8142_s29 + $0xc4] sm:$0xf]  ;;  %v4002_v40 = vrot.slane %v4001_v44, 4  ;;  %v4016_v13 = vrot.slane %v4015_v36, 4  ;;  %v6901_v28 = vcombine.low %v3973_v45, %v3983_v15 }
 0x1f8   : > { %v3991_v58 = vor.u32 %v3990_v18, %v3987_v10  ;;  %v4057_v23 = vshrl.u32 %v6881_v12, 16  ;;  %v4060_v10 = vshll.u32 %v6881_v12, 16  ;;  %v4066_v18 = vshll.u32 %v9741_v14, 16 }
 0x1f9   : > { %v4070_v25 = vshrl.u32 %v9741_v14, 16  ;;  %v4030_v1 = vrot.slane %v4028_v46, 5  ;;  %v4035_v29 = vrot.slane %v4033_v41, 4  ;;  %v4026_v11 = vrot.slane %v4025_v20, 4  ;;  %v9762_v46 = vld [vmem:[%s8142_s29 + $0xc8] sm:$0x1] }
 0x1fa   : > { %v3992_v63 = vrot.slane %v3991_v58, 4  ;;  %v4044_v0 = vrot.slane %v4042_v3, 5  ;;  %v4059_v39 = vrot.slane %v4057_v23, 4  ;;  %v4062_v33 = vrot.slane %v4060_v10, 5  ;;  %v6884_v58 = vld [vmem:[%s8142_s29 + $0xcc] sm:$0xf] }
 0x1fb   : > { %v4068_v61 = vrot.slane %v4066_v18, 5  ;;  %v4072_v8 = vrot.slane %v4070_v25, 4  ;;  %v4007_v44 = vsel %vm8175_vm2, %v4002_v40, %v4006_v34  ;;  %v4052_v36 = vshll.u32 %v9521_v43, 16 }
 0x1fc   : > { %v3997_v9 = vsel %vm8175_vm2, %v3992_v63, %v9730_v52  ;;  %v4021_v41 = vsel %vm8175_vm2, %v4016_v13, %v4020_v19  ;;  %v4031_v12 = vsel %vm8175_vm2, %v4026_v11, %v4030_v1  ;;  %v4081_v52 = vshrl.u32 %v6884_v58, 16 }
 0x1fd   : > { %v4084_v3 = vshll.u32 %v6884_v58, 16  ;;  %v4094_v43 = vshrl.u32 %v9569_v6, 16  ;;  %v4063_v45 = vor.u32 %v4062_v33, %v4059_v39  ;;  %v4073_v15 = vor.u32 %v4072_v8, %v4068_v61 }
 0x1fe   : > { %7610 = vmatmul.mubr.msk.bf16.gmra.mrb[12].mxu0 %vm730_vm3, %v6898_v35  ;;  %v4038_v35 = vrot.slane %v4036_v51, 5  ;;  %v6902_v63 = vcombine.low %v3997_v9, %v4007_v44  ;;  %v6903_v34 = vcombine.low %v4021_v41, %v4031_v12  ;;  %v4054_v10 = vrot.slane %v4052_v36, 5  ;;  %v6925_v9 = vld [vmem:[%s8142_s29 + $0x18] sm:$0xe] }
 0x1ff   : > { %7613 = vmatprep.mubr.msk.bf16.mxu0 %vm730_vm3, %v6899_v30  ;;  %v4048_v30 = vrot.slane %v4046_v24, 4  ;;  %v4090_v24 = vshll.u32 %v9569_v6, 16  ;;  %v4083_v18 = vrot.slane %v4081_v52, 4  ;;  %v4086_v25 = vrot.slane %v4084_v3, 5 }
 0x200   : > { %v4039_v20 = vor.u32 %v4038_v35, %v4035_v29  ;;  %v4096_v13 = vrot.slane %v4094_v43, 4  ;;  %v4064_v1 = vrot.slane %v4063_v45, 4  ;;  %v4074_v29 = vrot.slane %v4073_v15, 4  ;;  %v6926_v43 = vld [vmem:[%s8142_s29 + $0x24] sm:$0xe] }
 0x201   : > { %v4049_v51 = vor.u32 %v4048_v30, %v4044_v0  ;;  %v4092_v40 = vrot.slane %v4090_v24, 5  ;;  %v4087_v30 = vor.u32 %v4086_v25, %v4083_v18  ;;  %v4100_v39 = vshll.u32 %v9572_v53, 16  ;;  %v6927_v45 = vld [vmem:[%s8142_s29 + $0x30] sm:$0xe] }
 0x202   : > { %v4040_v19 = vrot.slane %v4039_v20, 4  ;;  %v4069_v33 = vsel %vm8175_vm2, %v4064_v1, %v4068_v61  ;;  %v4476_v58 = vrot.slane %v9413_v21, 5  ;;  %v6941_v20 = vrot.slane %v6925_v9, 9 }
 0x203   : > { %v4050_v23 = vrot.slane %v4049_v51, 4  ;;  %v4088_v36 = vrot.slane %v4087_v30, 4  ;;  %v4102_v12 = vrot.slane %v4100_v39, 5  ;;  %v4479_v53 = vrot.slane %v9447_v55, 5 }
 0x204   : > { %v4045_v6 = vsel %vm8175_vm2, %v4040_v19, %v4044_v0  ;;  %v4478_v51 = vrot.slane %v4476_v58, 4  ;;  %v4483_v52 = vrot.slane %v9443_v4, 5  ;;  %v4477_v3 = vsel %vm8486_vm6, %v6941_v20, %v4476_v58  ;;  %v6933_v20 = vld [vmem:[%s8142_s29 + $0x78] sm:$0xe] }
 0x205   : > { %v4055_v35 = vsel %vm8175_vm2, %v4050_v23, %v4054_v10  ;;  %v4093_v61 = vsel %vm8175_vm2, %v4088_v36, %v4092_v40  ;;  %v4490_v55 = vrot.slane %v9470_v5, 5  ;;  %v6943_v19 = vrot.slane %v6927_v45, 9 }
 0x206   : > { %7614 = vmatmul.mubr.msk.bf16.gmra.mrb[16].mxu0 %vm730_vm3, %v6900_v48  ;;  %v4076_v48 = vshll.u32 %v9762_v46, 16  ;;  %v6904_v0 = vcombine.low %v4045_v6, %v4055_v35  ;;  %v4480_v24 = vsel %vm8486_vm6, %v4478_v51, %v4479_v53  ;;  %v4493_v23 = vrot.slane %v9504_v37, 5 }
 0x207   : > { %7617 = vmatprep.mubr.msk.bf16.mxu0 %vm730_vm3, %v6901_v28  ;;  %v4097_v28 = vor.u32 %v4096_v13, %v4092_v40  ;;  %v4492_v4 = vrot.slane %v4490_v55, 4  ;;  %v4497_v18 = vrot.slane %v9489_v31, 5  ;;  %v4491_v25 = vsel %vm8486_vm6, %v6943_v19, %v4490_v55  ;;  %v6928_v40 = vld [vmem:[%s8142_s29 + $0x3c] sm:$0xe]  ;;  %v6929_v13 = vld [vmem:[%s8142_s29 + $0x48] sm:$0xe] }
 0x208   : > { %v4078_v11 = vrot.slane %v4076_v48, 5  ;;  %v6961_v48 = vcombine.low %v4477_v3, %v4480_v24  ;;  %v4504_v37 = vrot.slane %v9535_v60, 5  ;;  %v4500_v35 = vrot.slane %v9529_v56, 5  ;;  %v6935_v24 = vld [vmem:[%s8142_s29 + $0x90] sm:$0xe] }
 0x209   : > { %v4098_v41 = vrot.slane %v4097_v28, 4  ;;  %v4494_v38 = vsel %vm8486_vm6, %v4492_v4, %v4493_v23  ;;  %v4499_v6 = vrot.slane %v4497_v18, 4  ;;  %v6945_v30 = vrot.slane %v6929_v13, 9  ;;  %v6939_v23 = vld [vmem:[%s8142_s29 + $0xc0] sm:$0xe]  ;;  %v10504_v13 = vld [vmem:[#allocation6_spill] sm:$0xff] }
 0x20a   : > { %v4079_v8 = vsel %vm8175_vm2, %v4074_v29, %v4078_v11  ;;  %v6963_v29 = vcombine.low %v4491_v25, %v4494_v38  ;;  %v6944_v11 = vrot.slane %v6928_v40, 9  ;;  %v4506_v28 = vrot.slane %v4504_v37, 4  ;;  %v10501_v25 = vld [vmem:[#allocation4_spill] sm:$0xff] }
 0x20b   : > { %v6905_v44 = vcombine.low %v4069_v33, %v4079_v8  ;;  %v4103_v21 = vsel %vm8175_vm2, %v4098_v41, %v4102_v12  ;;  %v4507_v31 = vrot.slane %v9584_v7, 5  ;;  %v4501_v60 = vsel %vm8486_vm6, %v4499_v6, %v4500_v35  ;;  %v6931_v7 = vld [vmem:[%s8142_s29 + $0x60] sm:$0xe] }
 0x20c   : > { %v6906_v15 = vcombine.low %v4093_v61, %v4103_v21  ;;  %v4498_v39 = vsel %vm8486_vm6, %v6944_v11, %v4497_v18  ;;  %v4505_v33 = vsel %vm8486_vm6, %v6945_v30, %v4504_v37  ;;  %v4518_v8 = vrot.slane %v9596_v50, 5  ;;  %v10508_v11 = vld [vmem:[#allocation9_spill] sm:$0xff] }
 0x20d   : > { %v4508_v56 = vsel %vm8486_vm6, %v4506_v28, %v4507_v31  ;;  %v6964_v58 = vcombine.low %v4498_v39, %v4501_v60  ;;  %v4521_v36 = vrot.slane %v9632_v54, 5  ;;  %v4532_v50 = vrot.slane %v9645_v57, 5  ;;  %v9945_v30 = vld [vmem:[%s10408_s2] ss:$0 sm:$0xff] }
 0x20e   : > { %7618 = vmatmul.mubr.msk.bf16.gmra.mrb[20].mxu0 %vm730_vm3, %v6902_v63  ;;  %v6942_v63 = vrot.slane %v6926_v43, 9  ;;  %v6965_v9 = vcombine.low %v4505_v33, %v4508_v56  ;;  %v6949_v53 = vrot.slane %v6933_v20, 9  ;;  %v4535_v21 = vrot.slane %v9666_v16, 5 }
 0x20f   : > { %7621 = vmatprep.mubr.msk.bf16.mxu0 %vm730_vm3, %v6903_v34  ;;  %v4485_v34 = vrot.slane %v4483_v52, 4  ;;  %v4534_v61 = vrot.slane %v4532_v50, 4  ;;  %v10497_v54 = vcombine.low %v9390_v32, %v9395_v17  ;;  %v4546_v3 = vrot.slane %v9684_v22, 5 }
 0x210   : > { %v4484_v5 = vsel %vm8486_vm6, %v6942_v63, %v4483_v52  ;;  %v4533_v52 = vsel %vm8486_vm6, %v6949_v53, %v4532_v50  ;;  %v6951_v55 = vrot.slane %v6935_v24, 9  ;;  %v4549_v45 = vrot.slane %v9701_v26, 5 }
 0x211   : > { %v4487_v10 = vsel %vm8486_vm6, %v4485_v34, %v4486_v27  ;;  %v4536_v57 = vsel %vm8486_vm6, %v4534_v61, %v4535_v21  ;;  %v4548_v16 = vrot.slane %v4546_v3, 4  ;;  %v10498_v32 = vcombine.low %v9417_v49, %v9423_v59  ;;  %v10499_v49 = vld [vmem:[#allocation3_spill] sm:$0xff] }
 0x212   : > { %v6962_v1 = vcombine.low %v4484_v5, %v4487_v10  ;;  %v6969_v43 = vcombine.low %v4533_v52, %v4536_v57  ;;  %v4547_v17 = vsel %vm8486_vm6, %v6951_v55, %v4546_v3  ;;  %v4563_v27 = vrot.slane %v9733_v2, 5 }
 0x213   : > { %v4550_v22 = vsel %vm8486_vm6, %v4548_v16, %v4549_v45  ;;  %v10500_v59 = vcombine.low %v9451_v42, %v10499_v49  ;;  %v6955_v10 = vrot.slane %v6939_v23, 9  ;;  %v4577_v2 = vrot.slane %v9762_v46, 5  ;;  %v10502_v42 = vld [vmem:[#allocation5_spill] sm:$0xff]  ;;  %v10507_v46 = vld [vmem:[#allocation8_spill] sm:$0xff] }
 0x214   : > { %v6971_v63 = vcombine.low %v4547_v17, %v4550_v22  ;;  %v10503_v38 = vcombine.low %v10501_v25, %v10502_v42  ;;  %v10509_v6 = vcombine.low %v10507_v46, %v10508_v11  ;;  %v8085_v35 = vmov 0.0  }
 0x215   : > { %4964 = vst.msk [vmem:[#allocation2] sm:$0xff] %vm4963_vm7, %v8085_v35  ;;  %4965 = vst.msk [vmem:[#allocation2 + $0x8] sm:$0xff] %vm4963_vm7, %v8085_v35 }
 0x216   : > { %7622 = vmatmul.mubr.msk.bf16.gmra.mrb[24].mxu0 %vm730_vm3, %v6904_v0  ;;  %v6947_v0 = vrot.slane %v6931_v7, 9  ;;  %4969 = vst.msk [vmem:[#allocation2 + $0x198] sm:$0xff] %vm4963_vm7, %v8085_v35  ;;  %4970 = vst.msk [vmem:[#allocation2 + $0x1a0] sm:$0xff] %vm4963_vm7, %v8085_v35 }
 0x217   : > { %7625 = vmatprep.mubr.msk.bf16.mxu0 %vm730_vm3, %v6905_v44  ;;  %v4520_v44 = vrot.slane %v4518_v8, 4  ;;  %4974 = vst.msk [vmem:[#allocation2 + $0x18] sm:$0x1] %vm4972_vm8, %v8085_v35  ;;  %4975 = vst.msk [vmem:[#allocation2 + $0x30] sm:$0x1] %vm4972_vm8, %v8085_v35 }
 0x218   : > { %v4519_v41 = vsel %vm8486_vm6, %v6947_v0, %v4518_v8  ;;  %4976 = vst.msk [vmem:[#allocation2 + $0x48] sm:$0x1] %vm4972_vm8, %v8085_v35  ;;  %4977 = vst.msk [vmem:[#allocation2 + $0x60] sm:$0x1] %vm4972_vm8, %v8085_v35 }
 0x219   : > { %v4522_v12 = vsel %vm8486_vm6, %v4520_v44, %v4521_v36  ;;  %4978 = vst.msk [vmem:[#allocation2 + $0x78] sm:$0x1] %vm4972_vm8, %v8085_v35  ;;  %4979 = vst.msk [vmem:[#allocation2 + $0x90] sm:$0x1] %vm4972_vm8, %v8085_v35 }
 0x21a   : > { %v6967_v51 = vcombine.low %v4519_v41, %v4522_v12  ;;  %4980 = vst.msk [vmem:[#allocation2 + $0xa8] sm:$0x1] %vm4972_vm8, %v8085_v35  ;;  %4981 = vst.msk [vmem:[#allocation2 + $0xc0] sm:$0x1] %vm4972_vm8, %v8085_v35 }
 0x21b   : > { %4982 = vst.msk [vmem:[#allocation2 + $0xd8] sm:$0x1] %vm4972_vm8, %v8085_v35  ;;  %4983 = vst.msk [vmem:[#allocation2 + $0xf0] sm:$0x1] %vm4972_vm8, %v8085_v35 }
 0x21c   : > { %4984 = vst.msk [vmem:[#allocation2 + $0x108] sm:$0x1] %vm4972_vm8, %v8085_v35  ;;  %4985 = vst.msk [vmem:[#allocation2 + $0x120] sm:$0x1] %vm4972_vm8, %v8085_v35  ;;  %v5091_v25 = vld [vmem:[#allocation2 + $0x1] sm:$0xff] }
 0x21d   : > { %4986 = vst.msk [vmem:[#allocation2 + $0x138] sm:$0x1] %vm4972_vm8, %v8085_v35  ;;  %4987 = vst.msk [vmem:[#allocation2 + $0x150] sm:$0x1] %vm4972_vm8, %v8085_v35 }
 0x21e   : > { %7626 = vmatmul.mubr.msk.bf16.gmra.mrb[28].mxu0 %vm730_vm3, %v6906_v15  ;;  %v4560_v15 = vrot.slane %v9710_v62, 5  ;;  %v4574_v62 = vrot.slane %v9741_v14, 5  ;;  %4988 = vst.msk [vmem:[#allocation2 + $0x168] sm:$0x1] %vm4972_vm8, %v8085_v35  ;;  %4989 = vst.msk [vmem:[#allocation2 + $0x180] sm:$0x1] %vm4972_vm8, %v8085_v35 }
 0x21f   : > { %7633 = vmatprep.mubr.msk.bf16.mxu0 %vm730_vm3, %v6961_v48  ;;  %v6937_v48 = vld [vmem:[%s8142_s29 + $0xa8] sm:$0xe]  ;;  %4992 = vst.msk [vmem:[#allocation2 + $0x29] sm:$0x1] %vm4972_vm8, %v8085_v35  ;;  %4993 = vst.msk [vmem:[#allocation2 + $0x41] sm:$0x1] %vm4972_vm8, %v8085_v35 }
 0x220   : > { %v6953_v34 = vrot.slane %v6937_v48, 9  ;;  %v4562_v26 = vrot.slane %v4560_v15, 4  ;;  %v4576_v18 = vrot.slane %v4574_v62, 4  ;;  %v4575_v40 = vsel %vm8486_vm6, %v6955_v10, %v4574_v62  ;;  %4994 = vst.msk [vmem:[#allocation2 + $0x59] sm:$0x1] %vm4972_vm8, %v8085_v35 }
 0x221   : > { %4995 = vst.msk [vmem:[#allocation2 + $0x71] sm:$0x1] %vm4972_vm8, %v8085_v35  ;;  %4996 = vst.msk [vmem:[#allocation2 + $0x89] sm:$0x1] %vm4972_vm8, %v8085_v35 }
 0x222   : > { %v4561_v19 = vsel %vm8486_vm6, %v6953_v34, %v4560_v15  ;;  %v4564_v4 = vsel %vm8486_vm6, %v4562_v26, %v4563_v27  ;;  %v4578_v37 = vsel %vm8486_vm6, %v4576_v18, %v4577_v2  ;;  %4997 = vst.msk [vmem:[#allocation2 + $0xa1] sm:$0x1] %vm4972_vm8, %v8085_v35  ;;  %4998 = vst.msk [vmem:[#allocation2 + $0xb9] sm:$0x1] %vm4972_vm8, %v8085_v35 }
 0x223   : > { %v6973_v5 = vcombine.low %v4561_v19, %v4564_v4  ;;  %v6975_v14 = vcombine.low %v4575_v40, %v4578_v37  ;;  %4999 = vst.msk [vmem:[#allocation2 + $0xd1] sm:$0x1] %vm4972_vm8, %v8085_v35  ;;  %5000 = vst.msk [vmem:[#allocation2 + $0xe9] sm:$0x1] %vm4972_vm8, %v8085_v35 }
 0x224   : > { %5001 = vst.msk [vmem:[#allocation2 + $0x101] sm:$0x1] %vm4972_vm8, %v8085_v35  ;;  %5002 = vst.msk [vmem:[#allocation2 + $0x119] sm:$0x1] %vm4972_vm8, %v8085_v35 }
 0x225   : > { %5003 = vst.msk [vmem:[#allocation2 + $0x131] sm:$0x1] %vm4972_vm8, %v8085_v35  ;;  %5004 = vst.msk [vmem:[#allocation2 + $0x149] sm:$0x1] %vm4972_vm8, %v8085_v35 }
 0x226   : > { %7634 = vmatmul.mubr.msk.bf16.vlgmr.msra.gmra.mrb[0].mxu0 %vm730_vm3, %v6962_v1  ;;  %v10505_v1 = vld [vmem:[#allocation7_spill] sm:$0xff]  ;;  %5005 = vst.msk [vmem:[#allocation2 + $0x161] sm:$0x1] %vm4972_vm8, %v8085_v35  ;;  %5006 = vst.msk [vmem:[#allocation2 + $0x179] sm:$0x1] %vm4972_vm8, %v8085_v35 }
 0x227   : > { %7637 = vmatprep.mubr.msk.bf16.mxu0 %vm730_vm3, %v6963_v29  ;;  %v10506_v29 = vcombine.low %v10504_v13, %v10505_v1  ;;  %5007 = vst.msk [vmem:[#allocation2 + $0x191] sm:$0x1] %vm4972_vm8, %v8085_v35  ;;  %4973 = vst.msk [vmem:[#allocation2] sm:$0x1] %vm4972_vm8, %v8085_v35 }
 0x228   : > { %4990 = vst.msk [vmem:[#allocation2 + $0x198] sm:$0x1] %vm4972_vm8, %v8085_v35 }
 0x229   : > { %4967 = vst.msk [vmem:[#allocation2 + $0x10] sm:$0x3] %vm4966_vm9, %v8085_v35  ;;  %4971 = vst.msk [vmem:[#allocation2 + $0x1a8] sm:$0x3] %vm4966_vm9, %v8085_v35 }
 0x22a   : > { %4991 = vst.msk [vmem:[#allocation2 + $0x11] sm:$0x1] %vm4972_vm8, %v8085_v35  ;;  %5008 = vst.msk [vmem:[#allocation2 + $0x1a9] sm:$0x1] %vm4972_vm8, %v8085_v35 }
 0x22e   : > { %7638 = vmatmul.mubr.msk.bf16.gmra.mrb[4].mxu0 %vm730_vm3, %v6964_v58 }
 0x22f   : > { %7641 = vmatprep.mubr.msk.bf16.mxu0 %vm730_vm3, %v6965_v9 }
 0x230   : > { %v5092_v42 = vld [vmem:[#allocation2 + $0x9] sm:$0xff] }
 0x231   : > { %v5125_v46 = vpack.c.bf16 %v5092_v42, %v5091_v25 }
 0x236   : > { %7642 = vmatmul.mubr.msk.bf16.gmra.mrb[8].mxu0 %vm730_vm3, %v10497_v54 }
 0x237   : > { %7645 = vmatprep.mubr.msk.bf16.mxu0 %vm730_vm3, %v6967_v51 }
 0x23e   : > { %7646 = vmatmul.mubr.msk.bf16.gmra.mrb[12].mxu0 %vm730_vm3, %v10498_v32 }
 0x23f   : > { %7649 = vmatprep.mubr.msk.bf16.mxu0 %vm730_vm3, %v6969_v43 }
 0x246   : > { %7650 = vmatmul.mubr.msk.bf16.gmra.mrb[16].mxu0 %vm730_vm3, %v10500_v59 }
 0x247   : > { %7653 = vmatprep.mubr.msk.bf16.mxu0 %vm730_vm3, %v6971_v63 }
 0x24e   : > { %7654 = vmatmul.mubr.msk.bf16.gmra.mrb[20].mxu0 %vm730_vm3, %v10503_v38 }
 0x24f   : > { %7657 = vmatprep.mubr.msk.bf16.mxu0 %vm730_vm3, %v6973_v5 }
 0x256   : > { %7658 = vmatmul.mubr.msk.bf16.gmra.mrb[24].mxu0 %vm730_vm3, %v10506_v29 }
 0x257   : > { %7661 = vmatprep.mubr.msk.bf16.mxu0 %vm730_vm3, %v6975_v14 }
 0x25e   : > { %7662 = vmatmul.mubr.msk.bf16.gmra.mrb[28].mxu0 %vm730_vm3, %v10509_v6 }
 0x2f9   : > { %v7635_v28 = vpop.f32.mrb[0].mxu0 }
 0x2fa   : > { %v4901_v31 = vadd.f32 %v7635_v28, %v9945_v30  ;;  %v4733_v39 = vpop.f32.mrb[1].mxu0 }
 0x2fb   : > { %v4899_v60 = vadd.f32 %v9945_v30, %v4733_v39  ;;  %v7636_v33 = vpop.f32.mrb[2].mxu0 }
 0x2fc   : > { %v4933_v56 = vmax.f32 %v4901_v31, 0.0  ;;  %v4902_v8 = vadd.f32 %v7636_v33, %v9945_v30  ;;  %v4736_v7 = vpop.f32.mrb[3].mxu0  ;;  %v5145_v33 = vsel %vm4963_vm7, %v5125_v46, 0 }
 0x2fd   : > { %v4931_v58 = vmax.f32 %v4899_v60, 0.0  ;;  %v4900_v9 = vadd.f32 %v9945_v30, %v4736_v7 }
 0x2fe   : > { %5012 = vst.msk [vmem:[#allocation2 + $0x31] sm:$0xff] %vm4963_vm7, %v4933_v56  ;;  %v4934_v0 = vmax.f32 %v4902_v8, 0.0 }
 0x2ff   : > { %5010 = vst.msk [vmem:[#allocation2 + $0x19] sm:$0xff] %vm4963_vm7, %v4931_v58  ;;  %v4932_v44 = vmax.f32 %v4900_v9, 0.0 }
 0x300   : > { %5013 = vst.msk [vmem:[#allocation2 + $0x39] sm:$0xff] %vm4963_vm7, %v4934_v0 }
 0x301   : > { %5011 = vst.msk [vmem:[#allocation2 + $0x21] sm:$0xff] %vm4963_vm7, %v4932_v44  ;;  %v7639_v36 = vpop.f32.mrb[4].mxu0 }
 0x302   : > { %v4905_v41 = vadd.f32 %v7639_v36, %v9945_v30  ;;  %v4749_v12 = vpop.f32.mrb[5].mxu0 }
 0x303   : > { %v4903_v50 = vadd.f32 %v9945_v30, %v4749_v12  ;;  %v7640_v20 = vpop.f32.mrb[6].mxu0 }
 0x304   : > { %v4937_v51 = vmax.f32 %v4905_v41, 0.0  ;;  %v4906_v53 = vadd.f32 %v7640_v20, %v9945_v30  ;;  %v4752_v61 = vpop.f32.mrb[7].mxu0 }
 0x305   : > { %v4935_v21 = vmax.f32 %v4903_v50, 0.0  ;;  %v4904_v54 = vadd.f32 %v9945_v30, %v4752_v61 }
 0x306   : > { %5016 = vst.msk [vmem:[#allocation2 + $0x61] sm:$0xff] %vm4963_vm7, %v4937_v51  ;;  %v4938_v52 = vmax.f32 %v4906_v53, 0.0  ;;  %v5093_v51 = vld [vmem:[#allocation2 + $0x19] sm:$0xff] }
 0x307   : > { %5014 = vst.msk [vmem:[#allocation2 + $0x49] sm:$0xff] %vm4963_vm7, %v4935_v21  ;;  %v4936_v57 = vmax.f32 %v4904_v54, 0.0 }
 0x308   : > { %5017 = vst.msk [vmem:[#allocation2 + $0x69] sm:$0xff] %vm4963_vm7, %v4938_v52  ;;  %v5094_v41 = vld [vmem:[#allocation2 + $0x21] sm:$0xff] }
 0x309   : > { %5015 = vst.msk [vmem:[#allocation2 + $0x51] sm:$0xff] %vm4963_vm7, %v4936_v57  ;;  %v7643_v3 = vpop.f32.mrb[8].mxu0  ;;  %v5126_v61 = vpack.c.bf16 %v5094_v41, %v5093_v51 }
 0x30a   : > { %v4909_v24 = vadd.f32 %v7643_v3, %v9945_v30  ;;  %v4765_v43 = vpop.f32.mrb[9].mxu0 }
 0x30b   : > { %v4907_v55 = vadd.f32 %v9945_v30, %v4765_v43  ;;  %v7644_v16 = vpop.f32.mrb[10].mxu0 }
 0x30c   : > { %v4941_v45 = vmax.f32 %v4909_v24, 0.0  ;;  %v4910_v32 = vadd.f32 %v7644_v16, %v9945_v30  ;;  %v4768_v17 = vpop.f32.mrb[11].mxu0 }
 0x30d   : > { %v4939_v22 = vmax.f32 %v4907_v55, 0.0  ;;  %v4908_v15 = vadd.f32 %v9945_v30, %v4768_v17 }
 0x30e   : > { %5020 = vst.msk [vmem:[#allocation2 + $0x91] sm:$0xff] %vm4963_vm7, %v4941_v45  ;;  %v4942_v48 = vmax.f32 %v4910_v32, 0.0  ;;  %v10007_v32 = vsel %vm4963_vm7, %v5126_v61, 0  ;;  %v5097_v46 = vld [vmem:[#allocation2 + $0x49] sm:$0xff] }
 0x30f   : > { %5018 = vst.msk [vmem:[#allocation2 + $0x79] sm:$0xff] %vm4963_vm7, %v4939_v22  ;;  %v4940_v63 = vmax.f32 %v4908_v15, 0.0 }
 0x310   : > { %5021 = vst.msk [vmem:[#allocation2 + $0x99] sm:$0xff] %vm4963_vm7, %v4942_v48 }
 0x311   : > { %5019 = vst.msk [vmem:[#allocation2 + $0x81] sm:$0xff] %vm4963_vm7, %v4940_v63  ;;  %v7647_v34 = vpop.f32.mrb[12].mxu0  ;;  %v5096_v63 = vld [vmem:[#allocation2 + $0x39] sm:$0xff] }
 0x312   : > { %v4913_v26 = vadd.f32 %v7647_v34, %v9945_v30  ;;  %v4781_v27 = vpop.f32.mrb[13].mxu0 }
 0x313   : > { %v4911_v49 = vadd.f32 %v9945_v30, %v4781_v27  ;;  %v7648_v59 = vpop.f32.mrb[14].mxu0 }
 0x314   : > { %v4945_v19 = vmax.f32 %v4913_v26, 0.0  ;;  %v4914_v4 = vadd.f32 %v7648_v59, %v9945_v30  ;;  %v4784_v62 = vpop.f32.mrb[15].mxu0 }
 0x315   : > { %v4943_v23 = vmax.f32 %v4911_v49, 0.0  ;;  %v4912_v5 = vadd.f32 %v9945_v30, %v4784_v62  ;;  %v5095_v49 = vld [vmem:[#allocation2 + $0x31] sm:$0xff] }
 0x316   : > { %5024 = vst.msk [vmem:[#allocation2 + $0xc1] sm:$0xff] %vm4963_vm7, %v4945_v19  ;;  %v4946_v10 = vmax.f32 %v4914_v4, 0.0  ;;  %v5127_v19 = vpack.c.bf16 %v5096_v63, %v5095_v49  ;;  %v10080_v49 = vld [vmem:[%s10409_s3] sm:$0xf] }
 0x317   : > { %5022 = vst.msk [vmem:[#allocation2 + $0xa9] sm:$0xff] %vm4963_vm7, %v4943_v23  ;;  %v4944_v18 = vmax.f32 %v4912_v5, 0.0  ;;  %v5104_v51 = vld [vmem:[#allocation2 + $0x99] sm:$0xff] }
 0x318   : > { %5025 = vst.msk [vmem:[#allocation2 + $0xc9] sm:$0xff] %vm4963_vm7, %v4946_v10  ;;  %v10023_v25 = vsel %vm4963_vm7, %v5127_v19, 0 }
 0x319   : > { %5023 = vst.msk [vmem:[#allocation2 + $0xb1] sm:$0xff] %vm4963_vm7, %v4944_v18  ;;  %v7651_v2 = vpop.f32.mrb[16].mxu0 }
 0x31a   : > { %v4917_v38 = vadd.f32 %v7651_v2, %v9945_v30  ;;  %v4797_v40 = vpop.f32.mrb[17].mxu0 }
 0x31b   : > { %v4915_v37 = vadd.f32 %v9945_v30, %v4797_v40  ;;  %v7652_v14 = vpop.f32.mrb[18].mxu0 }
 0x31c   : > { %v4949_v13 = vmax.f32 %v4917_v38, 0.0  ;;  %v4918_v1 = vadd.f32 %v7652_v14, %v9945_v30  ;;  %v4800_v29 = vpop.f32.mrb[19].mxu0  ;;  %v5098_v14 = vld [vmem:[#allocation2 + $0x51] sm:$0xff] }
 0x31d   : > { %v4947_v11 = vmax.f32 %v4915_v37, 0.0  ;;  %v4916_v6 = vadd.f32 %v9945_v30, %v4800_v29  ;;  %v5107_v31 = vld [vmem:[#allocation2 + $0xc1] sm:$0xff] }
 0x31e   : > { %5028 = vst.msk [vmem:[#allocation2 + $0xf1] sm:$0xff] %vm4963_vm7, %v4949_v13  ;;  %v4950_v35 = vmax.f32 %v4918_v1, 0.0 }
 0x31f   : > { %5026 = vst.msk [vmem:[#allocation2 + $0xd9] sm:$0xff] %vm4963_vm7, %v4947_v11  ;;  %v4948_v28 = vmax.f32 %v4916_v6, 0.0  ;;  %v5108_v39 = vld [vmem:[#allocation2 + $0xc9] sm:$0xff]  ;;  %v5128_v6 = vpack.c.bf16 %v5098_v14, %v5097_v46 }
 0x320   : > { %5029 = vst.msk [vmem:[#allocation2 + $0xf9] sm:$0xff] %vm4963_vm7, %v4950_v35  ;;  %v9986_v60 = vpack.c.bf16 %v5108_v39, %v5107_v31  ;;  %v5100_v39 = vld [vmem:[#allocation2 + $0x69] sm:$0xff] }
 0x321   : > { %5027 = vst.msk [vmem:[#allocation2 + $0xe1] sm:$0xff] %vm4963_vm7, %v4948_v28  ;;  %v7655_v56 = vpop.f32.mrb[20].mxu0  ;;  %v10037_v31 = vsel %vm4963_vm7, %v5128_v6, 0  ;;  %v5048_v46 = vld [vmem:[#allocation2 + $0x48] sm:$0xff] }
 0x322   : > { %v4921_v8 = vadd.f32 %v7655_v56, %v9945_v30  ;;  %v4813_v7 = vpop.f32.mrb[21].mxu0  ;;  %7921 = vmatprep.subr.msk.bf16.mxu1 %vm4963_vm7, %v9986_v60 }
 0x323   : > { %v4919_v58 = vadd.f32 %v9945_v30, %v4813_v7  ;;  %v7656_v9 = vpop.f32.mrb[22].mxu0  ;;  %7180 = vmatpush3.bf16.xpose.msra.mxu1 %v5145_v33  ;;  %v5099_v33 = vld [vmem:[#allocation2 + $0x61] sm:$0xff] }
 0x324   : > { %v4953_v0 = vmax.f32 %v4921_v8, 0.0  ;;  %v4922_v44 = vadd.f32 %v7656_v9, %v9945_v30  ;;  %v4816_v36 = vpop.f32.mrb[23].mxu0  ;;  %v5129_v56 = vpack.c.bf16 %v5100_v39, %v5099_v33  ;;  %v5051_v33 = vld [vmem:[#allocation2 + $0x68] sm:$0xff] }
 0x325   : > { %v4951_v12 = vmax.f32 %v4919_v58, 0.0  ;;  %v4920_v50 = vadd.f32 %v9945_v30, %v4816_v36  ;;  %v5111_v55 = vld [vmem:[#allocation2 + $0xf1] sm:$0xff] }
 0x326   : > { %5032 = vst.msk [vmem:[#allocation2 + $0x121] sm:$0xff] %vm4963_vm7, %v4953_v0  ;;  %v4954_v20 = vmax.f32 %v4922_v44, 0.0  ;;  %v5109_v21 = vld [vmem:[#allocation2 + $0xd9] sm:$0xff]  ;;  %v10045_v58 = vsel %vm4963_vm7, %v5129_v56, 0  ;;  %v5102_v0 = vld [vmem:[#allocation2 + $0x81] sm:$0xff] }
 0x327   : > { %5030 = vst.msk [vmem:[#allocation2 + $0x109] sm:$0xff] %vm4963_vm7, %v4951_v12  ;;  %v4952_v53 = vmax.f32 %v4920_v50, 0.0  ;;  %v5112_v52 = vld [vmem:[#allocation2 + $0xf9] sm:$0xff] }
 0x328   : > { %5033 = vst.msk [vmem:[#allocation2 + $0x129] sm:$0xff] %vm4963_vm7, %v4954_v20  ;;  %v5110_v54 = vld [vmem:[#allocation2 + $0xe1] sm:$0xff]  ;;  %v10009_v17 = vpack.c.bf16 %v5112_v52, %v5111_v55  ;;  %v5101_v44 = vld [vmem:[#allocation2 + $0x79] sm:$0xff] }
 0x329   : > { %5031 = vst.msk [vmem:[#allocation2 + $0x111] sm:$0xff] %vm4963_vm7, %v4952_v53  ;;  %v7659_v57 = vpop.f32.mrb[24].mxu0  ;;  %v10000_v3 = vpack.c.bf16 %v5110_v54, %v5109_v21  ;;  %v5130_v36 = vpack.c.bf16 %v5102_v0, %v5101_v44  ;;  %v5103_v53 = vld [vmem:[#allocation2 + $0x91] sm:$0xff]  ;;  %v5050_v56 = vld [vmem:[#allocation2 + $0x60] sm:$0xff] }
 0x32a   : > { %v4925_v24 = vadd.f32 %v7659_v57, %v9945_v30  ;;  %v4829_v43 = vpop.f32.mrb[25].mxu0  ;;  %v5131_v61 = vpack.c.bf16 %v5104_v51, %v5103_v53 }
 0x32b   : > { %v4923_v16 = vadd.f32 %v9945_v30, %v4829_v43  ;;  %v7660_v45 = vpop.f32.mrb[26].mxu0  ;;  %7922 = vmatprep.subr.msk.bf16.mxu1 %vm4963_vm7, %v10000_v3  ;;  %v10053_v50 = vsel %vm4963_vm7, %v5130_v36, 0  ;;  %v5105_v43 = vld [vmem:[#allocation2 + $0xa9] sm:$0xff] }
 0x32c   : > { %v4957_v22 = vmax.f32 %v4925_v24, 0.0  ;;  %v4926_v15 = vadd.f32 %v7660_v45, %v9945_v30  ;;  %v4832_v48 = vpop.f32.mrb[27].mxu0  ;;  %7182 = vmatpush3.bf16.xpose.msra.mxu1 %v10007_v32  ;;  %v10061_v52 = vsel %vm4963_vm7, %v5131_v61, 0  ;;  %v5106_v24 = vld [vmem:[#allocation2 + $0xb1] sm:$0xff]  ;;  %v5058_v45 = vld [vmem:[#allocation2 + $0xc0] sm:$0xff] }
 0x32d   : > { %v4955_v34 = vmax.f32 %v4923_v16, 0.0  ;;  %v4924_v26 = vadd.f32 %v9945_v30, %v4832_v48  ;;  %7923 = vmatprep.subr.msk.bf16.mxu1 %vm4963_vm7, %v10009_v17  ;;  %v5115_v28 = vld [vmem:[#allocation2 + $0x121] sm:$0xff]  ;;  %v5132_v55 = vpack.c.bf16 %v5106_v24, %v5105_v43  ;;  %v5055_v24 = vld [vmem:[#allocation2 + $0x98] sm:$0xff]  ;;  %v5054_v43 = vld [vmem:[#allocation2 + $0x90] sm:$0xff] }
 0x32e   : > { %5036 = vst.msk [vmem:[#allocation2 + $0x151] sm:$0xff] %vm4963_vm7, %v4957_v22  ;;  %v4958_v27 = vmax.f32 %v4926_v15, 0.0  ;;  %v5113_v10 = vld [vmem:[#allocation2 + $0x109] sm:$0xff]  ;;  %v5042_v22 = vld [vmem:[#allocation2] sm:$0xff] }
 0x32f   : > { %5034 = vst.msk [vmem:[#allocation2 + $0x139] sm:$0xff] %vm4963_vm7, %v4955_v34  ;;  %v4956_v59 = vmax.f32 %v4924_v26, 0.0  ;;  %v5116_v35 = vld [vmem:[#allocation2 + $0x129] sm:$0xff]  ;;  %v10069_v48 = vsel %vm4963_vm7, %v5132_v55, 0  ;;  %v5061_v26 = vld [vmem:[#allocation2 + $0xe0] sm:$0xff]  ;;  %v5081_v55 = vpack.c.bf16 %v5055_v24, %v5054_v43  ;;  %v5332_v24 = vld [vmem:[#allocation2 + $0x52] sm:$0xff] }
 0x330   : > { %5037 = vst.msk [vmem:[#allocation2 + $0x159] sm:$0xff] %vm4963_vm7, %v4958_v27  ;;  %v5114_v4 = vld [vmem:[#allocation2 + $0x111] sm:$0xff]  ;;  %v5059_v16 = vld [vmem:[#allocation2 + $0xc8] sm:$0xff] }
 0x331   : > { %5035 = vst.msk [vmem:[#allocation2 + $0x141] sm:$0xff] %vm4963_vm7, %v4956_v59  ;;  %v7663_v62 = vpop.f32.mrb[28].mxu0  ;;  %v10025_v42 = vpack.c.bf16 %v5114_v4, %v5113_v10  ;;  %v5043_v15 = vld [vmem:[#allocation2 + $0x8] sm:$0xff]  ;;  %v10071_v63 = vpack.c.bf16 %v5059_v16, %v5058_v45  ;;  %v5060_v59 = vld [vmem:[#allocation2 + $0xd8] sm:$0xff]  ;;  %v5045_v4 = vld [vmem:[#allocation2 + $0x20] sm:$0xff] }
 0x332   : > { %v4929_v23 = vadd.f32 %v7663_v62, %v9945_v30  ;;  %v4845_v5 = vpop.f32.mrb[29].mxu0  ;;  %v5075_v34 = vpack.c.bf16 %v5043_v15, %v5042_v22  ;;  %v10084_v19 = vpack.c.bf16 %v5061_v26, %v5060_v59  ;;  %v5044_v62 = vld [vmem:[#allocation2 + $0x18] sm:$0xff]  ;;  %v5062_v10 = vld [vmem:[#allocation2 + $0xf0] sm:$0xff]  ;;  %v5064_v14 = vld [vmem:[#allocation2 + $0x108] sm:$0xff]  ;;  %v10131_v22 = vsel %vm4963_vm7, %v5081_v55, 0 }
 0x333   : > { %v4927_v18 = vadd.f32 %v9945_v30, %v4845_v5  ;;  %v7664_v2 = vpop.f32.mrb[30].mxu0  ;;  %v5063_v5 = vld [vmem:[#allocation2 + $0xf8] sm:$0xff]  ;;  %v5067_v6 = vld [vmem:[#allocation2 + $0x128] sm:$0xff] }
 0x334   : > { %v4961_v38 = vmax.f32 %v4929_v23, 0.0  ;;  %v4930_v40 = vadd.f32 %v7664_v2, %v9945_v30  ;;  %v4848_v37 = vpop.f32.mrb[31].mxu0  ;;  %7184 = vmatpush3.bf16.xpose.msra.mxu1 %v10023_v25  ;;  %v5237_v27 = vsel %vm4963_vm7, %v5075_v34, 0  ;;  %v5076_v23 = vpack.c.bf16 %v5045_v4, %v5044_v62  ;;  %v5057_v34 = vld [vmem:[#allocation2 + $0xb0] sm:$0xff]  ;;  %v5056_v26 = vld [vmem:[#allocation2 + $0xa8] sm:$0xff] }
 0x335   : > { %v4959_v13 = vmax.f32 %v4927_v18, 0.0  ;;  %v4928_v1 = vadd.f32 %v9945_v30, %v4848_v37  ;;  %7924 = vmatprep.subr.msk.bf16.mxu1 %vm4963_vm7, %v10025_v42  ;;  %v10039_v30 = vpack.c.bf16 %v5116_v35, %v5115_v28  ;;  %v5119_v12 = vld [vmem:[#allocation2 + $0x151] sm:$0xff]  ;;  %v10093_v2 = vpack.c.bf16 %v5063_v5, %v5062_v10  ;;  %v5066_v35 = vld [vmem:[#allocation2 + $0x120] sm:$0xff] }
 0x336   : > { %5040 = vst.msk [vmem:[#allocation2 + $0x181] sm:$0xff] %vm4963_vm7, %v4961_v38  ;;  %v4962_v29 = vmax.f32 %v4930_v40, 0.0  ;;  %v5117_v7 = vld [vmem:[#allocation2 + $0x139] sm:$0xff]  ;;  %v10091_v18 = vsel %vm4963_vm7, %v5076_v23, 0  ;;  %v5046_v38 = vld [vmem:[#allocation2 + $0x30] sm:$0xff]  ;;  %v10109_v39 = vpack.c.bf16 %v5067_v6, %v5066_v35  ;;  %v5341_v59 = vld [vmem:[#allocation2 + $0xc2] sm:$0xff] }
 0x337   : > { %5038 = vst.msk [vmem:[#allocation2 + $0x169] sm:$0xff] %vm4963_vm7, %v4959_v13  ;;  %v4960_v11 = vmax.f32 %v4928_v1, 0.0  ;;  %v5120_v41 = vld [vmem:[#allocation2 + $0x159] sm:$0xff]  ;;  %v5065_v37 = vld [vmem:[#allocation2 + $0x110] sm:$0xff]  ;;  %v5325_v62 = vld [vmem:[#allocation2 + $0x2] sm:$0xff] }
 0x338   : > { %5041 = vst.msk [vmem:[#allocation2 + $0x189] sm:$0xff] %vm4963_vm7, %v4962_v29  ;;  %v5118_v8 = vld [vmem:[#allocation2 + $0x141] sm:$0xff]  ;;  %v10055_v20 = vpack.c.bf16 %v5120_v41, %v5119_v12  ;;  %v10101_v1 = vpack.c.bf16 %v5065_v37, %v5064_v14  ;;  %v5049_v29 = vld [vmem:[#allocation2 + $0x50] sm:$0xff]  ;;  %v5068_v0 = vld [vmem:[#allocation2 + $0x138] sm:$0xff] }
 0x339   : > { %5039 = vst.msk [vmem:[#allocation2 + $0x171] sm:$0xff] %vm4963_vm7, %v4960_v11  ;;  %v10047_v9 = vpack.c.bf16 %v5118_v8, %v5117_v7  ;;  %v5078_v11 = vpack.c.bf16 %v5049_v29, %v5048_v46  ;;  %v5079_v8 = vpack.c.bf16 %v5051_v33, %v5050_v56  ;;  %v5069_v7 = vld [vmem:[#allocation2 + $0x140] sm:$0xff]  ;;  %v5052_v12 = vld [vmem:[#allocation2 + $0x78] sm:$0xff]  ;;  %v5070_v61 = vld [vmem:[#allocation2 + $0x150] sm:$0xff] }
 0x33a   : > { %v10117_v36 = vpack.c.bf16 %v5069_v7, %v5068_v0  ;;  %v5053_v41 = vld [vmem:[#allocation2 + $0x80] sm:$0xff]  ;;  %v5071_v53 = vld [vmem:[#allocation2 + $0x158] sm:$0xff]  ;;  %v5342_v4 = vld [vmem:[#allocation2 + $0xca] sm:$0xff] }
 0x33b   : > { %v10107_v28 = vsel %vm4963_vm7, %v5078_v11, 0  ;;  %v10115_v44 = vsel %vm4963_vm7, %v5079_v8, 0  ;;  %v5080_v51 = vpack.c.bf16 %v5053_v41, %v5052_v12  ;;  %v5326_v23 = vld [vmem:[#allocation2 + $0xa] sm:$0xff]  ;;  %v10141_v10 = vpack.c.bf16 %v5342_v4, %v5341_v59  ;;  %v5327_v46 = vld [vmem:[#allocation2 + $0x1a] sm:$0xff]  ;;  %v5328_v11 = vld [vmem:[#allocation2 + $0x22] sm:$0xff] }
 0x33c   : > { %7186 = vmatpush3.bf16.xpose.msra.mxu1 %v10037_v31  ;;  %v10150_v14 = vld [vmem:[%s10409_s3 + $0x8] sm:$0xf]  ;;  %v5360_v6 = vpack.c.bf16 %v5328_v11, %v5327_v46  ;;  %v5345_v35 = vld [vmem:[#allocation2 + $0xf2] sm:$0xff]  ;;  %v5346_v33 = vld [vmem:[#allocation2 + $0xfa] sm:$0xff] }
 0x33d   : > { %7925 = vmatprep.subr.msk.bf16.mxu1 %vm4963_vm7, %v10039_v30  ;;  %v10163_v8 = vpack.c.bf16 %v5346_v33, %v5345_v35  ;;  %v5330_v7 = vld [vmem:[#allocation2 + $0x3a] sm:$0xff]  ;;  %v5347_v41 = vld [vmem:[#allocation2 + $0x10a] sm:$0xff]  ;;  %v5348_v12 = vld [vmem:[#allocation2 + $0x112] sm:$0xff] }
 0x33e   : > { %v5121_v54 = vld [vmem:[#allocation2 + $0x169] sm:$0xff]  ;;  %v10161_v56 = vsel %vm4963_vm7, %v5360_v6, 0  ;;  %v5351_v4 = vld [vmem:[#allocation2 + $0x13a] sm:$0xff]  ;;  %v5353_v46 = vld [vmem:[#allocation2 + $0x152] sm:$0xff] }
 0x33f   : > { %v5072_v45 = vld [vmem:[#allocation2 + $0x168] sm:$0xff]  ;;  %v5354_v11 = vld [vmem:[#allocation2 + $0x15a] sm:$0xff]  ;;  %v5337_v33 = vld [vmem:[#allocation2 + $0x92] sm:$0xff] }
 0x340   : > { %v5122_v21 = vld [vmem:[#allocation2 + $0x171] sm:$0xff]  ;;  %v5349_v55 = vld [vmem:[#allocation2 + $0x122] sm:$0xff]  ;;  %v10195_v35 = vpack.c.bf16 %v5354_v11, %v5353_v46 }
 0x341   : > { %v10063_v57 = vpack.c.bf16 %v5122_v21, %v5121_v54  ;;  %v10123_v21 = vsel %vm4963_vm7, %v5080_v51, 0  ;;  %v10125_v54 = vpack.c.bf16 %v5071_v53, %v5070_v61  ;;  %v5073_v16 = vld [vmem:[#allocation2 + $0x170] sm:$0xff]  ;;  %v10171_v53 = vpack.c.bf16 %v5348_v12, %v5347_v41 }
 0x342   : > { %v10133_v15 = vpack.c.bf16 %v5073_v16, %v5072_v45  ;;  %v5331_v61 = vld [vmem:[#allocation2 + $0x4a] sm:$0xff]  ;;  %v5356_v41 = vld [vmem:[#allocation2 + $0x172] sm:$0xff] }
 0x343   : > { %v5362_v43 = vpack.c.bf16 %v5332_v24, %v5331_v61  ;;  %v5350_v16 = vld [vmem:[#allocation2 + $0x12a] sm:$0xff] }
 0x344   : > { %7188 = vmatpush3.bf16.xpose.msra.mxu1 %v10045_v58  ;;  %v5339_v24 = vld [vmem:[#allocation2 + $0xaa] sm:$0xff] }
 0x345   : > { %7926 = vmatprep.subr.msk.bf16.mxu1 %vm4963_vm7, %v10047_v9  ;;  %v10177_v45 = vsel %vm4963_vm7, %v5362_v43, 0  ;;  %v5340_v43 = vld [vmem:[#allocation2 + $0xb2] sm:$0xff] }
 0x346   : > { %v6065_v11 = vld [vmem:[#allocation2 + $0x111] sm:$0xff] }
 0x34c   : > { %7190 = vmatpush3.bf16.xpose.msra.mxu1 %v10053_v50 }
 0x34d   : > { %7927 = vmatprep.subr.msk.bf16.mxu1 %vm4963_vm7, %v10055_v20 }
 0x354   : > { %7192 = vmatpush3.bf16.xpose.msra.mxu1 %v10061_v52 }
 0x355   : > { %7928 = vmatprep.subr.msk.bf16.mxu1 %vm4963_vm7, %v10063_v57 }
 0x35c   : > { %7194 = vmatpush3.bf16.xpose.msra.mxu1 %v10069_v48 }
 0x35d   : > { %7929 = vmatprep.subr.msk.bf16.mxu1 %vm4963_vm7, %v10071_v63 }
 0x363   : > { %7196 = vmatmul.mubr.msk.bf16.vlgmr.msra.gmra.mrb[0].mxu1 %vm4963_vm7, %v9938_v47  ;;  %v5047_v47 = vld [vmem:[#allocation2 + $0x38] sm:$0xff] }
 0x364   : > { %7198 = vmatpush3.bf16.xpose.msra.mxu1 %v5237_v27  ;;  %7213 = vmatprep.mubr.msk.bf16.mxu1 %vm4963_vm7, %v10080_v49  ;;  %v5077_v40 = vpack.c.bf16 %v5047_v47, %v5046_v38  ;;  %v5082_v27 = vpack.c.bf16 %v5057_v34, %v5056_v26  ;;  %v5359_v47 = vpack.c.bf16 %v5326_v23, %v5325_v62  ;;  %v5343_v38 = vld [vmem:[#allocation2 + $0xda] sm:$0xff]  ;;  %v5333_v26 = vld [vmem:[#allocation2 + $0x62] sm:$0xff] }
 0x365   : > { %7930 = vmatprep.subr.msk.bf16.mxu1 %vm4963_vm7, %v10084_v19  ;;  %v10179_v34 = vpack.c.bf16 %v5350_v16, %v5349_v55  ;;  %v5352_v62 = vld [vmem:[#allocation2 + $0x142] sm:$0xff]  ;;  %v5366_v55 = vpack.c.bf16 %v5340_v43, %v5339_v24 }
 0x366   : > { %v10099_v13 = vsel %vm4963_vm7, %v5077_v40, 0  ;;  %v10139_v5 = vsel %vm4963_vm7, %v5082_v27, 0  ;;  %v5344_v40 = vld [vmem:[#allocation2 + $0xe2] sm:$0xff]  ;;  %v5379_v37 = vsel %vm4963_vm7, %v5359_v47, 0  ;;  %v5334_v27 = vld [vmem:[#allocation2 + $0x6a] sm:$0xff]  ;;  %v10187_v47 = vpack.c.bf16 %v5352_v62, %v5351_v4 }
 0x367   : > { %v10154_v29 = vpack.c.bf16 %v5344_v40, %v5343_v38  ;;  %v5363_v59 = vpack.c.bf16 %v5334_v27, %v5333_v26  ;;  %v5335_v38 = vld [vmem:[#allocation2 + $0x7a] sm:$0xff]  ;;  %v5336_v40 = vld [vmem:[#allocation2 + $0x82] sm:$0xff]  ;;  %v10209_v16 = vsel %vm4963_vm7, %v5366_v55, 0  ;;  %v7001_v26 = vld [vmem:[%s10409_s3 + $0xc] sm:$0xf] }
 0x368   : > { %v7003_v4 = vld [vmem:[%s10409_s3 + $0x10] sm:$0xf]  ;;  %v6066_v55 = vld [vmem:[#allocation2 + $0x121] sm:$0xff] }
 0x369   : > { %v10185_v23 = vsel %vm4963_vm7, %v5363_v59, 0  ;;  %v10245_v59 = vsel %vm4963_vm7, %v10071_v63, 0  ;;  %v6067_v43 = vld [vmem:[#allocation2 + $0x129] sm:$0xff] }
 0x36c   : > { %7200 = vmatpush3.bf16.xpose.msra.mxu1 %v10091_v18 }
 0x36d   : > { %7931 = vmatprep.subr.msk.bf16.mxu1 %vm4963_vm7, %v10093_v2 }
 0x374   : > { %7202 = vmatpush3.bf16.xpose.msra.mxu1 %v10099_v13 }
 0x375   : > { %7932 = vmatprep.subr.msk.bf16.mxu1 %vm4963_vm7, %v10101_v1 }
 0x37c   : > { %7204 = vmatpush3.bf16.xpose.msra.mxu1 %v10107_v28 }
 0x37d   : > { %7933 = vmatprep.subr.msk.bf16.mxu1 %vm4963_vm7, %v10109_v39 }
 0x384   : > { %7206 = vmatpush3.bf16.xpose.msra.mxu1 %v10115_v44 }
 0x385   : > { %7934 = vmatprep.subr.msk.bf16.mxu1 %vm4963_vm7, %v10117_v36 }
 0x38c   : > { %7208 = vmatpush3.bf16.xpose.msra.mxu1 %v10123_v21 }
 0x38d   : > { %7935 = vmatprep.subr.msk.bf16.mxu1 %vm4963_vm7, %v10125_v54 }
 0x394   : > { %7210 = vmatpush3.bf16.xpose.msra.mxu1 %v10131_v22 }
 0x395   : > { %7936 = vmatprep.subr.msk.bf16.mxu1 %vm4963_vm7, %v10133_v15 }
 0x39c   : > { %7212 = vmatpush3.bf16.xpose.msra.mxu1 %v10139_v5 }
 0x39d   : > { %7937 = vmatprep.subr.msk.bf16.mxu1 %vm4963_vm7, %v10141_v10 }
 0x3a3   : > { %7214 = vmatmul.mubr.msk.bf16.vlgmr.msra.gmra.mrb[4].mxu1 %vm4963_vm7, %v10080_v49  ;;  %v5329_v49 = vld [vmem:[#allocation2 + $0x32] sm:$0xff] }
 0x3a4   : > { %7216 = vmatpush3.bf16.xpose.msra.mxu1 %v5379_v37  ;;  %7231 = vmatprep.mubr.msk.bf16.mxu1 %vm4963_vm7, %v10150_v14  ;;  %v5361_v0 = vpack.c.bf16 %v5330_v7, %v5329_v49  ;;  %v5364_v37 = vpack.c.bf16 %v5336_v40, %v5335_v38  ;;  %v5338_v49 = vld [vmem:[#allocation2 + $0x9a] sm:$0xff] }
 0x3a5   : > { %7938 = vmatprep.subr.msk.bf16.mxu1 %vm4963_vm7, %v10154_v29  ;;  %v5365_v7 = vpack.c.bf16 %v5338_v49, %v5337_v33  ;;  %v10345_v33 = vld [vmem:[%s10409_s3 + $0x1c] sm:$0xf]  ;;  %v6064_v49 = vld [vmem:[#allocation2 + $0x109] sm:$0xff] }
 0x3a6   : > { %v10169_v51 = vsel %vm4963_vm7, %v5361_v0, 0  ;;  %v10193_v6 = vsel %vm4963_vm7, %v5364_v37, 0  ;;  %v5355_v0 = vld [vmem:[#allocation2 + $0x16a] sm:$0xff] }
 0x3a7   : > { %v10201_v12 = vsel %vm4963_vm7, %v5365_v7, 0  ;;  %v10203_v61 = vpack.c.bf16 %v5356_v41, %v5355_v0  ;;  %v6089_v0 = vpack.c.bf16 %v6065_v11, %v6064_v49  ;;  %v6048_v41 = vld [vmem:[#allocation2 + $0x49] sm:$0xff]  ;;  %v6061_v11 = vld [vmem:[#allocation2 + $0xe1] sm:$0xff]  ;;  %v6060_v49 = vld [vmem:[#allocation2 + $0xd9] sm:$0xff] }
 0x3ac   : > { %7218 = vmatpush3.bf16.xpose.msra.mxu1 %v10161_v56 }
 0x3ad   : > { %7939 = vmatprep.subr.msk.bf16.mxu1 %vm4963_vm7, %v10163_v8 }
 0x3b4   : > { %7220 = vmatpush3.bf16.xpose.msra.mxu1 %v10169_v51 }
 0x3b5   : > { %7940 = vmatprep.subr.msk.bf16.mxu1 %vm4963_vm7, %v10171_v53 }
 0x3bc   : > { %7222 = vmatpush3.bf16.xpose.msra.mxu1 %v10177_v45 }
 0x3bd   : > { %7941 = vmatprep.subr.msk.bf16.mxu1 %vm4963_vm7, %v10179_v34 }
 0x3c4   : > { %7224 = vmatpush3.bf16.xpose.msra.mxu1 %v10185_v23 }
 0x3c5   : > { %7942 = vmatprep.subr.msk.bf16.mxu1 %vm4963_vm7, %v10187_v47 }
 0x3cc   : > { %7226 = vmatpush3.bf16.xpose.msra.mxu1 %v10193_v6 }
 0x3cd   : > { %7943 = vmatprep.subr.msk.bf16.mxu1 %vm4963_vm7, %v10195_v35 }
 0x3d4   : > { %7228 = vmatpush3.bf16.xpose.msra.mxu1 %v10201_v12 }
 0x3d5   : > { %7944 = vmatprep.subr.msk.bf16.mxu1 %vm4963_vm7, %v10203_v61 }
 0x3dc   : > { %7230 = vmatpush3.bf16.xpose.msra.mxu1 %v10209_v16 }
 0x3dd   : > { %7945 = vmatprep.subr.msk.bf16.mxu1 %vm4963_vm7, %v10084_v19 }
 0x3e3   : > { %7232 = vmatmul.mubr.msk.bf16.vlgmr.msra.gmra.mrb[8].mxu1 %vm4963_vm7, %v10150_v14  ;;  %v5499_v14 = vld [vmem:[#allocation2 + $0x180] sm:$0xff] }
 0x3e4   : > { %7234 = vmatpush3.bf16.xpose.msra.mxu1 %v10091_v18  ;;  %7249 = vmatprep.mubr.msk.bf16.mxu1 %vm4963_vm7, %v7001_v26  ;;  %v5500_v18 = vld [vmem:[#allocation2 + $0x188] sm:$0xff] }
 0x3e5   : > { %7946 = vmatprep.subr.msk.bf16.mxu1 %vm4963_vm7, %v10093_v2  ;;  %v10238_v27 = vpack.c.bf16 %v5500_v18, %v5499_v14  ;;  %v6090_v18 = vpack.c.bf16 %v6067_v43, %v6066_v55  ;;  %v6051_v14 = vld [vmem:[#allocation2 + $0x69] sm:$0xff]  ;;  %v8086_v43 = vmov 0  }
 0x3e6   : > { %8004 = vset.pattern.permute.xlu0 %v8086_v43 }
 0x3ec   : > { %7236 = vmatpush3.bf16.xpose.msra.mxu1 %v10099_v13 }
 0x3ed   : > { %7947 = vmatprep.subr.msk.bf16.mxu1 %vm4963_vm7, %v10101_v1 }
 0x3f4   : > { %7238 = vmatpush3.bf16.xpose.msra.mxu1 %v10107_v28 }
 0x3f5   : > { %7948 = vmatprep.subr.msk.bf16.mxu1 %vm4963_vm7, %v10109_v39 }
 0x3fc   : > { %7240 = vmatpush3.bf16.xpose.msra.mxu1 %v10115_v44 }
 0x3fd   : > { %7949 = vmatprep.subr.msk.bf16.mxu1 %vm4963_vm7, %v10117_v36 }
 0x404   : > { %7242 = vmatpush3.bf16.xpose.msra.mxu1 %v10123_v21 }
 0x405   : > { %7950 = vmatprep.subr.msk.bf16.mxu1 %vm4963_vm7, %v10125_v54 }
 0x40c   : > { %7244 = vmatpush3.bf16.xpose.msra.mxu1 %v10131_v22 }
 0x40d   : > { %7951 = vmatprep.subr.msk.bf16.mxu1 %vm4963_vm7, %v10133_v15 }
 0x414   : > { %7246 = vmatpush3.bf16.xpose.msra.mxu1 %v10139_v5 }
 0x415   : > { %7952 = vmatprep.subr.msk.bf16.mxu1 %vm4963_vm7, %v10238_v27 }
 0x41c   : > { %7248 = vmatpush3.bf16.xpose.msra.mxu1 %v10245_v59 }
 0x41d   : > { %7953 = vmatprep.subr.msk.bf16.mxu1 %vm4963_vm7, %v10000_v3 }
 0x423   : > { %7250 = vmatmul.mubr.msk.bf16.vlgmr.msra.gmra.mrb[12].mxu1 %vm4963_vm7, %v7001_v26 }
 0x424   : > { %7252 = vmatpush3.bf16.xpose.msra.mxu1 %v10007_v32  ;;  %7267 = vmatprep.mubr.msk.bf16.mxu1 %vm4963_vm7, %v7003_v4  ;;  %v5644_v32 = vld [vmem:[#allocation2 + $0x189] sm:$0xff] }
 0x425   : > { %7954 = vmatprep.subr.msk.bf16.mxu1 %vm4963_vm7, %v10009_v17  ;;  %v5643_v17 = vld [vmem:[#allocation2 + $0x181] sm:$0xff] }
 0x42c   : > { %7254 = vmatpush3.bf16.xpose.msra.mxu1 %v10023_v25  ;;  %v10273_v25 = vpack.c.bf16 %v5644_v32, %v5643_v17  ;;  %v6052_v17 = vld [vmem:[#allocation2 + $0x79] sm:$0xff] }
 0x42d   : > { %7955 = vmatprep.subr.msk.bf16.mxu1 %vm4963_vm7, %v10025_v42  ;;  %v5688_v42 = vsel %vm4963_vm7, %v9986_v60, 0 }
 0x434   : > { %7256 = vmatpush3.bf16.xpose.msra.mxu1 %v10037_v31  ;;  %v7005_v31 = vld [vmem:[%s10409_s3 + $0x14] sm:$0xf] }
 0x435   : > { %7956 = vmatprep.subr.msk.bf16.mxu1 %vm4963_vm7, %v10039_v30 }
 0x436   : > { %v5226_v3 = vpop.f32.mrb[0].mxu1 }
 0x437   : > { %v5228_v63 = vpop.f32.mrb[1].mxu1 }
 0x438   : > { %v5230_v62 = vpop.f32.mrb[2].mxu1 }
 0x439   : > { %v5231_v38 = vpop.f32.mrb[3].mxu1 }
 0x43a   : > { %v6053_v38 = vld [vmem:[#allocation2 + $0x81] sm:$0xff] }
 0x43c   : > { %7258 = vmatpush3.bf16.xpose.msra.mxu1 %v10045_v58 }
 0x43d   : > { %7957 = vmatprep.subr.msk.bf16.mxu1 %vm4963_vm7, %v10047_v9 }
 0x444   : > { %7260 = vmatpush3.bf16.xpose.msra.mxu1 %v10053_v50 }
 0x445   : > { %7958 = vmatprep.subr.msk.bf16.mxu1 %vm4963_vm7, %v10055_v20 }
 0x44c   : > { %7262 = vmatpush3.bf16.xpose.msra.mxu1 %v10061_v52  ;;  %v5787_v52 = vld [vmem:[#allocation2 + $0x182] sm:$0xff] }
 0x44d   : > { %7959 = vmatprep.subr.msk.bf16.mxu1 %vm4963_vm7, %v10063_v57  ;;  %v5788_v57 = vld [vmem:[#allocation2 + $0x18a] sm:$0xff] }
 0x454   : > { %7264 = vmatpush3.bf16.xpose.msra.mxu1 %v10069_v48  ;;  %v10305_v48 = vpack.c.bf16 %v5788_v57, %v5787_v52 }
 0x455   : > { %7960 = vmatprep.subr.msk.bf16.mxu1 %vm4963_vm7, %v10273_v25 }
 0x45c   : > { %7266 = vmatpush3.bf16.xpose.msra.mxu1 %v5688_v42 }
 0x45d   : > { %7961 = vmatprep.subr.msk.bf16.mxu1 %vm4963_vm7, %v10154_v29  ;;  %v5832_v29 = vsel %vm4963_vm7, %v10141_v10, 0 }
 0x463   : > { %7268 = vmatmul.mubr.msk.bf16.vlgmr.msra.gmra.mrb[16].mxu1 %vm4963_vm7, %v7003_v4  ;;  %v6069_v4 = vld [vmem:[#allocation2 + $0x141] sm:$0xff] }
 0x464   : > { %7270 = vmatpush3.bf16.xpose.msra.mxu1 %v10161_v56  ;;  %7285 = vmatprep.mubr.msk.bf16.mxu1 %vm4963_vm7, %v7005_v31  ;;  %v7007_v56 = vld [vmem:[%s10409_s3 + $0x18] sm:$0xf] }
 0x465   : > { %7962 = vmatprep.subr.msk.bf16.mxu1 %vm4963_vm7, %v10163_v8 }
 0x46c   : > { %7272 = vmatpush3.bf16.xpose.msra.mxu1 %v10169_v51 }
 0x46d   : > { %7963 = vmatprep.subr.msk.bf16.mxu1 %vm4963_vm7, %v10171_v53 }
 0x474   : > { %7274 = vmatpush3.bf16.xpose.msra.mxu1 %v10177_v45 }
 0x475   : > { %7964 = vmatprep.subr.msk.bf16.mxu1 %vm4963_vm7, %v10179_v34 }
 0x476   : > { %v5318_v60 = vpop.f32.mrb[4].mxu1 }
 0x477   : > { %v5319_v30 = vadd.f32 %v5318_v60, %v5226_v3  ;;  %v5320_v58 = vpop.f32.mrb[5].mxu1  ;;  %v6068_v3 = vld [vmem:[#allocation2 + $0x139] sm:$0xff]  ;;  %v6083_v60 = vpack.c.bf16 %v6053_v38, %v6052_v17 }
 0x478   : > { %v5321_v9 = vadd.f32 %v5320_v58, %v5228_v63  ;;  %v5322_v50 = vpop.f32.mrb[6].mxu1  ;;  %v6091_v62 = vpack.c.bf16 %v6069_v4, %v6068_v3 }
 0x479   : > { %v5323_v20 = vpop.f32.mrb[7].mxu1  ;;  %v6109_v52 = vsel %vm4963_vm7, %v6083_v60, 0 }
 0x47a   : > { %v6070_v20 = vld [vmem:[#allocation2 + $0x151] sm:$0xff] }
 0x47c   : > { %7276 = vmatpush3.bf16.xpose.msra.mxu1 %v10185_v23 }
 0x47d   : > { %7965 = vmatprep.subr.msk.bf16.mxu1 %vm4963_vm7, %v10187_v47 }
 0x484   : > { %7278 = vmatpush3.bf16.xpose.msra.mxu1 %v10193_v6 }
 0x485   : > { %7966 = vmatprep.subr.msk.bf16.mxu1 %vm4963_vm7, %v10195_v35 }
 0x48c   : > { %7280 = vmatpush3.bf16.xpose.msra.mxu1 %v10201_v12 }
 0x48d   : > { %7967 = vmatprep.subr.msk.bf16.mxu1 %vm4963_vm7, %v10203_v61 }
 0x494   : > { %7282 = vmatpush3.bf16.xpose.msra.mxu1 %v10209_v16 }
 0x495   : > { %7968 = vmatprep.subr.msk.bf16.mxu1 %vm4963_vm7, %v10305_v48 }
 0x49c   : > { %7284 = vmatpush3.bf16.xpose.msra.mxu1 %v5832_v29  ;;  %v6055_v29 = vld [vmem:[#allocation2 + $0x99] sm:$0xff] }
 0x49d   : > { %7969 = vmatprep.subr.msk.bf16.mxu1 %vm4963_vm7, %v10093_v2 }
 0x4a3   : > { %7286 = vmatmul.mubr.msk.bf16.vlgmr.msra.gmra.mrb[20].mxu1 %vm4963_vm7, %v7005_v31 }
 0x4a4   : > { %7288 = vmatpush3.bf16.xpose.msra.mxu1 %v10099_v13  ;;  %7303 = vmatprep.mubr.msk.bf16.mxu1 %vm4963_vm7, %v7007_v56 }
 0x4a5   : > { %7970 = vmatprep.subr.msk.bf16.mxu1 %vm4963_vm7, %v10101_v1  ;;  %v5932_v1 = vld [vmem:[#allocation2 + $0x198] sm:$0xff] }
 0x4ac   : > { %7290 = vmatpush3.bf16.xpose.msra.mxu1 %v10107_v28  ;;  %v5933_v28 = vld [vmem:[#allocation2 + $0x1a0] sm:$0xff] }
 0x4ad   : > { %7971 = vmatprep.subr.msk.bf16.mxu1 %vm4963_vm7, %v10109_v39  ;;  %v5951_v39 = vpack.c.bf16 %v5933_v28, %v5932_v1  ;;  %v6056_v1 = vld [vmem:[#allocation2 + $0xa9] sm:$0xff] }
 0x4b4   : > { %7292 = vmatpush3.bf16.xpose.msra.mxu1 %v10115_v44  ;;  %v6063_v44 = vld [vmem:[#allocation2 + $0xf9] sm:$0xff] }
 0x4b5   : > { %7972 = vmatprep.subr.msk.bf16.mxu1 %vm4963_vm7, %v10117_v36  ;;  %v6062_v36 = vld [vmem:[#allocation2 + $0xf1] sm:$0xff] }
 0x4b6   : > { %v5460_v2 = vpop.f32.mrb[8].mxu1 }
 0x4b7   : > { %v5467_v10 = vadd.f32 %v5460_v2, %v5319_v30  ;;  %v5462_v40 = vpop.f32.mrb[9].mxu1 }
 0x4b8   : > { %v5468_v37 = vadd.f32 %v5462_v40, %v5321_v9  ;;  %v5464_v13 = vpop.f32.mrb[10].mxu1  ;;  %v6071_v9 = vld [vmem:[#allocation2 + $0x159] sm:$0xff]  ;;  %v6073_v40 = vld [vmem:[#allocation2 + $0x171] sm:$0xff] }
 0x4b9   : > { %v5465_v46 = vpop.f32.mrb[11].mxu1  ;;  %v6092_v57 = vpack.c.bf16 %v6071_v9, %v6070_v20  ;;  %v6072_v13 = vld [vmem:[#allocation2 + $0x169] sm:$0xff] }
 0x4ba   : > { %v6093_v46 = vpack.c.bf16 %v6073_v40, %v6072_v13 }
 0x4bc   : > { %7294 = vmatpush3.bf16.xpose.msra.mxu1 %v10123_v21  ;;  %v5977_v21 = vsel %vm4963_vm7, %v10084_v19, 0  ;;  %v6049_v19 = vld [vmem:[#allocation2 + $0x51] sm:$0xff] }
 0x4bd   : > { %7973 = vmatprep.subr.msk.bf16.mxu1 %vm4963_vm7, %v10125_v54  ;;  %v6088_v54 = vpack.c.bf16 %v6063_v44, %v6062_v36  ;;  %v6081_v24 = vpack.c.bf16 %v6049_v19, %v6048_v41  ;;  %v6059_v44 = vld [vmem:[#allocation2 + $0xc9] sm:$0xff]  ;;  %v6058_v36 = vld [vmem:[#allocation2 + $0xc1] sm:$0xff] }
 0x4bf   : > { %v6103_v26 = vsel %vm4963_vm7, %v6081_v24, 0  ;;  %v6334_v24 = vld [vmem:[%s10410_s4] sm:$0xff] }
 0x4c0   : > { %6337 = vperm.xlu0 %8004, %v6334_v24  }
 0x4c4   : > { %7296 = vmatpush3.bf16.xpose.msra.mxu1 %v10131_v22  ;;  %v6047_v22 = vld [vmem:[#allocation2 + $0x39] sm:$0xff] }
 0x4c5   : > { %7974 = vmatprep.subr.msk.bf16.mxu1 %vm4963_vm7, %v10133_v15  ;;  %v6046_v15 = vld [vmem:[#allocation2 + $0x31] sm:$0xff] }
 0x4cc   : > { %7298 = vmatpush3.bf16.xpose.msra.mxu1 %v10139_v5  ;;  %v6080_v5 = vpack.c.bf16 %v6047_v22, %v6046_v15  ;;  %v6086_v22 = vpack.c.bf16 %v6059_v44, %v6058_v36 }
 0x4cd   : > { %7975 = vmatprep.subr.msk.bf16.mxu1 %vm4963_vm7, %v10238_v27  ;;  %v6050_v27 = vld [vmem:[#allocation2 + $0x61] sm:$0xff] }
 0x4ce   : > { %v6100_v7 = vsel %vm4963_vm7, %v6080_v5, 0  ;;  %v6118_v5 = vsel %vm4963_vm7, %v6086_v22, 0 }
 0x4d4   : > { %7300 = vmatpush3.bf16.xpose.msra.mxu1 %v10245_v59  ;;  %v6082_v59 = vpack.c.bf16 %v6051_v14, %v6050_v27 }
 0x4d5   : > { %7976 = vmatprep.subr.msk.bf16.mxu1 %vm4963_vm7, %v5951_v39 }
 0x4d6   : > { %v6106_v63 = vsel %vm4963_vm7, %v6082_v59, 0 }
 0x4dc   : > { %7302 = vmatpush3.bf16.xpose.msra.mxu1 %v5977_v21  ;;  %v6076_v21 = vld [vmem:[#allocation2 + $0x199] sm:$0xff] }
 0x4dd   : > { %7977 = vmatprep.subr.msk.bf16.mxu1 %vm4963_vm7, %v6088_v54  ;;  %v6077_v54 = vld [vmem:[#allocation2 + $0x1a1] sm:$0xff] }
 0x4de   : > { %v6095_v15 = vpack.c.bf16 %v6077_v54, %v6076_v21 }
 0x4e3   : > { %7304 = vmatmul.mubr.msk.bf16.vlgmr.msra.gmra.mrb[24].mxu1 %vm4963_vm7, %v7007_v56  ;;  %v6054_v56 = vld [vmem:[#allocation2 + $0x91] sm:$0xff] }
 0x4e4   : > { %7306 = vmatpush3.bf16.xpose.msra.mxu1 %v6100_v7  ;;  %7321 = vmatprep.mubr.msk.bf16.mxu1 %vm4963_vm7, %v10345_v33  ;;  %v6084_v2 = vpack.c.bf16 %v6055_v29, %v6054_v56  ;;  %v6087_v7 = vpack.c.bf16 %v6061_v11, %v6060_v49 }
 0x4e5   : > { %7978 = vmatprep.subr.msk.bf16.mxu1 %vm4963_vm7, %v6089_v0 }
 0x4e6   : > { %v6121_v0 = vsel %vm4963_vm7, %v6087_v7, 0 }
 0x4ec   : > { %7308 = vmatpush3.bf16.xpose.msra.mxu1 %v6103_v26 }
 0x4ed   : > { %7979 = vmatprep.subr.msk.bf16.mxu1 %vm4963_vm7, %v6090_v18  ;;  %v6205_v18 = vld [vmem:[#allocation2 + $0xe2] sm:$0xff] }
 0x4f4   : > { %7310 = vmatpush3.bf16.xpose.msra.mxu1 %v6106_v63 }
 0x4f5   : > { %7980 = vmatprep.subr.msk.bf16.mxu1 %vm4963_vm7, %v6091_v62 }
 0x4f6   : > { %v5604_v32 = vpop.f32.mrb[12].mxu1 }
 0x4f7   : > { %v5611_v42 = vadd.f32 %v5604_v32, %v5467_v10  ;;  %v5606_v31 = vpop.f32.mrb[13].mxu1  ;;  %v6112_v10 = vsel %vm4963_vm7, %v6084_v2, 0 }
 0x4f8   : > { %v5612_v30 = vadd.f32 %v5606_v31, %v5468_v37  ;;  %v5608_v58 = vpop.f32.mrb[14].mxu1  ;;  %v6057_v37 = vld [vmem:[#allocation2 + $0xb1] sm:$0xff] }
 0x4f9   : > { %v5609_v50 = vpop.f32.mrb[15].mxu1  ;;  %v6085_v28 = vpack.c.bf16 %v6057_v37, %v6056_v1 }
 0x4fb   : > { %v6115_v39 = vsel %vm4963_vm7, %v6085_v28, 0 }
 0x4fc   : > { %7312 = vmatpush3.bf16.xpose.msra.mxu1 %v6109_v52 }
 0x4fd   : > { %7981 = vmatprep.subr.msk.bf16.mxu1 %vm4963_vm7, %v6092_v57 }
 0x504   : > { %7314 = vmatpush3.bf16.xpose.msra.mxu1 %v6112_v10 }
 0x505   : > { %7982 = vmatprep.subr.msk.bf16.mxu1 %vm4963_vm7, %v6093_v46 }
 0x50c   : > { %7316 = vmatpush3.bf16.xpose.msra.mxu1 %v6115_v39 }
 0x50d   : > { %7983 = vmatprep.subr.msk.bf16.mxu1 %vm4963_vm7, %v10273_v25  ;;  %v7011_v25 = vld [vmem:[%s10409_s3 + $0x20] sm:$0xf] }
 0x514   : > { %7318 = vmatpush3.bf16.xpose.msra.mxu1 %v6118_v5 }
 0x515   : > { %7984 = vmatprep.subr.msk.bf16.mxu1 %vm4963_vm7, %v6095_v15 }
 0x51c   : > { %7320 = vmatpush3.bf16.xpose.msra.mxu1 %v6121_v0 }
 0x51d   : > { %7985 = vmatprep.subr.msk.bf16.mxu1 %vm4963_vm7, %v10163_v8 }
 0x523   : > { %7322 = vmatmul.mubr.msk.bf16.vlgmr.msra.gmra.mrb[28].mxu1 %vm4963_vm7, %v10345_v33 }
 0x524   : > { %7324 = vmatpush3.bf16.xpose.msra.mxu1 %v10169_v51  ;;  %7339 = vmatprep.mubr.msk.bf16.mxu1 %vm4963_vm7, %v7011_v25 }
 0x525   : > { %7986 = vmatprep.subr.msk.bf16.mxu1 %vm4963_vm7, %v10171_v53 }
 0x52c   : > { %7326 = vmatpush3.bf16.xpose.msra.mxu1 %v10177_v45  ;;  %v6202_v45 = vld [vmem:[#allocation2 + $0xc2] sm:$0xff] }
 0x52d   : > { %7987 = vmatprep.subr.msk.bf16.mxu1 %vm4963_vm7, %v10179_v34  ;;  %v6203_v34 = vld [vmem:[#allocation2 + $0xca] sm:$0xff] }
 0x52e   : > { %v6230_v55 = vpack.c.bf16 %v6203_v34, %v6202_v45 }
 0x534   : > { %7328 = vmatpush3.bf16.xpose.msra.mxu1 %v10185_v23  ;;  %v6220_v23 = vld [vmem:[#allocation2 + $0x19a] sm:$0xff] }
 0x535   : > { %7988 = vmatprep.subr.msk.bf16.mxu1 %vm4963_vm7, %v10187_v47  ;;  %v6221_v47 = vld [vmem:[#allocation2 + $0x1a2] sm:$0xff] }
 0x536   : > { %v5748_v8 = vpop.f32.mrb[16].mxu1  ;;  %v6239_v26 = vpack.c.bf16 %v6221_v47, %v6220_v23 }
 0x537   : > { %v5755_v19 = vadd.f32 %v5748_v8, %v5611_v42  ;;  %v5750_v33 = vpop.f32.mrb[17].mxu1 }
 0x538   : > { %v5756_v41 = vadd.f32 %v5750_v33, %v5612_v30  ;;  %v5752_v51 = vpop.f32.mrb[18].mxu1 }
 0x539   : > { %v5753_v53 = vpop.f32.mrb[19].mxu1 }
 0x53c   : > { %7330 = vmatpush3.bf16.xpose.msra.mxu1 %v10193_v6  ;;  %v6262_v6 = vsel %vm4963_vm7, %v6230_v55, 0 }
 0x53d   : > { %7989 = vmatprep.subr.msk.bf16.mxu1 %vm4963_vm7, %v10195_v35  ;;  %v6204_v35 = vld [vmem:[#allocation2 + $0xda] sm:$0xff] }
 0x53f   : > { %v6338_v20 = vpop.permute.xlu0 %6337 }
 0x544   : > { %7332 = vmatpush3.bf16.xpose.msra.mxu1 %v10201_v12  ;;  %v6231_v12 = vpack.c.bf16 %v6205_v18, %v6204_v35 }
 0x545   : > { %7990 = vmatprep.subr.msk.bf16.mxu1 %vm4963_vm7, %v10203_v61 }
 0x546   : > { %v6265_v61 = vsel %vm4963_vm7, %v6231_v12, 0 }
 0x54c   : > { %7334 = vmatpush3.bf16.xpose.msra.mxu1 %v10209_v16 }
 0x54d   : > { %7991 = vmatprep.subr.msk.bf16.mxu1 %vm4963_vm7, %v10305_v48 }
 0x554   : > { %7336 = vmatpush3.bf16.xpose.msra.mxu1 %v6262_v6 }
 0x555   : > { %7992 = vmatprep.subr.msk.bf16.mxu1 %vm4963_vm7, %v6239_v26 }
 0x55c   : > { %7338 = vmatpush3.bf16.xpose.msra.mxu1 %v6265_v61 }
 0x563   : > { %7340 = vmatmul.mubr.msk.bf16.vlgmr.msra.gmra.mrb[32].mxu1 %vm4963_vm7, %v7011_v25 }
 0x576   : > { %v5892_v16 = vpop.f32.mrb[20].mxu1 }
 0x577   : > { %v5899_v14 = vadd.f32 %v5892_v16, %v5755_v19  ;;  %v5894_v48 = vpop.f32.mrb[21].mxu1 }
 0x578   : > { %v5900_v27 = vadd.f32 %v5894_v48, %v5756_v41  ;;  %v5896_v59 = vpop.f32.mrb[22].mxu1 }
 0x579   : > { %v5897_v4 = vpop.f32.mrb[23].mxu1 }
 0x5b6   : > { %v6037_v3 = vpop.f32.mrb[24].mxu1 }
 0x5b7   : > { %v6044_v63 = vadd.f32 %v6037_v3, %v5899_v14  ;;  %v6039_v62 = vpop.f32.mrb[25].mxu1 }
 0x5b8   : > { %v6045_v38 = vadd.f32 %v6039_v62, %v5900_v27  ;;  %v6041_v32 = vpop.f32.mrb[26].mxu1 }
 0x5b9   : > { %v6042_v17 = vpop.f32.mrb[27].mxu1 }
 0x5f6   : > { %v6181_v42 = vpop.f32.mrb[28].mxu1 }
 0x5f7   : > { %v6188_v31 = vadd.f32 %v6181_v42, %v6044_v63  ;;  %v6183_v60 = vpop.f32.mrb[29].mxu1 }
 0x5f8   : > { %v6189_v30 = vadd.f32 %v6183_v60, %v6045_v38  ;;  %v6185_v58 = vpop.f32.mrb[30].mxu1 }
 0x5f9   : > { %v6186_v9 = vpop.f32.mrb[31].mxu1 }
 0x636   : > { %v6325_v50 = vpop.f32.mrb[32].mxu1 }
 0x637   : > { %v6332_v52 = vadd.f32 %v6325_v50, %v6188_v31  ;;  %v6327_v57 = vpop.f32.mrb[33].mxu1 }
 0x638   : > { %v6333_v29 = vadd.f32 %v6327_v57, %v6189_v30  ;;  %v6329_v56 = vpop.f32.mrb[34].mxu1 }
 0x639   : > { %v6340_v2 = vadd.f32 %v6338_v20, %v6332_v52  ;;  %v6330_v40 = vpop.f32.mrb[35].mxu1 }
 0x63a   : > { %v6341_v13 = vadd.f32 %v6338_v20, %v6333_v29 }
 0x63c   : > { %v6344_v10 = vcombine.low %v6340_v2, %v6341_v13 }
 0x63e   : > { %7013 = vst.sshfl [vmem:[%s224_s14] sm:$0x33 pattern:$0x76325410] %v6344_v10 }
 0x63f PF: > { %s15_s18 = sadd.s32 1, %s8083_s18  }
 0x640   : > { %p12_p4 = scmp.ge.s32.totalorder %s15_s18, 4  }
 0x642   :  { %14 = sbr.rel (!%p12_p4) target bundleno = 1 (0x1), region = 91 }

</bundles_post_ra>
